<compile_context>
chip_gen: v5e
topology: v5e:2x2
jax: 0.10.0
libtpu: 0.0.40
codegen_flags: <defaults>
</compile_context>

<pallas_src>
import functools
import math

import jax
import jax.numpy as jnp
from jax.experimental import pallas as pl
from jax.experimental.pallas import tpu as pltpu


# ----------------------------------------------------------------------------------
# In-kernel helpers
# ----------------------------------------------------------------------------------
def _dw3x3_same(x1, taps, scale, bias, pad_ref):
    """3x3 depthwise conv (stride 1, SAME) + folded BN + ReLU on a (H, W, C) value.

    Zero padding is realized through a VMEM scratch whose interior is stored at a
    sublane-aligned offset (8); the 9 taps are unrolled VPU multiply-accumulates.
    """
    H, W, C = x1.shape
    pad_ref[...] = jnp.zeros_like(pad_ref)           # zero halo
    pad_ref[1:H + 1, 8:8 + W, :] = x1                # aligned sublane store (offset 8)
    acc = None
    for t in range(9):                               # unrolled VPU MAC loop (no XLU reduce)
        kh, kw = divmod(t, 3)
        win = pad_ref[kh:kh + H, 7 + kw:7 + kw + W, :]
        term = win * taps[t]
        acc = term if acc is None else acc + term
    acc = acc * scale + bias
    return jnp.maximum(acc, 0.0)


def _ghost_core(x_flat, wpw, spw, bpw, wdw, sdw, bdw, pad_ref, H, W, oup):
    """GhostModule: 1x1 conv(+BN+ReLU) -> cheap 3x3 depthwise(+BN+ReLU) -> concat[:oup]."""
    # Pointwise conv on the MXU (bf16 operands, f32 accumulation).
    x1 = jnp.dot(x_flat.astype(jnp.bfloat16), wpw.astype(jnp.bfloat16),
                 preferred_element_type=jnp.float32)
    x1 = jnp.maximum(x1 * spw + bpw, 0.0)
    init_c = x1.shape[-1]
    x1 = x1.reshape(H, W, init_c)
    x2 = _dw3x3_same(x1, wdw, sdw, bdw, pad_ref)
    out = jnp.concatenate([x1, x2], axis=-1)         # in-VMEM concat (no extra HBM pass)
    return out[:, :, :oup]


# ----------------------------------------------------------------------------------
# Pallas kernels
# ----------------------------------------------------------------------------------
def _ghost_module_kernel(x_ref, wpw_ref, spw_ref, bpw_ref, wdw_ref, sdw_ref, bdw_ref,
                         h_ref, pad_ref, *, H, W, oup):
    x = x_ref[0].reshape(H * W, x_ref.shape[-1])
    h_ref[0] = _ghost_core(x, wpw_ref[...], spw_ref[...], bpw_ref[...],
                           wdw_ref[...], sdw_ref[...], bdw_ref[...],
                           pad_ref, H, W, oup)


def _se_gate_kernel(h_ref, w1_ref, b1_ref, w2_ref, b2_ref, g_ref, *, inv_hw):
    # SELayer head: global average pool -> fc -> ReLU -> fc -> clamp(0, 1).
    B, H, W, C = h_ref.shape
    hm = jnp.sum(h_ref[...].reshape(B, H * W, C), axis=1) * inv_hw      # (B, C)
    y = jnp.dot(hm, w1_ref[...], preferred_element_type=jnp.float32) + b1_ref[...]
    y = jnp.maximum(y, 0.0)
    y = jnp.dot(y, w2_ref[...], preferred_element_type=jnp.float32) + b2_ref[...]
    g_ref[...] = jnp.clip(y, 0.0, 1.0)


def _moffn_tail_kernel(h_ref, gate_ref, xres_ref, wpw_ref, spw_ref, bpw_ref,
                       wdw_ref, sdw_ref, bdw_ref, o_ref, pad_ref, *, H, W, oup):
    b = pl.program_id(0)
    gate = gate_ref[b]                                # (Cmid,) SE gate for this image
    h = h_ref[0] * gate                               # fused SELayer scaling
    hf = h.reshape(H * W, h.shape[-1])
    out = _ghost_core(hf, wpw_ref[...], spw_ref[...], bpw_ref[...],
                      wdw_ref[...], sdw_ref[...], bdw_ref[...],
                      pad_ref, H, W, oup)
    o_ref[0] = out + xres_ref[0]                      # fused residual add (ffn(x) + x)


# ----------------------------------------------------------------------------------
# Pallas wrappers
# ----------------------------------------------------------------------------------
def ghost_module(x, p, oup):
    B, H, W, Cin = x.shape
    init_c = p["w_pw"].shape[1]
    kernel = functools.partial(_ghost_module_kernel, H=H, W=W, oup=oup)
    return pl.pallas_call(
        kernel,
        out_shape=jax.ShapeDtypeStruct((B, H, W, oup), jnp.float32),
        grid_spec=pltpu.PrefetchScalarGridSpec(
            num_scalar_prefetch=0,
            grid=(B,),
            in_specs=[
                pl.BlockSpec((1, H, W, Cin), lambda b: (b, 0, 0, 0)),
                pl.BlockSpec((Cin, init_c), lambda b: (0, 0)),
                pl.BlockSpec((1, init_c), lambda b: (0, 0)),
                pl.BlockSpec((1, init_c), lambda b: (0, 0)),
                pl.BlockSpec((9, init_c), lambda b: (0, 0)),
                pl.BlockSpec((1, init_c), lambda b: (0, 0)),
                pl.BlockSpec((1, init_c), lambda b: (0, 0)),
            ],
            out_specs=pl.BlockSpec((1, H, W, oup), lambda b: (b, 0, 0, 0)),
            scratch_shapes=[pltpu.VMEM((H + 2, W + 16, init_c), jnp.float32)]),
        compiler_params=pltpu.CompilerParams(dimension_semantics=("parallel",)),
    )(x, p["w_pw"], p["s_pw"].reshape(1, init_c), p["b_pw"].reshape(1, init_c),
      p["w_dw"], p["s_dw"].reshape(1, init_c), p["b_dw"].reshape(1, init_c))


def se_gate(h, p):
    B, H, W, C = h.shape
    Cr = p["w1"].shape[1]
    kernel = functools.partial(_se_gate_kernel, inv_hw=1.0 / (H * W))
    return pl.pallas_call(
        kernel,
        out_shape=jax.ShapeDtypeStruct((B, C), jnp.float32),
        grid_spec=pltpu.PrefetchScalarGridSpec(
            num_scalar_prefetch=0,
            grid=(1,),
            in_specs=[
                pl.BlockSpec((B, H, W, C), lambda i: (0, 0, 0, 0)),
                pl.BlockSpec((C, Cr), lambda i: (0, 0)),
                pl.BlockSpec((1, Cr), lambda i: (0, 0)),
                pl.BlockSpec((Cr, C), lambda i: (0, 0)),
                pl.BlockSpec((1, C), lambda i: (0, 0)),
            ],
            out_specs=pl.BlockSpec((B, C), lambda i: (0, 0))),
        compiler_params=pltpu.CompilerParams(dimension_semantics=("arbitrary",)),
    )(h, p["w1"], p["b1"].reshape(1, Cr), p["w2"], p["b2"].reshape(1, C))


def moffn_tail(h, gate, x_res, p, oup):
    B, H, W, Cmid = h.shape
    init_c = p["w_pw"].shape[1]
    kernel = functools.partial(_moffn_tail_kernel, H=H, W=W, oup=oup)
    return pl.pallas_call(
        kernel,
        out_shape=jax.ShapeDtypeStruct((B, H, W, oup), jnp.float32),
        grid_spec=pltpu.PrefetchScalarGridSpec(
            num_scalar_prefetch=0,
            grid=(B,),
            in_specs=[
                pl.BlockSpec((1, H, W, Cmid), lambda b: (b, 0, 0, 0)),
                pl.BlockSpec((B, Cmid), lambda b: (0, 0)),              # SE gate (tiny, full)
                pl.BlockSpec((1, H, W, oup), lambda b: (b, 0, 0, 0)),   # residual input
                pl.BlockSpec((Cmid, init_c), lambda b: (0, 0)),
                pl.BlockSpec((1, init_c), lambda b: (0, 0)),
                pl.BlockSpec((1, init_c), lambda b: (0, 0)),
                pl.BlockSpec((9, init_c), lambda b: (0, 0)),
                pl.BlockSpec((1, init_c), lambda b: (0, 0)),
                pl.BlockSpec((1, init_c), lambda b: (0, 0)),
            ],
            out_specs=pl.BlockSpec((1, H, W, oup), lambda b: (b, 0, 0, 0)),
            scratch_shapes=[pltpu.VMEM((H + 2, W + 16, init_c), jnp.float32)]),
        compiler_params=pltpu.CompilerParams(dimension_semantics=("parallel",)),
    )(h, gate, x_res, p["w_pw"], p["s_pw"].reshape(1, init_c), p["b_pw"].reshape(1, init_c),
      p["w_dw"], p["s_dw"].reshape(1, init_c), p["b_dw"].reshape(1, init_c))


def moffn_forward(params, x_nchw, hidden, oup):
    """MoFFN.forward: GhostModule(inp,hidden) -> SELayer(hidden) -> GhostModule(hidden,oup) + x."""
    x = jnp.transpose(x_nchw, (0, 2, 3, 1)).astype(jnp.float32)    # NCHW -> NHWC
    h = ghost_module(x, params["g1"], hidden)                      # GhostModule(inp, hidden)
    g = se_gate(h, params["se"])                                   # SELayer gate (B, hidden)
    out = moffn_tail(h, g, x, params["g2"], oup)                   # SE-apply + Ghost + residual
    return jnp.transpose(out, (0, 3, 1, 2))                        # NHWC -> NCHW


# ----------------------------------------------------------------------------------
# Deterministic synthetic parameter initialization (BN folded to eval-mode scale/bias)
# ----------------------------------------------------------------------------------
class _Rng:
    def __init__(self, seed):
        self._key = jax.random.PRNGKey(seed)

    def next(self):
        self._key, sub = jax.random.split(self._key)
        return sub


def _bn_fold(rng, c):
    gamma = 1.0 + 0.1 * jax.random.normal(rng.next(), (c,), jnp.float32)
    beta = 0.05 * jax.random.normal(rng.next(), (c,), jnp.float32)
    mean = 0.05 * jax.random.normal(rng.next(), (c,), jnp.float32)
    var = jnp.abs(1.0 + 0.1 * jax.random.normal(rng.next(), (c,), jnp.float32))
    scale = gamma / jnp.sqrt(var + 1e-5)
    bias = beta - mean * scale
    return scale, bias


def ghost_p(rng, inp, oup):
    init_c = math.ceil(oup / 2)    # ratio=2 -> cheap op is a plain 3x3 depthwise
    w_pw = (jax.random.normal(rng.next(), (inp, init_c), jnp.float32)
            * (2.0 / inp) ** 0.5).astype(jnp.bfloat16)              # bf16 MXU weights
    s_pw, b_pw = _bn_fold(rng, init_c)
    w_dw = jax.random.normal(rng.next(), (9, init_c), jnp.float32) * (2.0 / 9.0) ** 0.5
    s_dw, b_dw = _bn_fold(rng, init_c)
    return {"w_pw": w_pw, "s_pw": s_pw, "b_pw": b_pw,
            "w_dw": w_dw, "s_dw": s_dw, "b_dw": b_dw}


def se_p(rng, c, reduction=4):
    h = c // reduction
    w1 = jax.random.normal(rng.next(), (c, h), jnp.float32) / (c ** 0.5)
    b1 = 0.05 * jax.random.normal(rng.next(), (h,), jnp.float32)
    w2 = jax.random.normal(rng.next(), (h, c), jnp.float32) / (h ** 0.5)
    b2 = 0.05 * jax.random.normal(rng.next(), (c,), jnp.float32)
    return {"w1": w1, "b1": b1, "w2": w2, "b2": b2}


def init_moffn_params(seed, inp, hidden, oup):
    rng = _Rng(seed)
    return {"g1": ghost_p(rng, inp, hidden),
            "se": se_p(rng, hidden),
            "g2": ghost_p(rng, hidden, oup)}


# ----------------------------------------------------------------------------------
# Pure-JAX reference (same math: bf16 MXU operands, folded BN, eval-mode)
# ----------------------------------------------------------------------------------
def _ghost_ref(v, p, oup):
    B, H, W, C = v.shape
    x1 = jnp.dot(v.reshape(-1, C).astype(jnp.bfloat16), p["w_pw"].astype(jnp.bfloat16),
                 preferred_element_type=jnp.float32)
    x1 = jnp.maximum(x1 * p["s_pw"] + p["b_pw"], 0.0).reshape(B, H, W, -1)
    xp = jnp.pad(x1, ((0, 0), (1, 1), (1, 1), (0, 0)))
    acc = xp[:, 0:H, 0:W, :] * p["w_dw"][0]
    for t in range(1, 9):
        kh, kw = divmod(t, 3)
        acc = acc + xp[:, kh:kh + H, kw:kw + W, :] * p["w_dw"][t]
    x2 = jnp.maximum(acc * p["s_dw"] + p["b_dw"], 0.0)
    return jnp.concatenate([x1, x2], axis=-1)[..., :oup]


def _moffn_ref(params, x_nchw, hidden, oup):
    x = jnp.transpose(x_nchw, (0, 2, 3, 1)).astype(jnp.float32)
    h = _ghost_ref(x, params["g1"], hidden)
    y = jnp.mean(h, axis=(1, 2))
    y = jnp.maximum(jnp.dot(y, params["se"]["w1"]) + params["se"]["b1"], 0.0)
    y = jnp.clip(jnp.dot(y, params["se"]["w2"]) + params["se"]["b2"], 0.0, 1.0)
    hs = h * y[:, None, None, :]
    out = _ghost_ref(hs, params["g2"], oup) + x
    return jnp.transpose(out, (0, 3, 1, 2))


# ----------------------------------------------------------------------------------
if __name__ == "__main__":
    # Small MoFFN: B=2, inp=oup=256, hidden=512, 8x8 spatial (NCHW like PyTorch).
    # Channel counts are multiples of 128 so every store / concat is lane-dense.
    B, INP, H, W = 2, 256, 8, 8
    HIDDEN, OUP = 512, 256

    x = jax.random.normal(jax.random.PRNGKey(0), (B, INP, H, W), jnp.float32)
    params = init_moffn_params(seed=1, inp=INP, hidden=HIDDEN, oup=OUP)

    fwd = jax.jit(functools.partial(moffn_forward, hidden=HIDDEN, oup=OUP))
    out = fwd(params, x)
    jax.block_until_ready(out)

    assert out.shape == (B, OUP, H, W), out.shape
    assert bool(jnp.all(jnp.isfinite(out)))

    ref = _moffn_ref(params, x, HIDDEN, OUP)
    err = float(jnp.max(jnp.abs(out - ref)))
    assert err < 2e-2, f"max abs err vs reference: {err}"
    print("KERNEL_OK")
</pallas_src>

<mosaic_0001>
module attributes {stable_mosaic.version = 11 : i64} {
  func.func @_se_gate_kernel(%arg0: i32, %arg1: memref<2x8x8x512xf32, #tpu.memory_space<vmem>>, %arg2: memref<512x128xf32, #tpu.memory_space<vmem>>, %arg3: memref<1x128xf32, #tpu.memory_space<vmem>>, %arg4: memref<128x512xf32, #tpu.memory_space<vmem>>, %arg5: memref<1x512xf32, #tpu.memory_space<vmem>>, %arg6: memref<2x512xf32, #tpu.memory_space<vmem>>) attributes {dimension_semantics = [#tpu.dimension_semantics<arbitrary>], iteration_bounds = array<i64: 1>, scalar_prefetch = 0 : i64, scratch_operands = 0 : i64, tpu.core_type = #tpu.core_type<tc>, window_params = [{pipeline_mode = #tpu.pipeline_mode<synchronous>, transform_indices = @transform_0, window_bounds = array<i64: 2, 8, 8, 512>}, {pipeline_mode = #tpu.pipeline_mode<synchronous>, transform_indices = @transform_1, window_bounds = array<i64: 512, 128>}, {pipeline_mode = #tpu.pipeline_mode<synchronous>, transform_indices = @transform_2, window_bounds = array<i64: 1, 128>}, {pipeline_mode = #tpu.pipeline_mode<synchronous>, transform_indices = @transform_3, window_bounds = array<i64: 128, 512>}, {pipeline_mode = #tpu.pipeline_mode<synchronous>, transform_indices = @transform_4, window_bounds = array<i64: 1, 512>}, {pipeline_mode = #tpu.pipeline_mode<synchronous>, transform_indices = @transform_5, window_bounds = array<i64: 2, 512>}]} {
    %c0 = arith.constant 0 : index
    %c0_0 = arith.constant 0 : index
    %c0_1 = arith.constant 0 : index
    %c0_2 = arith.constant 0 : index
    %0 = vector.load %arg1[%c0, %c0_0, %c0_1, %c0_2] : memref<2x8x8x512xf32, #tpu.memory_space<vmem>>, vector<2x8x8x512xf32>
    %1 = vector.shape_cast %0 : vector<2x8x8x512xf32> to vector<2x64x512xf32>
    %cst = arith.constant dense<0.000000e+00> : vector<2x512xf32>
    %2 = vector.multi_reduction <add>, %1, %cst [1] : vector<2x64x512xf32> to vector<2x512xf32>
    %cst_3 = arith.constant 1.562500e-02 : f32
    %3 = vector.broadcast %cst_3 : f32 to vector<2x512xf32>
    %4 = arith.mulf %2, %3 : vector<2x512xf32>
    %c0_4 = arith.constant 0 : index
    %c0_5 = arith.constant 0 : index
    %5 = vector.load %arg2[%c0_4, %c0_5] : memref<512x128xf32, #tpu.memory_space<vmem>>, vector<512x128xf32>
    %cst_6 = arith.constant dense<0.000000e+00> : vector<2x128xf32>
    %6 = tpu.matmul %4, %5, %cst_6 {dimension_numbers = #tpu.dot_dimension_numbers<[1], [0], [0], [1], [0, 0, 1, 1], [], []>} : vector<2x512xf32>, vector<512x128xf32>, vector<2x128xf32> -> vector<2x128xf32>
    %c0_7 = arith.constant 0 : index
    %c0_8 = arith.constant 0 : index
    %7 = vector.load %arg3[%c0_7, %c0_8] : memref<1x128xf32, #tpu.memory_space<vmem>>, vector<1x128xf32>
    %8 = vector.broadcast %7 : vector<1x128xf32> to vector<2x128xf32>
    %9 = arith.addf %6, %8 : vector<2x128xf32>
    %cst_9 = arith.constant 0.000000e+00 : f32
    %10 = vector.broadcast %cst_9 : f32 to vector<2x128xf32>
    %11 = arith.maximumf %9, %10 : vector<2x128xf32>
    %c0_10 = arith.constant 0 : index
    %c0_11 = arith.constant 0 : index
    %12 = vector.load %arg4[%c0_10, %c0_11] : memref<128x512xf32, #tpu.memory_space<vmem>>, vector<128x512xf32>
    %cst_12 = arith.constant dense<0.000000e+00> : vector<2x512xf32>
    %13 = tpu.matmul %11, %12, %cst_12 {dimension_numbers = #tpu.dot_dimension_numbers<[1], [0], [0], [1], [0, 0, 1, 1], [], []>} : vector<2x128xf32>, vector<128x512xf32>, vector<2x512xf32> -> vector<2x512xf32>
    %c0_13 = arith.constant 0 : index
    %c0_14 = arith.constant 0 : index
    %14 = vector.load %arg5[%c0_13, %c0_14] : memref<1x512xf32, #tpu.memory_space<vmem>>, vector<1x512xf32>
    %15 = vector.broadcast %14 : vector<1x512xf32> to vector<2x512xf32>
    %16 = arith.addf %13, %15 : vector<2x512xf32>
    %cst_15 = arith.constant 0.000000e+00 : f32
    %cst_16 = arith.constant 1.000000e+00 : f32
    %17 = vector.broadcast %cst_15 : f32 to vector<2x512xf32>
    %18 = arith.maximumf %17, %16 : vector<2x512xf32>
    %19 = vector.broadcast %cst_16 : f32 to vector<2x512xf32>
    %20 = arith.minimumf %19, %18 : vector<2x512xf32>
    %c0_17 = arith.constant 0 : index
    %c0_18 = arith.constant 0 : index
    %21 = vector.load %arg6[%c0_17, %c0_18] : memref<2x512xf32, #tpu.memory_space<vmem>>, vector<2x512xf32>
    tpu.vector_store %arg6[%c0_17, %c0_18], %20 {strides = array<i32>} : memref<2x512xf32, #tpu.memory_space<vmem>>, vector<2x512xf32>,
    return
  }
  func.func @transform_0(%arg0: i32) -> (i32, i32, i32, i32) {
    %c0_i32 = arith.constant 0 : i32
    %c0_i32_0 = arith.constant 0 : i32
    %c0_i32_1 = arith.constant 0 : i32
    %c0_i32_2 = arith.constant 0 : i32
    %c0_i32_3 = arith.constant 0 : i32
    return %c0_i32, %c0_i32_0, %c0_i32_1, %c0_i32_2 : i32, i32, i32, i32
  }
  func.func @transform_1(%arg0: i32) -> (i32, i32) {
    %c0_i32 = arith.constant 0 : i32
    %c0_i32_0 = arith.constant 0 : i32
    %c0_i32_1 = arith.constant 0 : i32
    return %c0_i32, %c0_i32_0 : i32, i32
  }
  func.func @transform_2(%arg0: i32) -> (i32, i32) {
    %c0_i32 = arith.constant 0 : i32
    %c0_i32_0 = arith.constant 0 : i32
    %c0_i32_1 = arith.constant 0 : i32
    return %c0_i32, %c0_i32_0 : i32, i32
  }
  func.func @transform_3(%arg0: i32) -> (i32, i32) {
    %c0_i32 = arith.constant 0 : i32
    %c0_i32_0 = arith.constant 0 : i32
    %c0_i32_1 = arith.constant 0 : i32
    return %c0_i32, %c0_i32_0 : i32, i32
  }
  func.func @transform_4(%arg0: i32) -> (i32, i32) {
    %c0_i32 = arith.constant 0 : i32
    %c0_i32_0 = arith.constant 0 : i32
    %c0_i32_1 = arith.constant 0 : i32
    return %c0_i32, %c0_i32_0 : i32, i32
  }
  func.func @transform_5(%arg0: i32) -> (i32, i32) {
    %c0_i32 = arith.constant 0 : i32
    %c0_i32_0 = arith.constant 0 : i32
    %c0_i32_1 = arith.constant 0 : i32
    return %c0_i32, %c0_i32_0 : i32, i32
  }
}

module attributes {stable_mosaic.version = 11 : i64} {
  func.func @_ghost_module_kernel(%arg0: i32, %arg1: memref<1x8x8x256xf32, #tpu.memory_space<vmem>>, %arg2: memref<256x256xbf16, #tpu.memory_space<vmem>>, %arg3: memref<1x256xf32, #tpu.memory_space<vmem>>, %arg4: memref<1x256xf32, #tpu.memory_space<vmem>>, %arg5: memref<9x256xf32, #tpu.memory_space<vmem>>, %arg6: memref<1x256xf32, #tpu.memory_space<vmem>>, %arg7: memref<1x256xf32, #tpu.memory_space<vmem>>, %arg8: memref<1x8x8x512xf32, #tpu.memory_space<vmem>>, %arg9: memref<10x24x256xf32, #tpu.memory_space<vmem>>) attributes {dimension_semantics = [#tpu.dimension_semantics<parallel>], iteration_bounds = array<i64: 2>, scalar_prefetch = 0 : i64, scratch_operands = 1 : i64, tpu.core_type = #tpu.core_type<tc>, window_params = [{transform_indices = @transform_0, window_bounds = array<i64: 1, 8, 8, 256>}, {pipeline_mode = #tpu.pipeline_mode<synchronous>, transform_indices = @transform_1, window_bounds = array<i64: 256, 256>}, {pipeline_mode = #tpu.pipeline_mode<synchronous>, transform_indices = @transform_2, window_bounds = array<i64: 1, 256>}, {pipeline_mode = #tpu.pipeline_mode<synchronous>, transform_indices = @transform_3, window_bounds = array<i64: 1, 256>}, {pipeline_mode = #tpu.pipeline_mode<synchronous>, transform_indices = @transform_4, window_bounds = array<i64: 9, 256>}, {pipeline_mode = #tpu.pipeline_mode<synchronous>, transform_indices = @transform_5, window_bounds = array<i64: 1, 256>}, {pipeline_mode = #tpu.pipeline_mode<synchronous>, transform_indices = @transform_6, window_bounds = array<i64: 1, 256>}, {transform_indices = @transform_7, window_bounds = array<i64: 1, 8, 8, 512>}]} {
    %c0 = arith.constant 0 : index
    %c0_0 = arith.constant 0 : index
    %c0_1 = arith.constant 0 : index
    %c0_2 = arith.constant 0 : index
    %0 = vector.load %arg1[%c0, %c0_0, %c0_1, %c0_2] : memref<1x8x8x256xf32, #tpu.memory_space<vmem>>, vector<1x8x8x256xf32>
    %1 = vector.shape_cast %0 : vector<1x8x8x256xf32> to vector<8x8x256xf32>
    %2 = vector.shape_cast %1 : vector<8x8x256xf32> to vector<64x256xf32>
    %c0_3 = arith.constant 0 : index
    %c0_4 = arith.constant 0 : index
    %3 = vector.load %arg2[%c0_3, %c0_4] : memref<256x256xbf16, #tpu.memory_space<vmem>>, vector<256x256xbf16>
    %c0_5 = arith.constant 0 : index
    %c0_6 = arith.constant 0 : index
    %4 = vector.load %arg3[%c0_5, %c0_6] : memref<1x256xf32, #tpu.memory_space<vmem>>, vector<1x256xf32>
    %c0_7 = arith.constant 0 : index
    %c0_8 = arith.constant 0 : index
    %5 = vector.load %arg4[%c0_7, %c0_8] : memref<1x256xf32, #tpu.memory_space<vmem>>, vector<1x256xf32>
    %c0_9 = arith.constant 0 : index
    %c0_10 = arith.constant 0 : index
    %6 = vector.load %arg5[%c0_9, %c0_10] : memref<9x256xf32, #tpu.memory_space<vmem>>, vector<9x256xf32>
    %c0_11 = arith.constant 0 : index
    %c0_12 = arith.constant 0 : index
    %7 = vector.load %arg6[%c0_11, %c0_12] : memref<1x256xf32, #tpu.memory_space<vmem>>, vector<1x256xf32>
    %c0_13 = arith.constant 0 : index
    %c0_14 = arith.constant 0 : index
    %8 = vector.load %arg7[%c0_13, %c0_14] : memref<1x256xf32, #tpu.memory_space<vmem>>, vector<1x256xf32>
    %9 = arith.truncf %2 : vector<64x256xf32> to vector<64x256xbf16>
    %cst = arith.constant dense<0.000000e+00> : vector<64x256xf32>
    %10 = tpu.matmul %9, %3, %cst {dimension_numbers = #tpu.dot_dimension_numbers<[1], [0], [0], [1], [0, 0, 1, 1], [], []>} : vector<64x256xbf16>, vector<256x256xbf16>, vector<64x256xf32> -> vector<64x256xf32>
    %11 = vector.broadcast %4 : vector<1x256xf32> to vector<64x256xf32>
    %12 = arith.mulf %10, %11 : vector<64x256xf32>
    %13 = vector.broadcast %5 : vector<1x256xf32> to vector<64x256xf32>
    %14 = arith.addf %12, %13 : vector<64x256xf32>
    %cst_15 = arith.constant 0.000000e+00 : f32
    %15 = vector.broadcast %cst_15 : f32 to vector<64x256xf32>
    %16 = arith.maximumf %14, %15 : vector<64x256xf32>
    %17 = vector.shape_cast %16 : vector<64x256xf32> to vector<8x8x256xf32>
    %cst_16 = arith.constant 0.000000e+00 : f32
    %18 = vector.broadcast %cst_16 : f32 to vector<10x24x256xf32>
    %c0_17 = arith.constant 0 : index
    %c0_18 = arith.constant 0 : index
    %c0_19 = arith.constant 0 : index
    %19 = vector.load %arg9[%c0_17, %c0_18, %c0_19] : memref<10x24x256xf32, #tpu.memory_space<vmem>>, vector<10x24x256xf32>
    tpu.vector_store %arg9[%c0_17, %c0_18, %c0_19], %18 {strides = array<i32>} : memref<10x24x256xf32, #tpu.memory_space<vmem>>, vector<10x24x256xf32>,
    %c1 = arith.constant 1 : index
    %c8 = arith.constant 8 : index
    %c0_20 = arith.constant 0 : index
    %20 = vector.load %arg9[%c1, %c8, %c0_20] : memref<10x24x256xf32, #tpu.memory_space<vmem>>, vector<8x8x256xf32>
    tpu.vector_store %arg9[%c1, %c8, %c0_20], %17 {strides = array<i32>} : memref<10x24x256xf32, #tpu.memory_space<vmem>>, vector<8x8x256xf32>,
    %c0_21 = arith.constant 0 : index
    %c7 = arith.constant 7 : index
    %c0_22 = arith.constant 0 : index
    %21 = vector.load %arg9[%c0_21, %c7, %c0_22] : memref<10x24x256xf32, #tpu.memory_space<vmem>>, vector<8x8x256xf32>
    %22 = vector.extract_strided_slice %6 {offsets = [0, 0], sizes = [1, 256], strides = [1, 1]} : vector<9x256xf32> to vector<1x256xf32>
    %23 = vector.shape_cast %22 : vector<1x256xf32> to vector<256xf32>
    %24 = vector.shape_cast %23 : vector<256xf32> to vector<1x1x256xf32>
    %25 = vector.broadcast %24 : vector<1x1x256xf32> to vector<8x8x256xf32>
    %26 = arith.mulf %21, %25 : vector<8x8x256xf32>
    %c0_23 = arith.constant 0 : index
    %c8_24 = arith.constant 8 : index
    %c0_25 = arith.constant 0 : index
    %27 = vector.load %arg9[%c0_23, %c8_24, %c0_25] : memref<10x24x256xf32, #tpu.memory_space<vmem>>, vector<8x8x256xf32>
    %28 = vector.extract_strided_slice %6 {offsets = [1, 0], sizes = [1, 256], strides = [1, 1]} : vector<9x256xf32> to vector<1x256xf32>
    %29 = vector.shape_cast %28 : vector<1x256xf32> to vector<256xf32>
    %30 = vector.shape_cast %29 : vector<256xf32> to vector<1x1x256xf32>
    %31 = vector.broadcast %30 : vector<1x1x256xf32> to vector<8x8x256xf32>
    %32 = arith.mulf %27, %31 : vector<8x8x256xf32>
    %33 = arith.addf %26, %32 : vector<8x8x256xf32>
    %c0_26 = arith.constant 0 : index
    %c9 = arith.constant 9 : index
    %c0_27 = arith.constant 0 : index
    %34 = vector.load %arg9[%c0_26, %c9, %c0_27] : memref<10x24x256xf32, #tpu.memory_space<vmem>>, vector<8x8x256xf32>
    %35 = vector.extract_strided_slice %6 {offsets = [2, 0], sizes = [1, 256], strides = [1, 1]} : vector<9x256xf32> to vector<1x256xf32>
    %36 = vector.shape_cast %35 : vector<1x256xf32> to vector<256xf32>
    %37 = vector.shape_cast %36 : vector<256xf32> to vector<1x1x256xf32>
    %38 = vector.broadcast %37 : vector<1x1x256xf32> to vector<8x8x256xf32>
    %39 = arith.mulf %34, %38 : vector<8x8x256xf32>
    %40 = arith.addf %33, %39 : vector<8x8x256xf32>
    %c1_28 = arith.constant 1 : index
    %c7_29 = arith.constant 7 : index
    %c0_30 = arith.constant 0 : index
    %41 = vector.load %arg9[%c1_28, %c7_29, %c0_30] : memref<10x24x256xf32, #tpu.memory_space<vmem>>, vector<8x8x256xf32>
    %42 = vector.extract_strided_slice %6 {offsets = [3, 0], sizes = [1, 256], strides = [1, 1]} : vector<9x256xf32> to vector<1x256xf32>
    %43 = vector.shape_cast %42 : vector<1x256xf32> to vector<256xf32>
    %44 = vector.shape_cast %43 : vector<256xf32> to vector<1x1x256xf32>
    %45 = vector.broadcast %44 : vector<1x1x256xf32> to vector<8x8x256xf32>
    %46 = arith.mulf %41, %45 : vector<8x8x256xf32>
    %47 = arith.addf %40, %46 : vector<8x8x256xf32>
    %c1_31 = arith.constant 1 : index
    %c8_32 = arith.constant 8 : index
    %c0_33 = arith.constant 0 : index
    %48 = vector.load %arg9[%c1_31, %c8_32, %c0_33] : memref<10x24x256xf32, #tpu.memory_space<vmem>>, vector<8x8x256xf32>
    %49 = vector.extract_strided_slice %6 {offsets = [4, 0], sizes = [1, 256], strides = [1, 1]} : vector<9x256xf32> to vector<1x256xf32>
    %50 = vector.shape_cast %49 : vector<1x256xf32> to vector<256xf32>
    %51 = vector.shape_cast %50 : vector<256xf32> to vector<1x1x256xf32>
    %52 = vector.broadcast %51 : vector<1x1x256xf32> to vector<8x8x256xf32>
    %53 = arith.mulf %48, %52 : vector<8x8x256xf32>
    %54 = arith.addf %47, %53 : vector<8x8x256xf32>
    %c1_34 = arith.constant 1 : index
    %c9_35 = arith.constant 9 : index
    %c0_36 = arith.constant 0 : index
    %55 = vector.load %arg9[%c1_34, %c9_35, %c0_36] : memref<10x24x256xf32, #tpu.memory_space<vmem>>, vector<8x8x256xf32>
    %56 = vector.extract_strided_slice %6 {offsets = [5, 0], sizes = [1, 256], strides = [1, 1]} : vector<9x256xf32> to vector<1x256xf32>
    %57 = vector.shape_cast %56 : vector<1x256xf32> to vector<256xf32>
    %58 = vector.shape_cast %57 : vector<256xf32> to vector<1x1x256xf32>
    %59 = vector.broadcast %58 : vector<1x1x256xf32> to vector<8x8x256xf32>
    %60 = arith.mulf %55, %59 : vector<8x8x256xf32>
    %61 = arith.addf %54, %60 : vector<8x8x256xf32>
    %c2 = arith.constant 2 : index
    %c7_37 = arith.constant 7 : index
    %c0_38 = arith.constant 0 : index
    %62 = vector.load %arg9[%c2, %c7_37, %c0_38] : memref<10x24x256xf32, #tpu.memory_space<vmem>>, vector<8x8x256xf32>
    %63 = vector.extract_strided_slice %6 {offsets = [6, 0], sizes = [1, 256], strides = [1, 1]} : vector<9x256xf32> to vector<1x256xf32>
    %64 = vector.shape_cast %63 : vector<1x256xf32> to vector<256xf32>
    %65 = vector.shape_cast %64 : vector<256xf32> to vector<1x1x256xf32>
    %66 = vector.broadcast %65 : vector<1x1x256xf32> to vector<8x8x256xf32>
    %67 = arith.mulf %62, %66 : vector<8x8x256xf32>
    %68 = arith.addf %61, %67 : vector<8x8x256xf32>
    %c2_39 = arith.constant 2 : index
    %c8_40 = arith.constant 8 : index
    %c0_41 = arith.constant 0 : index
    %69 = vector.load %arg9[%c2_39, %c8_40, %c0_41] : memref<10x24x256xf32, #tpu.memory_space<vmem>>, vector<8x8x256xf32>
    %70 = vector.extract_strided_slice %6 {offsets = [7, 0], sizes = [1, 256], strides = [1, 1]} : vector<9x256xf32> to vector<1x256xf32>
    %71 = vector.shape_cast %70 : vector<1x256xf32> to vector<256xf32>
    %72 = vector.shape_cast %71 : vector<256xf32> to vector<1x1x256xf32>
    %73 = vector.broadcast %72 : vector<1x1x256xf32> to vector<8x8x256xf32>
    %74 = arith.mulf %69, %73 : vector<8x8x256xf32>
    %75 = arith.addf %68, %74 : vector<8x8x256xf32>
    %c2_42 = arith.constant 2 : index
    %c9_43 = arith.constant 9 : index
    %c0_44 = arith.constant 0 : index
    %76 = vector.load %arg9[%c2_42, %c9_43, %c0_44] : memref<10x24x256xf32, #tpu.memory_space<vmem>>, vector<8x8x256xf32>
    %77 = vector.extract_strided_slice %6 {offsets = [8, 0], sizes = [1, 256], strides = [1, 1]} : vector<9x256xf32> to vector<1x256xf32>
    %78 = vector.shape_cast %77 : vector<1x256xf32> to vector<256xf32>
    %79 = vector.shape_cast %78 : vector<256xf32> to vector<1x1x256xf32>
    %80 = vector.broadcast %79 : vector<1x1x256xf32> to vector<8x8x256xf32>
    %81 = arith.mulf %76, %80 : vector<8x8x256xf32>
    %82 = arith.addf %75, %81 : vector<8x8x256xf32>
    %83 = vector.shape_cast %7 : vector<1x256xf32> to vector<1x1x256xf32>
    %84 = vector.broadcast %83 : vector<1x1x256xf32> to vector<8x8x256xf32>
    %85 = arith.mulf %82, %84 : vector<8x8x256xf32>
    %86 = vector.shape_cast %8 : vector<1x256xf32> to vector<1x1x256xf32>
    %87 = vector.broadcast %86 : vector<1x1x256xf32> to vector<8x8x256xf32>
    %88 = arith.addf %85, %87 : vector<8x8x256xf32>
    %cst_45 = arith.constant 0.000000e+00 : f32
    %89 = vector.broadcast %cst_45 : f32 to vector<8x8x256xf32>
    %90 = arith.maximumf %88, %89 : vector<8x8x256xf32>
    %91 = tpu.concatenate %17, %90 in 2 : vector<8x8x256xf32>, vector<8x8x256xf32> -> vector<8x8x512xf32>
    %c0_46 = arith.constant 0 : index
    %c0_47 = arith.constant 0 : index
    %c0_48 = arith.constant 0 : index
    %c0_49 = arith.constant 0 : index
    %92 = vector.load %arg8[%c0_46, %c0_47, %c0_48, %c0_49] : memref<1x8x8x512xf32, #tpu.memory_space<vmem>>, vector<1x8x8x512xf32>
    %93 = vector.shape_cast %92 : vector<1x8x8x512xf32> to vector<8x8x512xf32>
    %94 = vector.shape_cast %91 : vector<8x8x512xf32> to vector<1x8x8x512xf32>
    tpu.vector_store %arg8[%c0_46, %c0_47, %c0_48, %c0_49], %94 {strides = array<i32>} : memref<1x8x8x512xf32, #tpu.memory_space<vmem>>, vector<1x8x8x512xf32>,
    return
  }
  func.func @transform_0(%arg0: i32) -> (i32, i32, i32, i32) {
    %c0_i32 = arith.constant 0 : i32
    %c0_i32_0 = arith.constant 0 : i32
    %c0_i32_1 = arith.constant 0 : i32
    %c0_i32_2 = arith.constant 0 : i32
    return %arg0, %c0_i32, %c0_i32_0, %c0_i32_1 : i32, i32, i32, i32
  }
  func.func @transform_1(%arg0: i32) -> (i32, i32) {
    %c0_i32 = arith.constant 0 : i32
    %c0_i32_0 = arith.constant 0 : i32
    %c0_i32_1 = arith.constant 0 : i32
    return %c0_i32, %c0_i32_0 : i32, i32
  }
  func.func @transform_2(%arg0: i32) -> (i32, i32) {
    %c0_i32 = arith.constant 0 : i32
    %c0_i32_0 = arith.constant 0 : i32
    %c0_i32_1 = arith.constant 0 : i32
    return %c0_i32, %c0_i32_0 : i32, i32
  }
  func.func @transform_3(%arg0: i32) -> (i32, i32) {
    %c0_i32 = arith.constant 0 : i32
    %c0_i32_0 = arith.constant 0 : i32
    %c0_i32_1 = arith.constant 0 : i32
    return %c0_i32, %c0_i32_0 : i32, i32
  }
  func.func @transform_4(%arg0: i32) -> (i32, i32) {
    %c0_i32 = arith.constant 0 : i32
    %c0_i32_0 = arith.constant 0 : i32
    %c0_i32_1 = arith.constant 0 : i32
    return %c0_i32, %c0_i32_0 : i32, i32
  }
  func.func @transform_5(%arg0: i32) -> (i32, i32) {
    %c0_i32 = arith.constant 0 : i32
    %c0_i32_0 = arith.constant 0 : i32
    %c0_i32_1 = arith.constant 0 : i32
    return %c0_i32, %c0_i32_0 : i32, i32
  }
  func.func @transform_6(%arg0: i32) -> (i32, i32) {
    %c0_i32 = arith.constant 0 : i32
    %c0_i32_0 = arith.constant 0 : i32
    %c0_i32_1 = arith.constant 0 : i32
    return %c0_i32, %c0_i32_0 : i32, i32
  }
  func.func @transform_7(%arg0: i32) -> (i32, i32, i32, i32) {
    %c0_i32 = arith.constant 0 : i32
    %c0_i32_0 = arith.constant 0 : i32
    %c0_i32_1 = arith.constant 0 : i32
    %c0_i32_2 = arith.constant 0 : i32
    return %arg0, %c0_i32, %c0_i32_0, %c0_i32_1 : i32, i32, i32, i32
  }
}

module attributes {stable_mosaic.version = 11 : i64} {
  func.func @_moffn_tail_kernel(%arg0: i32, %arg1: memref<1x8x8x512xf32, #tpu.memory_space<vmem>>, %arg2: memref<2x512xf32, #tpu.memory_space<vmem>>, %arg3: memref<1x8x8x256xf32, #tpu.memory_space<vmem>>, %arg4: memref<512x128xbf16, #tpu.memory_space<vmem>>, %arg5: memref<1x128xf32, #tpu.memory_space<vmem>>, %arg6: memref<1x128xf32, #tpu.memory_space<vmem>>, %arg7: memref<9x128xf32, #tpu.memory_space<vmem>>, %arg8: memref<1x128xf32, #tpu.memory_space<vmem>>, %arg9: memref<1x128xf32, #tpu.memory_space<vmem>>, %arg10: memref<1x8x8x256xf32, #tpu.memory_space<vmem>>, %arg11: memref<10x24x128xf32, #tpu.memory_space<vmem>>) attributes {dimension_semantics = [#tpu.dimension_semantics<parallel>], iteration_bounds = array<i64: 2>, scalar_prefetch = 0 : i64, scratch_operands = 1 : i64, tpu.core_type = #tpu.core_type<tc>, window_params = [{transform_indices = @transform_0, window_bounds = array<i64: 1, 8, 8, 512>}, {pipeline_mode = #tpu.pipeline_mode<synchronous>, transform_indices = @transform_1, window_bounds = array<i64: 2, 512>}, {transform_indices = @transform_2, window_bounds = array<i64: 1, 8, 8, 256>}, {pipeline_mode = #tpu.pipeline_mode<synchronous>, transform_indices = @transform_3, window_bounds = array<i64: 512, 128>}, {pipeline_mode = #tpu.pipeline_mode<synchronous>, transform_indices = @transform_4, window_bounds = array<i64: 1, 128>}, {pipeline_mode = #tpu.pipeline_mode<synchronous>, transform_indices = @transform_5, window_bounds = array<i64: 1, 128>}, {pipeline_mode = #tpu.pipeline_mode<synchronous>, transform_indices = @transform_6, window_bounds = array<i64: 9, 128>}, {pipeline_mode = #tpu.pipeline_mode<synchronous>, transform_indices = @transform_7, window_bounds = array<i64: 1, 128>}, {pipeline_mode = #tpu.pipeline_mode<synchronous>, transform_indices = @transform_8, window_bounds = array<i64: 1, 128>}, {transform_indices = @transform_9, window_bounds = array<i64: 1, 8, 8, 256>}]} {
    %0 = arith.index_cast %arg0 : i32 to index
    %c0 = arith.constant 0 : index
    %1 = vector.load %arg2[%0, %c0] : memref<2x512xf32, #tpu.memory_space<vmem>>, vector<1x512xf32>
    %2 = vector.shape_cast %1 : vector<1x512xf32> to vector<512xf32>
    %c0_0 = arith.constant 0 : index
    %c0_1 = arith.constant 0 : index
    %c0_2 = arith.constant 0 : index
    %c0_3 = arith.constant 0 : index
    %3 = vector.load %arg1[%c0_0, %c0_1, %c0_2, %c0_3] : memref<1x8x8x512xf32, #tpu.memory_space<vmem>>, vector<1x8x8x512xf32>
    %4 = vector.shape_cast %3 : vector<1x8x8x512xf32> to vector<8x8x512xf32>
    %5 = vector.shape_cast %2 : vector<512xf32> to vector<1x1x512xf32>
    %6 = vector.broadcast %5 : vector<1x1x512xf32> to vector<8x8x512xf32>
    %7 = arith.mulf %4, %6 : vector<8x8x512xf32>
    %8 = vector.shape_cast %7 : vector<8x8x512xf32> to vector<64x512xf32>
    %c0_4 = arith.constant 0 : index
    %c0_5 = arith.constant 0 : index
    %9 = vector.load %arg4[%c0_4, %c0_5] : memref<512x128xbf16, #tpu.memory_space<vmem>>, vector<512x128xbf16>
    %c0_6 = arith.constant 0 : index
    %c0_7 = arith.constant 0 : index
    %10 = vector.load %arg5[%c0_6, %c0_7] : memref<1x128xf32, #tpu.memory_space<vmem>>, vector<1x128xf32>
    %c0_8 = arith.constant 0 : index
    %c0_9 = arith.constant 0 : index
    %11 = vector.load %arg6[%c0_8, %c0_9] : memref<1x128xf32, #tpu.memory_space<vmem>>, vector<1x128xf32>
    %c0_10 = arith.constant 0 : index
    %c0_11 = arith.constant 0 : index
    %12 = vector.load %arg7[%c0_10, %c0_11] : memref<9x128xf32, #tpu.memory_space<vmem>>, vector<9x128xf32>
    %c0_12 = arith.constant 0 : index
    %c0_13 = arith.constant 0 : index
    %13 = vector.load %arg8[%c0_12, %c0_13] : memref<1x128xf32, #tpu.memory_space<vmem>>, vector<1x128xf32>
    %c0_14 = arith.constant 0 : index
    %c0_15 = arith.constant 0 : index
    %14 = vector.load %arg9[%c0_14, %c0_15] : memref<1x128xf32, #tpu.memory_space<vmem>>, vector<1x128xf32>
    %15 = arith.truncf %8 : vector<64x512xf32> to vector<64x512xbf16>
    %cst = arith.constant dense<0.000000e+00> : vector<64x128xf32>
    %16 = tpu.matmul %15, %9, %cst {dimension_numbers = #tpu.dot_dimension_numbers<[1], [0], [0], [1], [0, 0, 1, 1], [], []>} : vector<64x512xbf16>, vector<512x128xbf16>, vector<64x128xf32> -> vector<64x128xf32>
    %17 = vector.broadcast %10 : vector<1x128xf32> to vector<64x128xf32>
    %18 = arith.mulf %16, %17 : vector<64x128xf32>
    %19 = vector.broadcast %11 : vector<1x128xf32> to vector<64x128xf32>
    %20 = arith.addf %18, %19 : vector<64x128xf32>
    %cst_16 = arith.constant 0.000000e+00 : f32
    %21 = vector.broadcast %cst_16 : f32 to vector<64x128xf32>
    %22 = arith.maximumf %20, %21 : vector<64x128xf32>
    %23 = vector.shape_cast %22 : vector<64x128xf32> to vector<8x8x128xf32>
    %cst_17 = arith.constant 0.000000e+00 : f32
    %24 = vector.broadcast %cst_17 : f32 to vector<10x24x128xf32>
    %c0_18 = arith.constant 0 : index
    %c0_19 = arith.constant 0 : index
    %c0_20 = arith.constant 0 : index
    %25 = vector.load %arg11[%c0_18, %c0_19, %c0_20] : memref<10x24x128xf32, #tpu.memory_space<vmem>>, vector<10x24x128xf32>
    tpu.vector_store %arg11[%c0_18, %c0_19, %c0_20], %24 {strides = array<i32>} : memref<10x24x128xf32, #tpu.memory_space<vmem>>, vector<10x24x128xf32>,
    %c1 = arith.constant 1 : index
    %c8 = arith.constant 8 : index
    %c0_21 = arith.constant 0 : index
    %26 = vector.load %arg11[%c1, %c8, %c0_21] : memref<10x24x128xf32, #tpu.memory_space<vmem>>, vector<8x8x128xf32>
    tpu.vector_store %arg11[%c1, %c8, %c0_21], %23 {strides = array<i32>} : memref<10x24x128xf32, #tpu.memory_space<vmem>>, vector<8x8x128xf32>,
    %c0_22 = arith.constant 0 : index
    %c7 = arith.constant 7 : index
    %c0_23 = arith.constant 0 : index
    %27 = vector.load %arg11[%c0_22, %c7, %c0_23] : memref<10x24x128xf32, #tpu.memory_space<vmem>>, vector<8x8x128xf32>
    %28 = vector.extract_strided_slice %12 {offsets = [0, 0], sizes = [1, 128], strides = [1, 1]} : vector<9x128xf32> to vector<1x128xf32>
    %29 = vector.shape_cast %28 : vector<1x128xf32> to vector<128xf32>
    %30 = vector.shape_cast %29 : vector<128xf32> to vector<1x1x128xf32>
    %31 = vector.broadcast %30 : vector<1x1x128xf32> to vector<8x8x128xf32>
    %32 = arith.mulf %27, %31 : vector<8x8x128xf32>
    %c0_24 = arith.constant 0 : index
    %c8_25 = arith.constant 8 : index
    %c0_26 = arith.constant 0 : index
    %33 = vector.load %arg11[%c0_24, %c8_25, %c0_26] : memref<10x24x128xf32, #tpu.memory_space<vmem>>, vector<8x8x128xf32>
    %34 = vector.extract_strided_slice %12 {offsets = [1, 0], sizes = [1, 128], strides = [1, 1]} : vector<9x128xf32> to vector<1x128xf32>
    %35 = vector.shape_cast %34 : vector<1x128xf32> to vector<128xf32>
    %36 = vector.shape_cast %35 : vector<128xf32> to vector<1x1x128xf32>
    %37 = vector.broadcast %36 : vector<1x1x128xf32> to vector<8x8x128xf32>
    %38 = arith.mulf %33, %37 : vector<8x8x128xf32>
    %39 = arith.addf %32, %38 : vector<8x8x128xf32>
    %c0_27 = arith.constant 0 : index
    %c9 = arith.constant 9 : index
    %c0_28 = arith.constant 0 : index
    %40 = vector.load %arg11[%c0_27, %c9, %c0_28] : memref<10x24x128xf32, #tpu.memory_space<vmem>>, vector<8x8x128xf32>
    %41 = vector.extract_strided_slice %12 {offsets = [2, 0], sizes = [1, 128], strides = [1, 1]} : vector<9x128xf32> to vector<1x128xf32>
    %42 = vector.shape_cast %41 : vector<1x128xf32> to vector<128xf32>
    %43 = vector.shape_cast %42 : vector<128xf32> to vector<1x1x128xf32>
    %44 = vector.broadcast %43 : vector<1x1x128xf32> to vector<8x8x128xf32>
    %45 = arith.mulf %40, %44 : vector<8x8x128xf32>
    %46 = arith.addf %39, %45 : vector<8x8x128xf32>
    %c1_29 = arith.constant 1 : index
    %c7_30 = arith.constant 7 : index
    %c0_31 = arith.constant 0 : index
    %47 = vector.load %arg11[%c1_29, %c7_30, %c0_31] : memref<10x24x128xf32, #tpu.memory_space<vmem>>, vector<8x8x128xf32>
    %48 = vector.extract_strided_slice %12 {offsets = [3, 0], sizes = [1, 128], strides = [1, 1]} : vector<9x128xf32> to vector<1x128xf32>
    %49 = vector.shape_cast %48 : vector<1x128xf32> to vector<128xf32>
    %50 = vector.shape_cast %49 : vector<128xf32> to vector<1x1x128xf32>
    %51 = vector.broadcast %50 : vector<1x1x128xf32> to vector<8x8x128xf32>
    %52 = arith.mulf %47, %51 : vector<8x8x128xf32>
    %53 = arith.addf %46, %52 : vector<8x8x128xf32>
    %c1_32 = arith.constant 1 : index
    %c8_33 = arith.constant 8 : index
    %c0_34 = arith.constant 0 : index
    %54 = vector.load %arg11[%c1_32, %c8_33, %c0_34] : memref<10x24x128xf32, #tpu.memory_space<vmem>>, vector<8x8x128xf32>
    %55 = vector.extract_strided_slice %12 {offsets = [4, 0], sizes = [1, 128], strides = [1, 1]} : vector<9x128xf32> to vector<1x128xf32>
    %56 = vector.shape_cast %55 : vector<1x128xf32> to vector<128xf32>
    %57 = vector.shape_cast %56 : vector<128xf32> to vector<1x1x128xf32>
    %58 = vector.broadcast %57 : vector<1x1x128xf32> to vector<8x8x128xf32>
    %59 = arith.mulf %54, %58 : vector<8x8x128xf32>
    %60 = arith.addf %53, %59 : vector<8x8x128xf32>
    %c1_35 = arith.constant 1 : index
    %c9_36 = arith.constant 9 : index
    %c0_37 = arith.constant 0 : index
    %61 = vector.load %arg11[%c1_35, %c9_36, %c0_37] : memref<10x24x128xf32, #tpu.memory_space<vmem>>, vector<8x8x128xf32>
    %62 = vector.extract_strided_slice %12 {offsets = [5, 0], sizes = [1, 128], strides = [1, 1]} : vector<9x128xf32> to vector<1x128xf32>
    %63 = vector.shape_cast %62 : vector<1x128xf32> to vector<128xf32>
    %64 = vector.shape_cast %63 : vector<128xf32> to vector<1x1x128xf32>
    %65 = vector.broadcast %64 : vector<1x1x128xf32> to vector<8x8x128xf32>
    %66 = arith.mulf %61, %65 : vector<8x8x128xf32>
    %67 = arith.addf %60, %66 : vector<8x8x128xf32>
    %c2 = arith.constant 2 : index
    %c7_38 = arith.constant 7 : index
    %c0_39 = arith.constant 0 : index
    %68 = vector.load %arg11[%c2, %c7_38, %c0_39] : memref<10x24x128xf32, #tpu.memory_space<vmem>>, vector<8x8x128xf32>
    %69 = vector.extract_strided_slice %12 {offsets = [6, 0], sizes = [1, 128], strides = [1, 1]} : vector<9x128xf32> to vector<1x128xf32>
    %70 = vector.shape_cast %69 : vector<1x128xf32> to vector<128xf32>
    %71 = vector.shape_cast %70 : vector<128xf32> to vector<1x1x128xf32>
    %72 = vector.broadcast %71 : vector<1x1x128xf32> to vector<8x8x128xf32>
    %73 = arith.mulf %68, %72 : vector<8x8x128xf32>
    %74 = arith.addf %67, %73 : vector<8x8x128xf32>
    %c2_40 = arith.constant 2 : index
    %c8_41 = arith.constant 8 : index
    %c0_42 = arith.constant 0 : index
    %75 = vector.load %arg11[%c2_40, %c8_41, %c0_42] : memref<10x24x128xf32, #tpu.memory_space<vmem>>, vector<8x8x128xf32>
    %76 = vector.extract_strided_slice %12 {offsets = [7, 0], sizes = [1, 128], strides = [1, 1]} : vector<9x128xf32> to vector<1x128xf32>
    %77 = vector.shape_cast %76 : vector<1x128xf32> to vector<128xf32>
    %78 = vector.shape_cast %77 : vector<128xf32> to vector<1x1x128xf32>
    %79 = vector.broadcast %78 : vector<1x1x128xf32> to vector<8x8x128xf32>
    %80 = arith.mulf %75, %79 : vector<8x8x128xf32>
    %81 = arith.addf %74, %80 : vector<8x8x128xf32>
    %c2_43 = arith.constant 2 : index
    %c9_44 = arith.constant 9 : index
    %c0_45 = arith.constant 0 : index
    %82 = vector.load %arg11[%c2_43, %c9_44, %c0_45] : memref<10x24x128xf32, #tpu.memory_space<vmem>>, vector<8x8x128xf32>
    %83 = vector.extract_strided_slice %12 {offsets = [8, 0], sizes = [1, 128], strides = [1, 1]} : vector<9x128xf32> to vector<1x128xf32>
    %84 = vector.shape_cast %83 : vector<1x128xf32> to vector<128xf32>
    %85 = vector.shape_cast %84 : vector<128xf32> to vector<1x1x128xf32>
    %86 = vector.broadcast %85 : vector<1x1x128xf32> to vector<8x8x128xf32>
    %87 = arith.mulf %82, %86 : vector<8x8x128xf32>
    %88 = arith.addf %81, %87 : vector<8x8x128xf32>
    %89 = vector.shape_cast %13 : vector<1x128xf32> to vector<1x1x128xf32>
    %90 = vector.broadcast %89 : vector<1x1x128xf32> to vector<8x8x128xf32>
    %91 = arith.mulf %88, %90 : vector<8x8x128xf32>
    %92 = vector.shape_cast %14 : vector<1x128xf32> to vector<1x1x128xf32>
    %93 = vector.broadcast %92 : vector<1x1x128xf32> to vector<8x8x128xf32>
    %94 = arith.addf %91, %93 : vector<8x8x128xf32>
    %cst_46 = arith.constant 0.000000e+00 : f32
    %95 = vector.broadcast %cst_46 : f32 to vector<8x8x128xf32>
    %96 = arith.maximumf %94, %95 : vector<8x8x128xf32>
    %97 = tpu.concatenate %23, %96 in 2 : vector<8x8x128xf32>, vector<8x8x128xf32> -> vector<8x8x256xf32>
    %c0_47 = arith.constant 0 : index
    %c0_48 = arith.constant 0 : index
    %c0_49 = arith.constant 0 : index
    %c0_50 = arith.constant 0 : index
    %98 = vector.load %arg3[%c0_47, %c0_48, %c0_49, %c0_50] : memref<1x8x8x256xf32, #tpu.memory_space<vmem>>, vector<1x8x8x256xf32>
    %99 = vector.shape_cast %98 : vector<1x8x8x256xf32> to vector<8x8x256xf32>
    %100 = arith.addf %97, %99 : vector<8x8x256xf32>
    %c0_51 = arith.constant 0 : index
    %c0_52 = arith.constant 0 : index
    %c0_53 = arith.constant 0 : index
    %c0_54 = arith.constant 0 : index
    %101 = vector.load %arg10[%c0_51, %c0_52, %c0_53, %c0_54] : memref<1x8x8x256xf32, #tpu.memory_space<vmem>>, vector<1x8x8x256xf32>
    %102 = vector.shape_cast %101 : vector<1x8x8x256xf32> to vector<8x8x256xf32>
    %103 = vector.shape_cast %100 : vector<8x8x256xf32> to vector<1x8x8x256xf32>
    tpu.vector_store %arg10[%c0_51, %c0_52, %c0_53, %c0_54], %103 {strides = array<i32>} : memref<1x8x8x256xf32, #tpu.memory_space<vmem>>, vector<1x8x8x256xf32>,
    return
  }
  func.func @transform_0(%arg0: i32) -> (i32, i32, i32, i32) {
    %c0_i32 = arith.constant 0 : i32
    %c0_i32_0 = arith.constant 0 : i32
    %c0_i32_1 = arith.constant 0 : i32
    %c0_i32_2 = arith.constant 0 : i32
    return %arg0, %c0_i32, %c0_i32_0, %c0_i32_1 : i32, i32, i32, i32
  }
  func.func @transform_1(%arg0: i32) -> (i32, i32) {
    %c0_i32 = arith.constant 0 : i32
    %c0_i32_0 = arith.constant 0 : i32
    %c0_i32_1 = arith.constant 0 : i32
    return %c0_i32, %c0_i32_0 : i32, i32
  }
  func.func @transform_2(%arg0: i32) -> (i32, i32, i32, i32) {
    %c0_i32 = arith.constant 0 : i32
    %c0_i32_0 = arith.constant 0 : i32
    %c0_i32_1 = arith.constant 0 : i32
    %c0_i32_2 = arith.constant 0 : i32
    return %arg0, %c0_i32, %c0_i32_0, %c0_i32_1 : i32, i32, i32, i32
  }
  func.func @transform_3(%arg0: i32) -> (i32, i32) {
    %c0_i32 = arith.constant 0 : i32
    %c0_i32_0 = arith.constant 0 : i32
    %c0_i32_1 = arith.constant 0 : i32
    return %c0_i32, %c0_i32_0 : i32, i32
  }
  func.func @transform_4(%arg0: i32) -> (i32, i32) {
    %c0_i32 = arith.constant 0 : i32
    %c0_i32_0 = arith.constant 0 : i32
    %c0_i32_1 = arith.constant 0 : i32
    return %c0_i32, %c0_i32_0 : i32, i32
  }
  func.func @transform_5(%arg0: i32) -> (i32, i32) {
    %c0_i32 = arith.constant 0 : i32
    %c0_i32_0 = arith.constant 0 : i32
    %c0_i32_1 = arith.constant 0 : i32
    return %c0_i32, %c0_i32_0 : i32, i32
  }
  func.func @transform_6(%arg0: i32) -> (i32, i32) {
    %c0_i32 = arith.constant 0 : i32
    %c0_i32_0 = arith.constant 0 : i32
    %c0_i32_1 = arith.constant 0 : i32
    return %c0_i32, %c0_i32_0 : i32, i32
  }
  func.func @transform_7(%arg0: i32) -> (i32, i32) {
    %c0_i32 = arith.constant 0 : i32
    %c0_i32_0 = arith.constant 0 : i32
    %c0_i32_1 = arith.constant 0 : i32
    return %c0_i32, %c0_i32_0 : i32, i32
  }
  func.func @transform_8(%arg0: i32) -> (i32, i32) {
    %c0_i32 = arith.constant 0 : i32
    %c0_i32_0 = arith.constant 0 : i32
    %c0_i32_1 = arith.constant 0 : i32
    return %c0_i32, %c0_i32_0 : i32, i32
  }
  func.func @transform_9(%arg0: i32) -> (i32, i32, i32, i32) {
    %c0_i32 = arith.constant 0 : i32
    %c0_i32_0 = arith.constant 0 : i32
    %c0_i32_1 = arith.constant 0 : i32
    %c0_i32_2 = arith.constant 0 : i32
    return %arg0, %c0_i32, %c0_i32_0, %c0_i32_1 : i32, i32, i32, i32
  }
}

</mosaic_0001>

<bundles_post_ra>
// kernel: moffn_forward.4
= control target key start
LH: loop header
LB: loop body
LE: loop exit
PB: predicated region body
PF: predicated region fallthrough
CT: control target
= control target key end

     0   :  { %10 = vsyncpa [#allocation3], 0  ;;  %s883_s0 = inlined_call_operand.vmem [shape: f32[2,8,8,512], index: 0, kind: input, shape index: {}]   ;;  %s884_s1 = inlined_call_operand.hbm [shape: f32[512,128], index: 1, kind: input, shape index: {}]   ;;  %s885_s2 = inlined_call_operand.vmem [shape: f32[1,128], index: 2, kind: input, shape index: {}]   ;;  %s886_s3 = inlined_call_operand.hbm [shape: f32[128,512], index: 3, kind: input, shape index: {}]   ;;  %s887_s4 = inlined_call_operand.vmem [shape: f32[1,512], index: 4, kind: input, shape index: {}]   ;;  %s888_s5 = inlined_call_operand.vmem [shape: f32[2,512], index: 5, kind: output, shape index: {}]  }
   0x1   :  { %s18_s20 = sshll.u32 %s884_s1, 4  ;;  %s19_s20 = int_to_ptr.hbm [resolvable:$true] %s18_s20 }
   0x2   :  { %11 = vsyncpa [#allocation5], 0  ;;  %s636_s21 = smov [#allocation2]   ;;  %s33_s25 = sshll.u32 %s886_s3, 4  ;;  %s34_s25 = int_to_ptr.hbm [resolvable:$true] %s33_s25 }
   0x3   :  { %s20_s22 = sshll.u32 %s636_s21, 4  ;;  %s637_s26 = smov 128   ;;  %s21_s22 = int_to_ptr.vmem [resolvable:$true] %s20_s22 }
   0x4   :  { %s638_s27 = smov 8   ;;  %s639_s28 = smov [#allocation4]  }
   0x5   :  { %26 = dma.hbm_to_vmem [thread:$0]  %s19_s20, 8192, %s21_s22, [#allocation3], %s637_s26, %s637_s26, %s638_s27  }
   0x6   :  { %s35_s29 = sshll.u32 %s639_s28, 4  ;;  %s640_s30 = smov 512   ;;  %s36_s29 = int_to_ptr.vmem [resolvable:$true] %s35_s29 }
   0x7   :  { %s641_s6 = smov 32  }
   0x8   :  { %41 = dma.hbm_to_vmem [thread:$0]  %s34_s25, 8192, %s36_s29, [#allocation5], %s640_s30, %s640_s30, %s641_s6  }
   0x9   :  { %632 = dma.done.wait [#allocation3], 8192  }
   0xa   :  { %633 = vsyncadd [#allocation3], 4294959104 }
   0xb   :  { %634 = dma.done.wait [#allocation5], 8192  }
   0xc   :  { %635 = vsyncadd [#allocation5], 4294959104  ;;  %v275_v0 = vld [vmem:[#allocation2 + $0x178] sm:$0xff]  ;;  %v274_v2 = vld [vmem:[#allocation2 + $0x170] sm:$0xff]  ;;  %vm304_vm0 = vcmask 1041409   ;;  %vm563_vm1 = vcmask 1041408  }
   0xd   :  { %v243_v1 = vld [vmem:[#allocation2 + $0x78] sm:$0xff]  ;;  %353 = vmatpush.msra.mxu2 %v275_v0  ;;  %v242_v4 = vld [vmem:[#allocation2 + $0x70] sm:$0xff]  ;;  %v273_v6 = vld [vmem:[#allocation2 + $0x168] sm:$0xff]  ;;  %vm565_vm2 = vcmask 1045508   ;;  %vm567_vm3 = vcmask 1043456  }
   0xe   :  { %313 = vmatpush.msra.mxu0 %v243_v1  ;;  %v291_v3 = vld [vmem:[#allocation2 + $0x1f8] sm:$0xff]  ;;  %v290_v7 = vld [vmem:[#allocation2 + $0x1f0] sm:$0xff]  ;;  %v241_v8 = vld [vmem:[#allocation2 + $0x68] sm:$0xff] }
   0xf   :  { %v259_v5 = vld [vmem:[#allocation2 + $0xf8] sm:$0xff]  ;;  %373 = vmatpush.msra.mxu3 %v291_v3  ;;  %354 = vmatpush.msra.mxu2 %v274_v2  ;;  %v258_v9 = vld [vmem:[#allocation2 + $0xf0] sm:$0xff]  ;;  %v289_v10 = vld [vmem:[#allocation2 + $0x1e8] sm:$0xff] }
  0x10   :  { %333 = vmatpush.msra.mxu1 %v259_v5  ;;  %314 = vmatpush.msra.mxu0 %v242_v4  ;;  %v272_v11 = vld [vmem:[#allocation2 + $0x160] sm:$0xff]  ;;  %v257_v13 = vld [vmem:[#allocation2 + $0xe8] sm:$0xff]  ;;  %v271_v16 = vld [vmem:[#allocation2 + $0x158] sm:$0xff] }
  0x11   :  { %374 = vmatpush.msra.mxu3 %v290_v7  ;;  %v240_v12 = vld [vmem:[#allocation2 + $0x60] sm:$0xff]  ;;  %355 = vmatpush.msra.mxu2 %v273_v6  ;;  %v239_v17 = vld [vmem:[#allocation2 + $0x58] sm:$0xff]  ;;  %v270_v20 = vld [vmem:[#allocation2 + $0x150] sm:$0xff] }
  0x12   :  { %334 = vmatpush.msra.mxu1 %v258_v9  ;;  %315 = vmatpush.msra.mxu0 %v241_v8  ;;  %v288_v14 = vld [vmem:[#allocation2 + $0x1e0] sm:$0xff]  ;;  %v287_v18 = vld [vmem:[#allocation2 + $0x1d8] sm:$0xff]  ;;  %v238_v21 = vld [vmem:[#allocation2 + $0x50] sm:$0xff] }
  0x13   :  { %v256_v15 = vld [vmem:[#allocation2 + $0xe0] sm:$0xff]  ;;  %375 = vmatpush.msra.mxu3 %v289_v10  ;;  %356 = vmatpush.msra.mxu2 %v272_v11  ;;  %v255_v19 = vld [vmem:[#allocation2 + $0xd8] sm:$0xff]  ;;  %v286_v22 = vld [vmem:[#allocation2 + $0x1d0] sm:$0xff] }
  0x14   :  { %335 = vmatpush.msra.mxu1 %v257_v13  ;;  %316 = vmatpush.msra.mxu0 %v240_v12  ;;  %v254_v23 = vld [vmem:[#allocation2 + $0xd0] sm:$0xff]  ;;  %v269_v24 = vld [vmem:[#allocation2 + $0x148] sm:$0xff]  ;;  %v268_v28 = vld [vmem:[#allocation2 + $0x140] sm:$0xff] }
  0x15   :  { %376 = vmatpush.msra.mxu3 %v288_v14  ;;  %357 = vmatpush.msra.mxu2 %v271_v16  ;;  %v237_v25 = vld [vmem:[#allocation2 + $0x48] sm:$0xff]  ;;  %v236_v29 = vld [vmem:[#allocation2 + $0x40] sm:$0xff]  ;;  %v267_v32 = vld [vmem:[#allocation2 + $0x138] sm:$0xff] }
  0x16   :  { %336 = vmatpush.msra.mxu1 %v256_v15  ;;  %317 = vmatpush.msra.mxu0 %v239_v17  ;;  %v285_v26 = vld [vmem:[#allocation2 + $0x1c8] sm:$0xff]  ;;  %v284_v30 = vld [vmem:[#allocation2 + $0x1c0] sm:$0xff]  ;;  %v235_v33 = vld [vmem:[#allocation2 + $0x38] sm:$0xff] }
  0x17   :  { %377 = vmatpush.msra.mxu3 %v287_v18  ;;  %358 = vmatpush.msra.mxu2 %v270_v20  ;;  %v253_v27 = vld [vmem:[#allocation2 + $0xc8] sm:$0xff]  ;;  %v252_v31 = vld [vmem:[#allocation2 + $0xc0] sm:$0xff]  ;;  %v283_v34 = vld [vmem:[#allocation2 + $0x1b8] sm:$0xff] }
  0x18   :  { %337 = vmatpush.msra.mxu1 %v255_v19  ;;  %318 = vmatpush.msra.mxu0 %v238_v21  ;;  %v251_v35 = vld [vmem:[#allocation2 + $0xb8] sm:$0xff]  ;;  %v266_v36 = vld [vmem:[#allocation2 + $0x130] sm:$0xff]  ;;  %v265_v38 = vld [vmem:[#allocation2 + $0x128] sm:$0xff] }
  0x19   :  { %378 = vmatpush.msra.mxu3 %v286_v22  ;;  %359 = vmatpush.msra.mxu2 %v269_v24  ;;  %v234_v37 = vld [vmem:[#allocation2 + $0x30] sm:$0xff]  ;;  %v233_v41 = vld [vmem:[#allocation2 + $0x28] sm:$0xff]  ;;  %v264_v42 = vld [vmem:[#allocation2 + $0x120] sm:$0xff] }
  0x1a   :  { %338 = vmatpush.msra.mxu1 %v254_v23  ;;  %319 = vmatpush.msra.mxu0 %v237_v25  ;;  %v282_v39 = vld [vmem:[#allocation2 + $0x1b0] sm:$0xff]  ;;  %v281_v43 = vld [vmem:[#allocation2 + $0x1a8] sm:$0xff]  ;;  %v232_v44 = vld [vmem:[#allocation2 + $0x20] sm:$0xff] }
  0x1b   :  { %379 = vmatpush.msra.mxu3 %v285_v26  ;;  %360 = vmatpush.msra.mxu2 %v268_v28  ;;  %v250_v40 = vld [vmem:[#allocation2 + $0xb0] sm:$0xff]  ;;  %v249_v45 = vld [vmem:[#allocation2 + $0xa8] sm:$0xff]  ;;  %v280_v46 = vld [vmem:[#allocation2 + $0x1a0] sm:$0xff] }
  0x1c   :  { %339 = vmatpush.msra.mxu1 %v253_v27  ;;  %320 = vmatpush.msra.mxu0 %v236_v29  ;;  %v263_v47 = vld [vmem:[#allocation2 + $0x118] sm:$0xff]  ;;  %v54_v48 = vld [vmem:[%s883_s0 + $0x10] sm:$0xff]  ;;  %v248_v52 = vld [vmem:[#allocation2 + $0xa0] sm:$0xff] }
  0x1d   :  { %380 = vmatpush.msra.mxu3 %v284_v30  ;;  %361 = vmatpush.msra.mxu2 %v267_v32  ;;  %v58_v49 = vld [vmem:[%s883_s0 + $0x30] sm:$0xff]  ;;  %v231_v51 = vld [vmem:[#allocation2 + $0x18] sm:$0xff]  ;;  %v261_v0 = vld [vmem:[#allocation2 + $0x108] sm:$0xff] }
  0x1e   :  { %340 = vmatpush.msra.mxu1 %v252_v31  ;;  %321 = vmatpush.msra.mxu0 %v235_v33  ;;  %v62_v50 = vld [vmem:[%s883_s0 + $0x50] sm:$0xff]  ;;  %v279_v53 = vld [vmem:[#allocation2 + $0x198] sm:$0xff]  ;;  %v142_v54 = vadd.f32 %v58_v49, %v54_v48  ;;  %v229_v1 = vld [vmem:[#allocation2 + $0x8] sm:$0xff] }
  0x1f   :  { %381 = vmatpush.msra.mxu3 %v283_v34  ;;  %362 = vmatpush.msra.mxu2 %v266_v36  ;;  %v262_v55 = vld [vmem:[#allocation2 + $0x110] sm:$0xff]  ;;  %v247_v57 = vld [vmem:[#allocation2 + $0x98] sm:$0xff]  ;;  %v277_v5 = vld [vmem:[#allocation2 + $0x188] sm:$0xff] }
  0x20   :  { %341 = vmatpush.msra.mxu1 %v251_v35  ;;  %322 = vmatpush.msra.mxu0 %v234_v37  ;;  %v230_v56 = vld [vmem:[#allocation2 + $0x10] sm:$0xff]  ;;  %v143_v63 = vadd.f32 %v142_v54, %v62_v50  ;;  %v260_v9 = vld [vmem:[#allocation2 + $0x100] sm:$0xff]  ;;  %v245_v17 = vld [vmem:[#allocation2 + $0x88] sm:$0xff] }
  0x21   :  { %382 = vmatpush.msra.mxu3 %v282_v39  ;;  %363 = vmatpush.msra.mxu2 %v265_v38  ;;  %v66_v58 = vld [vmem:[%s883_s0 + $0x70] sm:$0xff]  ;;  %v52_v13 = vld [vmem:[%s883_s0] sm:$0xff]  ;;  %v55_v37 = vld [vmem:[%s883_s0 + $0x18] sm:$0xff] }
  0x22   :  { %342 = vmatpush.msra.mxu1 %v250_v40  ;;  %323 = vmatpush.msra.mxu0 %v233_v41  ;;  %v86_v59 = vld [vmem:[%s883_s0 + $0x110] sm:$0xff]  ;;  %v144_v8 = vadd.f32 %v143_v63, %v66_v58  ;;  %v56_v14 = vld [vmem:[%s883_s0 + $0x20] sm:$0xff]  ;;  %v59_v41 = vld [vmem:[%s883_s0 + $0x38] sm:$0xff] }
  0x23   :  { %383 = vmatpush.msra.mxu3 %v281_v43  ;;  %364 = vmatpush.msra.mxu2 %v264_v42  ;;  %v278_v60 = vld [vmem:[#allocation2 + $0x190] sm:$0xff]  ;;  %v60_v18 = vld [vmem:[%s883_s0 + $0x40] sm:$0xff]  ;;  %v116_v19 = vadd.f32 %v56_v14, %v52_v13  ;;  %v63_v42 = vld [vmem:[%s883_s0 + $0x58] sm:$0xff]  ;;  %v155_v48 = vadd.f32 %v59_v41, %v55_v37 }
  0x24   :  { %343 = vmatpush.msra.mxu1 %v249_v45  ;;  %324 = vmatpush.msra.mxu0 %v232_v44  ;;  %v90_v61 = vld [vmem:[%s883_s0 + $0x130] sm:$0xff]  ;;  %v228_v21 = vld [vmem:[#allocation2] sm:$0xff]  ;;  %v95_v58 = vld [vmem:[%s883_s0 + $0x158] sm:$0xff] }
  0x25   :  { %v94_v62 = vld [vmem:[%s883_s0 + $0x150] sm:$0xff]  ;;  %384 = vmatpush.msra.mxu3 %v280_v46  ;;  %v194_v4 = vadd.f32 %v90_v61, %v86_v59  ;;  %365 = vmatpush.msra.mxu2 %v263_v47  ;;  %v276_v22 = vld [vmem:[#allocation2 + $0x180] sm:$0xff]  ;;  %v117_v28 = vadd.f32 %v116_v19, %v60_v18  ;;  %v156_v59 = vadd.f32 %v155_v48, %v63_v42  ;;  %v61_v13 = vld [vmem:[%s883_s0 + $0x48] sm:$0xff] }
  0x26   :  { %344 = vmatpush.msra.mxu1 %v248_v52  ;;  %v246_v2 = vld [vmem:[#allocation2 + $0x90] sm:$0xff]  ;;  %325 = vmatpush.msra.mxu0 %v231_v51  ;;  %v64_v23 = vld [vmem:[%s883_s0 + $0x60] sm:$0xff]  ;;  %v67_v51 = vld [vmem:[%s883_s0 + $0x78] sm:$0xff] }
  0x27   :  { %v70_v3 = vld [vmem:[%s883_s0 + $0x90] sm:$0xff]  ;;  %385 = vmatpush.msra.mxu3 %v279_v53  ;;  %v195_v12 = vadd.f32 %v194_v4, %v94_v62  ;;  %366 = vmatpush.msra.mxu2 %v262_v55  ;;  %v84_v25 = vld [vmem:[%s883_s0 + $0x100] sm:$0xff]  ;;  %v118_v36 = vadd.f32 %v117_v28, %v64_v23  ;;  %v87_v52 = vld [vmem:[%s883_s0 + $0x118] sm:$0xff]  ;;  %v157_v4 = vadd.f32 %v156_v59, %v67_v51 }
  0x28   :  { %v74_v6 = vld [vmem:[%s883_s0 + $0xb0] sm:$0xff]  ;;  %345 = vmatpush.msra.mxu1 %v247_v57  ;;  %326 = vmatpush.msra.mxu0 %v230_v56  ;;  %v145_v16 = vadd.f32 %v144_v8, %v70_v3  ;;  %v88_v26 = vld [vmem:[%s883_s0 + $0x120] sm:$0xff]  ;;  %v91_v53 = vld [vmem:[%s883_s0 + $0x138] sm:$0xff] }
  0x29   :  { %v98_v7 = vld [vmem:[%s883_s0 + $0x170] sm:$0xff]  ;;  %386 = vmatpush.msra.mxu3 %v278_v60  ;;  %367 = vmatpush.msra.mxu2 %v261_v0  ;;  %v92_v27 = vld [vmem:[%s883_s0 + $0x140] sm:$0xff]  ;;  %v168_v32 = vadd.f32 %v88_v26, %v84_v25  ;;  %v207_v60 = vadd.f32 %v91_v53, %v87_v52  ;;  %v71_v0 = vld [vmem:[%s883_s0 + $0x98] sm:$0xff] }
  0x2a   :  { %v78_v10 = vld [vmem:[%s883_s0 + $0xd0] sm:$0xff]  ;;  %346 = vmatpush.msra.mxu1 %v246_v2  ;;  %v196_v20 = vadd.f32 %v195_v12, %v98_v7  ;;  %327 = vmatpush.msra.mxu0 %v229_v1  ;;  %v146_v24 = vadd.f32 %v145_v16, %v74_v6  ;;  %v68_v31 = vld [vmem:[%s883_s0 + $0x80] sm:$0xff]  ;;  %v99_v1 = vld [vmem:[%s883_s0 + $0x178] sm:$0xff]  ;;  %v158_v19 = vadd.f32 %v157_v4, %v71_v0 }
  0x2b   :  { %v102_v11 = vld [vmem:[%s883_s0 + $0x190] sm:$0xff]  ;;  %387 = vmatpush.msra.mxu3 %v277_v5  ;;  %368 = vmatpush.msra.mxu2 %v260_v9  ;;  %v96_v35 = vld [vmem:[%s883_s0 + $0x160] sm:$0xff]  ;;  %v169_v40 = vadd.f32 %v168_v32, %v92_v27  ;;  %v119_v47 = vadd.f32 %v118_v36, %v68_v31  ;;  %v208_v5 = vadd.f32 %v207_v60, %v95_v58  ;;  %v53_v7 = vld [vmem:[%s883_s0 + $0x8] sm:$0xff] }
  0x2c   :  { %v106_v15 = vld [vmem:[%s883_s0 + $0x1b0] sm:$0xff]  ;;  %v197_v30 = vadd.f32 %v196_v20, %v102_v11  ;;  %347 = vmatpush.msra.mxu1 %v245_v17  ;;  %v147_v34 = vadd.f32 %v146_v24, %v78_v10  ;;  %328 = vmatpush.msra.mxu0 %v228_v21  ;;  %v72_v39 = vld [vmem:[%s883_s0 + $0xa0] sm:$0xff]  ;;  %v57_v8 = vld [vmem:[%s883_s0 + $0x28] sm:$0xff] }
  0x2d   :  { %v82_v29 = vld [vmem:[%s883_s0 + $0xf0] sm:$0xff]  ;;  %388 = vmatpush.msra.mxu3 %v276_v22  ;;  %v76_v45 = vld [vmem:[%s883_s0 + $0xc0] sm:$0xff]  ;;  %v170_v50 = vadd.f32 %v169_v40, %v96_v35  ;;  %v120_v57 = vadd.f32 %v119_v47, %v72_v39  ;;  %v75_v11 = vld [vmem:[%s883_s0 + $0xb8] sm:$0xff]  ;;  %v129_v14 = vadd.f32 %v57_v8, %v53_v7  ;;  %v209_v20 = vadd.f32 %v208_v5, %v99_v1 }
  0x2e   :  { %v110_v33 = vld [vmem:[%s883_s0 + $0x1d0] sm:$0xff]  ;;  %v198_v38 = vadd.f32 %v197_v30, %v106_v15  ;;  %v148_v44 = vadd.f32 %v147_v34, %v82_v29  ;;  %v100_v46 = vld [vmem:[%s883_s0 + $0x180] sm:$0xff]  ;;  %v103_v12 = vld [vmem:[%s883_s0 + $0x198] sm:$0xff]  ;;  %v159_v32 = vadd.f32 %v158_v19, %v75_v11 }
  0x2f   :  { %v114_v43 = vld [vmem:[%s883_s0 + $0x1f0] sm:$0xff]  ;;  %v80_v55 = vld [vmem:[%s883_s0 + $0xe0] sm:$0xff]  ;;  %v171_v63 = vadd.f32 %v170_v50, %v100_v46  ;;  %v121_v3 = vadd.f32 %v120_v57, %v76_v45  ;;  %v79_v18 = vld [vmem:[%s883_s0 + $0xd8] sm:$0xff]  ;;  %v130_v28 = vadd.f32 %v129_v14, %v61_v13 }
  0x30   :  { %v199_v49 = vadd.f32 %v198_v38, %v110_v33  ;;  %v149_v54 = vrot.slane %v148_v44, 4  ;;  %v104_v56 = vld [vmem:[%s883_s0 + $0x1a0] sm:$0xff]  ;;  %v65_v21 = vld [vmem:[%s883_s0 + $0x68] sm:$0xff]  ;;  %v83_v24 = vld [vmem:[%s883_s0 + $0xf8] sm:$0xff]  ;;  %v210_v33 = vadd.f32 %v209_v20, %v103_v12  ;;  %v160_v46 = vadd.f32 %v159_v32, %v79_v18 }
  0x31   :  { %v108_v62 = vld [vmem:[%s883_s0 + $0x1c0] sm:$0xff]  ;;  %v172_v10 = vadd.f32 %v171_v63, %v104_v56  ;;  %v122_v17 = vadd.f32 %v121_v3, %v80_v55  ;;  %v107_v25 = vld [vmem:[%s883_s0 + $0x1b8] sm:$0xff]  ;;  %v85_v26 = vld [vmem:[%s883_s0 + $0x108] sm:$0xff]  ;;  %v131_v41 = vadd.f32 %v130_v28, %v65_v21 }
  0x32   :  { %v200_v61 = vadd.f32 %v199_v49, %v114_v43  ;;  %v150_v2 = vadd.f32 %v149_v54, %v148_v44  ;;  %v244_v6 = vld [vmem:[#allocation2 + $0x80] sm:$0xff]  ;;  %v89_v27 = vld [vmem:[%s883_s0 + $0x128] sm:$0xff]  ;;  %v111_v31 = vld [vmem:[%s883_s0 + $0x1d8] sm:$0xff]  ;;  %v211_v47 = vadd.f32 %v210_v33, %v107_v25 }
  0x33   :  { %348 = vmatpush.msra.mxu1 %v244_v6  ;;  %v112_v16 = vld [vmem:[%s883_s0 + $0x1e0] sm:$0xff]  ;;  %v173_v23 = vadd.f32 %v172_v10, %v108_v62  ;;  %v123_v30 = vrot.slane %v122_v17, 4  ;;  %v69_v34 = vld [vmem:[%s883_s0 + $0x88] sm:$0xff]  ;;  %v115_v38 = vld [vmem:[%s883_s0 + $0x1f8] sm:$0xff]  ;;  %v181_v42 = vadd.f32 %v89_v27, %v85_v26  ;;  %v161_v62 = vadd.f32 %v160_v46, %v83_v24 }
  0x34   :  { %v201_v9 = vrot.slane %v200_v61, 4  ;;  %v151_v15 = vrot.slane %v150_v2, 2  ;;  %v93_v35 = vld [vmem:[%s883_s0 + $0x148] sm:$0xff]  ;;  %v454_v43 = vld [vmem:[#allocation4 + $0x1e0] sm:$0xff]  ;;  %v456_v51 = vld [vmem:[#allocation4 + $0x1f0] sm:$0xff]  ;;  %v132_v55 = vadd.f32 %v131_v41, %v69_v34  ;;  %v212_v63 = vadd.f32 %v211_v47, %v111_v31 }
  0x35   :  { %v174_v37 = vadd.f32 %v173_v23, %v112_v16  ;;  %v73_v39 = vld [vmem:[%s883_s0 + $0xa8] sm:$0xff]  ;;  %v124_v45 = vadd.f32 %v123_v30, %v122_v17  ;;  %468 = vmatpush.msrb.mxu0 %v454_v43  ;;  %v457_v52 = vld [vmem:[#allocation4 + $0x1f8] sm:$0xff]  ;;  %v182_v56 = vadd.f32 %v181_v42, %v93_v35  ;;  %508 = vmatpush.msrb.mxu2 %v456_v51  ;;  %v450_v57 = vld [vmem:[#allocation4 + $0x1c0] sm:$0xff]  ;;  %v162_v13 = vrot.slane %v161_v62, 4 }
  0x36   :  { %v202_v22 = vadd.f32 %v201_v9, %v200_v61  ;;  %v152_v29 = vadd.f32 %v151_v15, %v150_v2  ;;  %v97_v40 = vld [vmem:[%s883_s0 + $0x168] sm:$0xff]  ;;  %v452_v59 = vld [vmem:[#allocation4 + $0x1d0] sm:$0xff]  ;;  %528 = vmatpush.msrb.mxu3 %v457_v52  ;;  %v453_v1 = vld [vmem:[#allocation4 + $0x1d8] sm:$0xff]  ;;  %v133_v6 = vadd.f32 %v132_v55, %v73_v39  ;;  %v213_v14 = vadd.f32 %v212_v63, %v115_v38 }
  0x37   :  { %v77_v48 = vld [vmem:[%s883_s0 + $0xc8] sm:$0xff]  ;;  %v175_v54 = vrot.slane %v174_v37, 4  ;;  %v125_v61 = vrot.slane %v124_v45, 2  ;;  %469 = vmatpush.msrb.mxu0 %v450_v57  ;;  %v446_v2 = vld [vmem:[#allocation4 + $0x1a0] sm:$0xff]  ;;  %v183_v7 = vadd.f32 %v182_v56, %v97_v40  ;;  %509 = vmatpush.msrb.mxu2 %v452_v59  ;;  %v448_v8 = vld [vmem:[#allocation4 + $0x1b0] sm:$0xff]  ;;  %v163_v25 = vadd.f32 %v162_v13, %v161_v62 }
  0x38   :  { %v203_v36 = vrot.slane %v202_v22, 2  ;;  %v153_v44 = vrot.slane %v152_v29, 1  ;;  %v101_v49 = vld [vmem:[%s883_s0 + $0x188] sm:$0xff]  ;;  %v449_v9 = vld [vmem:[#allocation4 + $0x1b8] sm:$0xff]  ;;  %v442_v10 = vld [vmem:[#allocation4 + $0x180] sm:$0xff]  ;;  %529 = vmatpush.msrb.mxu3 %v453_v1  ;;  %v134_v20 = vadd.f32 %v133_v6, %v77_v48  ;;  %v214_v26 = vrot.slane %v213_v14, 4 }
  0x39   :  { %v455_v50 = vld [vmem:[#allocation4 + $0x1e8] sm:$0xff]  ;;  %v176_v5 = vadd.f32 %v175_v54, %v174_v37  ;;  %v126_v12 = vadd.f32 %v125_v61, %v124_v45  ;;  %470 = vmatpush.msrb.mxu0 %v446_v2  ;;  %v444_v17 = vld [vmem:[#allocation4 + $0x190] sm:$0xff]  ;;  %v184_v21 = vadd.f32 %v183_v7, %v101_v49  ;;  %510 = vmatpush.msrb.mxu2 %v448_v8  ;;  %v438_v23 = vld [vmem:[#allocation4 + $0x160] sm:$0xff] }
  0x3a   :  { %v204_v53 = vadd.f32 %v203_v36, %v202_v22  ;;  %488 = vmatpush.msrb.mxu1 %v455_v50  ;;  %v451_v58 = vld [vmem:[#allocation4 + $0x1c8] sm:$0xff]  ;;  %v154_v60 = vadd.f32 %v153_v44, %v152_v29  ;;  %v445_v22 = vld [vmem:[#allocation4 + $0x198] sm:$0xff]  ;;  %530 = vmatpush.msrb.mxu3 %v449_v9  ;;  %v440_v29 = vld [vmem:[#allocation4 + $0x170] sm:$0xff]  ;;  %v164_v36 = vrot.slane %v163_v25, 2  ;;  %v215_v37 = vadd.f32 %v214_v26, %v213_v14 }
  0x3b   :  { %v81_v0 = vld [vmem:[%s883_s0 + $0xe8] sm:$0xff]  ;;  %v177_v19 = vrot.slane %v176_v5, 2  ;;  %v127_v24 = vrot.slane %v126_v12, 1  ;;  %471 = vmatpush.msrb.mxu0 %v442_v10  ;;  %511 = vmatpush.msrb.mxu2 %v444_v17  ;;  %v441_v34 = vld [vmem:[#allocation4 + $0x178] sm:$0xff]  ;;  %v434_v39 = vld [vmem:[#allocation4 + $0x140] sm:$0xff] }
  0x3c   :  { %v447_v3 = vld [vmem:[#allocation4 + $0x1a8] sm:$0xff]  ;;  %v205_v4 = vrot.slane %v204_v53, 1  ;;  %489 = vmatpush.msrb.mxu1 %v451_v58  ;;  %v222_v11 = vmul.f32 0.015625, %v154_v60  ;;  %v135_v32 = vadd.f32 %v134_v20, %v81_v0  ;;  %531 = vmatpush.msrb.mxu3 %v445_v22  ;;  %v436_v45 = vld [vmem:[#allocation4 + $0x150] sm:$0xff]  ;;  %v437_v46 = vld [vmem:[#allocation4 + $0x158] sm:$0xff]  ;;  %v165_v47 = vadd.f32 %v164_v36, %v163_v25 }
  0x3d   :  { %v105_v15 = vld [vmem:[%s883_s0 + $0x1a8] sm:$0xff]  ;;  %v178_v31 = vadd.f32 %v177_v19, %v176_v5  ;;  %v128_v35 = vadd.f32 %v127_v24, %v126_v12  ;;  %472 = vmatpush.msrb.mxu0 %v438_v23  ;;  %512 = vmatpush.msrb.mxu2 %v440_v29  ;;  %v216_v48 = vrot.slane %v215_v37, 2  ;;  %v430_v49 = vld [vmem:[#allocation4 + $0x120] sm:$0xff]  ;;  %v432_v55 = vld [vmem:[#allocation4 + $0x130] sm:$0xff] }
  0x3e   :  { %v443_v16 = vld [vmem:[#allocation4 + $0x188] sm:$0xff]  ;;  %v206_v18 = vadd.f32 %v205_v4, %v204_v53  ;;  %490 = vmatpush.msrb.mxu1 %v447_v3  ;;  %v185_v33 = vadd.f32 %v184_v21, %v105_v15  ;;  %v136_v43 = vrot.slane %v135_v32, 4  ;;  %532 = vmatpush.msrb.mxu3 %v441_v34  ;;  %v433_v56 = vld [vmem:[#allocation4 + $0x138] sm:$0xff]  ;;  %v166_v57 = vrot.slane %v165_v47, 1  ;;  %v426_v59 = vld [vmem:[#allocation4 + $0x100] sm:$0xff] }
  0x3f   :  { %v109_v27 = vld [vmem:[%s883_s0 + $0x1c8] sm:$0xff]  ;;  %v179_v42 = vrot.slane %v178_v31, 1  ;;  %v220_v52 = vmul.f32 0.015625, %v128_v35  ;;  %473 = vmatpush.msrb.mxu0 %v434_v39  ;;  %v217_v58 = vadd.f32 %v216_v48, %v215_v37  ;;  %513 = vmatpush.msrb.mxu2 %v436_v45  ;;  %v428_v0 = vld [vmem:[#allocation4 + $0x110] sm:$0xff]  ;;  %v429_v3 = vld [vmem:[#allocation4 + $0x118] sm:$0xff] }
  0x40   :  { %v439_v28 = vld [vmem:[#allocation4 + $0x168] sm:$0xff]  ;;  %v226_v30 = vmul.f32 0.015625, %v206_v18  ;;  %491 = vmatpush.msrb.mxu1 %v443_v16  ;;  %v186_v44 = vadd.f32 %v185_v33, %v109_v27  ;;  %v137_v53 = vadd.f32 %v136_v43, %v135_v32  ;;  %533 = vmatpush.msrb.mxu3 %v437_v46  ;;  %v167_v1 = vadd.f32 %v166_v57, %v165_v47  ;;  %v422_v4 = vld [vmem:[#allocation4 + $0xe0] sm:$0xff]  ;;  %v424_v9 = vld [vmem:[#allocation4 + $0xf0] sm:$0xff] }
  0x41   :  { %v113_v38 = vld [vmem:[%s883_s0 + $0x1e8] sm:$0xff]  ;;  %v180_v51 = vadd.f32 %v179_v42, %v178_v31  ;;  %474 = vmatpush.msrb.mxu0 %v430_v49  ;;  %v218_v2 = vrot.slane %v217_v58, 1  ;;  %514 = vmatpush.msrb.mxu2 %v432_v55  ;;  %v425_v12 = vld [vmem:[#allocation4 + $0xf8] sm:$0xff]  ;;  %v418_v13 = vld [vmem:[#allocation4 + $0xc0] sm:$0xff] }
  0x42   :  { %v435_v40 = vld [vmem:[#allocation4 + $0x148] sm:$0xff]  ;;  %v307_v41 = vsel %vm304_vm0, %v226_v30, %v222_v11  ;;  %492 = vmatpush.msrb.mxu1 %v439_v28  ;;  %v187_v54 = vadd.f32 %v186_v44, %v113_v38  ;;  %v138_v62 = vrot.slane %v137_v53, 2  ;;  %534 = vmatpush.msrb.mxu3 %v433_v56  ;;  %v223_v11 = vmul.f32 0.015625, %v167_v1  ;;  %v420_v17 = vld [vmem:[#allocation4 + $0xd0] sm:$0xff]  ;;  %v421_v21 = vld [vmem:[#allocation4 + $0xd8] sm:$0xff] }
  0x43   :  { %369 = vmatmul.f32.vlgmr.msra.gmra.mxu2 %v307_v41  ;;  %v431_v50 = vld [vmem:[#allocation4 + $0x128] sm:$0xff]  ;;  %v224_v61 = vmul.f32 0.015625, %v180_v51  ;;  %475 = vmatpush.msrb.mxu0 %v426_v59  ;;  %v219_v10 = vadd.f32 %v218_v2, %v217_v58  ;;  %v414_v28 = vld [vmem:[#allocation4 + $0xa0] sm:$0xff]  ;;  %v416_v30 = vld [vmem:[#allocation4 + $0xb0] sm:$0xff] }
  0x44   :  { %493 = vmatpush.msrb.mxu1 %v435_v40  ;;  %v427_v60 = vld [vmem:[#allocation4 + $0x108] sm:$0xff]  ;;  %v188_v63 = vrot.slane %v187_v54, 4  ;;  %v139_v6 = vadd.f32 %v138_v62, %v137_v53  ;;  %515 = vmatpush.msrb.mxu2 %v428_v0  ;;  %v417_v31 = vld [vmem:[#allocation4 + $0xb8] sm:$0xff]  ;;  %v410_v32 = vld [vmem:[#allocation4 + $0x80] sm:$0xff] }
  0x45   :  { %v305_v5 = vsel %vm304_vm0, %v224_v61, %v220_v52  ;;  %v423_v8 = vld [vmem:[#allocation4 + $0xe8] sm:$0xff]  ;;  %535 = vmatpush.msrb.mxu3 %v429_v3  ;;  %476 = vmatpush.msrb.mxu0 %v422_v4  ;;  %v227_v18 = vmul.f32 0.015625, %v219_v10  ;;  %v412_v34 = vld [vmem:[#allocation4 + $0x90] sm:$0xff]  ;;  %v413_v35 = vld [vmem:[#allocation4 + $0x98] sm:$0xff] }
  0x46   :  { %494 = vmatpush.msrb.mxu1 %v431_v50  ;;  %v189_v7 = vadd.f32 %v188_v63, %v187_v54  ;;  %329 = vmatmul.f32.vlgmr.msra.gmra.mxu0 %v305_v5  ;;  %v140_v14 = vrot.slane %v139_v6, 1  ;;  %v419_v16 = vld [vmem:[#allocation4 + $0xc8] sm:$0xff]  ;;  %v406_v36 = vld [vmem:[#allocation4 + $0x60] sm:$0xff]  ;;  %v408_v38 = vld [vmem:[#allocation4 + $0x70] sm:$0xff] }
  0x47   :  { %516 = vmatpush.msrb.mxu2 %v424_v9  ;;  %536 = vmatpush.msrb.mxu3 %v425_v12  ;;  %v308_v22 = vsel %vm304_vm0, %v227_v18, %v223_v11  ;;  %v415_v29 = vld [vmem:[#allocation4 + $0xa8] sm:$0xff]  ;;  %v409_v39 = vld [vmem:[#allocation4 + $0x78] sm:$0xff]  ;;  %v402_v40 = vld [vmem:[#allocation4 + $0x40] sm:$0xff] }
  0x48   :  { %495 = vmatpush.msrb.mxu1 %v427_v60  ;;  %v190_v15 = vrot.slane %v189_v7, 2  ;;  %v141_v19 = vadd.f32 %v140_v14, %v139_v6  ;;  %477 = vmatpush.msrb.mxu0 %v418_v13  ;;  %v411_v33 = vld [vmem:[#allocation4 + $0x88] sm:$0xff]  ;;  %v404_v42 = vld [vmem:[#allocation4 + $0x50] sm:$0xff]  ;;  %v405_v43 = vld [vmem:[#allocation4 + $0x58] sm:$0xff] }
  0x49   :  { %517 = vmatpush.msrb.mxu2 %v420_v17  ;;  %389 = vmatmul.f32.vlgmr.msra.gmra.mxu3 %v308_v22  ;;  %v407_v37 = vld [vmem:[#allocation4 + $0x68] sm:$0xff]  ;;  %v398_v44 = vld [vmem:[#allocation4 + $0x20] sm:$0xff]  ;;  %v400_v46 = vld [vmem:[#allocation4 + $0x30] sm:$0xff] }
  0x4a   :  { %496 = vmatpush.msrb.mxu1 %v423_v8  ;;  %v191_v20 = vadd.f32 %v190_v15, %v189_v7  ;;  %537 = vmatpush.msrb.mxu3 %v421_v21  ;;  %v221_v25 = vmul.f32 0.015625, %v141_v19  ;;  %v403_v41 = vld [vmem:[#allocation4 + $0x48] sm:$0xff]  ;;  %v401_v47 = vld [vmem:[#allocation4 + $0x38] sm:$0xff]  ;;  %v394_v48 = vld [vmem:[#allocation4] sm:$0xff] }
  0x4b   :  { %478 = vmatpush.msrb.mxu0 %v414_v28  ;;  %518 = vmatpush.msrb.mxu2 %v416_v30  ;;  %v399_v45 = vld [vmem:[#allocation4 + $0x28] sm:$0xff]  ;;  %v396_v50 = vld [vmem:[#allocation4 + $0x10] sm:$0xff]  ;;  %v397_v51 = vld [vmem:[#allocation4 + $0x18] sm:$0xff] }
  0x4c   :  { %497 = vmatpush.msrb.mxu1 %v419_v16  ;;  %v192_v23 = vrot.slane %v191_v20, 1  ;;  %538 = vmatpush.msrb.mxu3 %v417_v31  ;;  %v395_v49 = vld [vmem:[#allocation4 + $0x8] sm:$0xff]  ;;  %v583_v52 = vld [vmem:[%s885_s2] ss:$0 sm:$0xff] }
  0x4d   :  { %479 = vmatpush.msrb.mxu0 %v410_v32  ;;  %519 = vmatpush.msrb.mxu2 %v412_v34  ;;  %v458_v62 = vld [vmem:[%s887_s4] sm:$0xf] }
  0x4e   :  { %v193_v24 = vadd.f32 %v192_v23, %v191_v20  ;;  %498 = vmatpush.msrb.mxu1 %v415_v29  ;;  %539 = vmatpush.msrb.mxu3 %v413_v35  ;;  %v461_v63 = vperm.slane %v458_v62, 1  ;;  %v460_v2 = vperm.slane %v458_v62, 0  ;;  %v462_v5 = vperm.slane %v458_v62, 2 }
  0x4f   :  { %480 = vmatpush.msrb.mxu0 %v406_v36  ;;  %520 = vmatpush.msrb.mxu2 %v408_v38  ;;  %v463_v6 = vperm.slane %v458_v62, 3 }
  0x50   :  { %v225_v26 = vmul.f32 0.015625, %v193_v24  ;;  %499 = vmatpush.msrb.mxu1 %v411_v33  ;;  %540 = vmatpush.msrb.mxu3 %v409_v39 }
  0x51   :  { %481 = vmatpush.msrb.mxu0 %v402_v40  ;;  %521 = vmatpush.msrb.mxu2 %v404_v42 }
  0x52   :  { %v306_v27 = vsel %vm304_vm0, %v225_v26, %v221_v25  ;;  %500 = vmatpush.msrb.mxu1 %v407_v37  ;;  %541 = vmatpush.msrb.mxu3 %v405_v43 }
  0x53   :  { %349 = vmatmul.f32.vlgmr.msra.gmra.mxu1 %v306_v27  ;;  %482 = vmatpush.msrb.mxu0 %v398_v44 }
  0x54   :  { %501 = vmatpush.msrb.mxu1 %v403_v41  ;;  %522 = vmatpush.msrb.mxu2 %v400_v46 }
  0x55   :  { %542 = vmatpush.msrb.mxu3 %v401_v47  ;;  %483 = vmatpush.msrb.mxu0 %v394_v48 }
  0x56   :  { %502 = vmatpush.msrb.mxu1 %v399_v45  ;;  %523 = vmatpush.msrb.mxu2 %v396_v50 }
  0x57   :  { %543 = vmatpush.msrb.mxu3 %v397_v51 }
  0x58   :  { %503 = vmatpush.msrb.mxu1 %v395_v49 }
  0xc3   :  { %v330_v53 = vpop.f32.mrf.mxu0 }
  0xc4   :  { %v331_v54 = vadd.f32 %v583_v52, %v330_v53 }
  0xc6   :  { %v370_v56 = vpop.f32.mrf.mxu2 }
  0xcc   :  { %v390_v58 = vpop.f32.mrf.mxu3 }
  0xd0   :  { %v350_v55 = vpop.f32.mrf.mxu1 }
  0xd1   :  { %v351_v57 = vadd.f32 %v350_v55, %v331_v54 }
  0xd3   :  { %v371_v59 = vadd.f32 %v370_v56, %v351_v57 }
  0xd5   :  { %v391_v60 = vadd.f32 %v390_v58, %v371_v59 }
  0xd7   :  { %v393_v61 = vmax.f32 %v391_v60, 0.0 }
  0xd9   :  { %484 = vmatmul.f32.vlgmr.msrb.gmra.mxu0 %v393_v61  ;;  %504 = vmatmul.f32.vlgmr.msrb.gmra.mxu1 %v393_v61 }
  0xda   :  { %524 = vmatmul.f32.vlgmr.msrb.gmra.mxu2 %v393_v61  ;;  %544 = vmatmul.f32.vlgmr.msrb.gmra.mxu3 %v393_v61 }
 0x156   :  { %v505_v0 = vpop.f32.mrf.mxu1  ;;  %v485_v3 = vpop.f32.mrf.mxu0 }
 0x157   :  { %v506_v1 = vadd.f32 %v505_v0, %v461_v63  ;;  %v486_v7 = vadd.f32 %v485_v3, %v460_v2 }
 0x159   :  { %v549_v4 = vmax.f32 %v506_v1, 0.0  ;;  %v548_v13 = vmax.f32 %v486_v7, 0.0 }
 0x15b   :  { %v553_v10 = vmin.f32 %v549_v4, 1.0  ;;  %v552_v19 = vmin.f32 %v548_v13, 1.0 }
 0x15d   :  { %v525_v8 = vpop.f32.mrf.mxu2  ;;  %v545_v9 = vpop.f32.mrf.mxu3  ;;  %v560_v16 = vrot.slane %v553_v10, 6 }
 0x15e   :  { %v526_v11 = vadd.f32 %v525_v8, %v462_v5  ;;  %v546_v12 = vadd.f32 %v545_v9, %v463_v6 }
 0x15f   :  { %v564_v22 = vsel %vm563_vm1, %v552_v19, %v560_v16 }
 0x160   :  { %v550_v14 = vmax.f32 %v526_v11, 0.0  ;;  %v551_v15 = vmax.f32 %v546_v12, 0.0 }
 0x162   :  { %v554_v17 = vmin.f32 %v550_v14, 1.0  ;;  %v555_v18 = vmin.f32 %v551_v15, 1.0 }
 0x164   :  { %v561_v20 = vrot.slane %v554_v17, 4  ;;  %v562_v21 = vrot.slane %v555_v18, 2 }
 0x166   :  { %v566_v23 = vsel %vm565_vm2, %v561_v20, %v562_v21 }
 0x167   :  { %v568_v24 = vsel %vm567_vm3, %v564_v22, %v566_v23 }
 0x168   :  { %570 = vst [vmem:[%s888_s5] sm:$0xff] %v568_v24 }
 0x169   :  { %575 = vsyncpa [#allocation3], 1 }
 0x16a   :  { %576 = vsyncpa [#allocation5], 1 }

// kernel: moffn_forward.5
= control target key start
LH: loop header
LB: loop body
LE: loop exit
PB: predicated region body
PF: predicated region fallthrough
CT: control target
= control target key end

     0   :  { %s2436_s0 = inlined_call_operand.vmem [shape: f32[2,8,8,512], index: 0, kind: input, shape index: {}]   ;;  %s2437_s1 = inlined_call_operand.vmem [shape: f32[2,512], index: 1, kind: input, shape index: {}]   ;;  %s2438_s2 = inlined_call_operand.hbm [shape: f32[2,8,8,256], index: 2, kind: input, shape index: {}]   ;;  %s2439_s3 = inlined_call_operand.hbm [shape: bf16[512,128], index: 3, kind: input, shape index: {}]   ;;  %s2440_s4 = inlined_call_operand.vmem [shape: f32[1,128], index: 4, kind: input, shape index: {}]   ;;  %s2441_s5 = inlined_call_operand.hbm [shape: f32[1,128], index: 5, kind: input, shape index: {}]   ;;  %s2442_s6 = inlined_call_operand.vmem [shape: f32[9,128], index: 6, kind: input, shape index: {}]   ;;  %s2443_s7 = inlined_call_operand.hbm [shape: f32[1,128], index: 7, kind: input, shape index: {}]   ;;  %s2444_s8 = inlined_call_operand.hbm [shape: f32[1,128], index: 8, kind: input, shape index: {}]   ;;  %s2445_s9 = inlined_call_operand.hbm [shape: f32[2,8,8,256], index: 9, kind: output, shape index: {}]  }
   0x1   :  { %2446 = sst [smem:[#allocation17_spill]] %s2439_s3 }
   0x2   :  { %2447 = sst [smem:[#allocation18_spill]] %s2441_s5 }
   0x3   :  { %2448 = sst [smem:[#allocation19_spill]] %s2443_s7 }
   0x4   :  { %14 = vsyncpa [#allocation4], 0 }
   0x5   :  { %16 = vsyncpa [#allocation4 + $0x1], 0 }
   0x6   :  { %17 = vsyncpa [#allocation7], 0 }
   0x7   :  { %18 = vsyncpa [#allocation10], 0 }
   0x8   :  { %19 = vsyncpa [#allocation5], 0 }
   0x9   :  { %21 = vsyncpa [#allocation5 + $0x1], 0  ;;  %s1992_s30 = smov 0   ;;  %s1994_s10 = smov 0  }
   0xa   :  { %s1996_s11 = smov 0   ;;  %s1998_s12 = smov 0  }
   0xb LB: > { %s2013_s13 = sadd.s32 4294967295, %s1929_s12   ;;  %s1416_s14 = sadd.s32 4294967294, %s1929_s12   ;;  %s1929_s12 = sphi %s1998_s12, %s2462_s12   ;;  %s1925_s11 = sphi %s1996_s11, %s2461_s11   ;;  %s1921_s10 = sphi %s1994_s10, %s2460_s10   ;;  %s1917_s30 = sphi %s1992_s30, %s2459_s30  }
   0xc   : > { %p94_p0 = scmp.ne.s32.totalorder %s1921_s10, %s1917_s30  ;;  %p95_p1 = scmp.eq.s32.totalorder %s2013_s13, 0 }
   0xd   : > { %p244_p2 = scmp.eq.s32.totalorder %s2013_s13, 1  ;;  %p250_p3 = scmp.eq.s32.totalorder %s1416_s14, 1 }
   0xe   : > { %p2022_p4 = por %p95_p1, %p94_p0  ;;  %p1417_p5 = scmp.ge.s32.totalorder %s1929_s12, 1 }
   0xf   : > { %p2027_p6 = por %p250_p3, %p94_p0  ;;  %p257_p7 = scmp.lt.s32.totalorder %s1929_s12, 3 }
  0x10   : > { %s2451_s3 = sld [smem:[#allocation17_spill]]  ;;  %s1931_s21 = smov [#allocation6]  }
  0x11   : > { %p2035_p8 = pnand %p1417_p5, %p257_p7  ;;  %s273_s22 = sshll.u32 %s1931_s21, 4  ;;  %s274_s22 = int_to_ptr.vmem [resolvable:$true] %s273_s22 }
  0x12   : > { %s2454_s7 = sld [smem:[#allocation19_spill]]  ;;  %s1932_s27 = smov 64  }
  0x13   : > { %p1626_p9 = pneg %p2035_p8  ;;  %s1933_s28 = smov 4  }
  0x14   : > { %s1934_s29 = smov [#allocation9]   ;;  %s2455_s5 = sld [smem:[#allocation18_spill]] }
  0x15   : > { %p2043_p10 = pnand %p1626_p9, %p95_p1  ;;  %s306_s14 = sshll.u32 %s1934_s29, 4  ;;  %s307_s14 = int_to_ptr.vmem [resolvable:$true] %s306_s14 }
  0x16   : > { %s271_s19 = sshll.u32 %s2451_s3, 4  ;;  %p88_p12 = scmp.ne.s32.totalorder %s1925_s11, %s1921_s10  ;;  %s272_s19 = int_to_ptr.hbm [resolvable:$true] %s271_s19 }
  0x17   : > { %1629 = dma.hbm_to_vmem [thread:$0]  (!%p2043_p10), %s272_s19, 4096, %s274_s22, [#allocation7], %s1932_s27, %s1932_s27, %s1933_s28  }
  0x18   : > { %s304_s26 = sshll.u32 %s2454_s7, 4  ;;  %s316_s19 = sshll.u32 %s2444_s8, 4  ;;  %s305_s26 = int_to_ptr.hbm [resolvable:$true] %s304_s26  ;;  %s317_s19 = int_to_ptr.hbm [resolvable:$true] %s316_s19 }
  0x19   : > { %1635 = dma.hbm_to_vmem [thread:$0]  (!%p2043_p10), %s305_s26, 16, %s307_s14, [#allocation10]  }
  0x1a   : > { %s289_s21 = sshll.u32 %s2455_s5, 4  ;;  %s1935_s22 = smov [#allocation8]   ;;  %s290_s21 = int_to_ptr.hbm [resolvable:$true] %s289_s21 }
  0x1b   : > { %s291_s27 = sshll.u32 %s1935_s22, 4  ;;  %s1936_s28 = smov [#allocation11]   ;;  %s292_s27 = int_to_ptr.vmem [resolvable:$true] %s291_s27 }
  0x1c   : > { %1632 = dma.hbm_to_vmem [thread:$0]  (!%p2043_p10), %s290_s21, 16, %s292_s27, [#allocation7]  }
  0x1d   : > { %s318_s29 = sshll.u32 %s1936_s28, 4  ;;  %s2066_s26 = sadd.s32 1, %s1929_s12   ;;  %s319_s29 = int_to_ptr.vmem [resolvable:$true] %s318_s29 }
  0x1e   : > { %1638 = dma.hbm_to_vmem [thread:$0]  (!%p2043_p10), %s317_s19, 16, %s319_s29, [#allocation10]  }
  0x1f   : > { %s81_s14 = sadd.s32 1, %s1925_s11  ;;  %s78_s17 = ssub.s32 %s1929_s12, %s2066_s26 }
  0x20   : > { %p79_p13 = scmp.eq.s32.totalorder %s78_s17, 0  ;;  %p89_p0 = scmp.eq.s32.totalorder %s1929_s12, 0 }
  0x21   : > { %p2076_p3 = por %p244_p2, %p88_p12  ;;  %p1651_p5 = scmp.lt.s32.totalorder %s1929_s12, 2 }
  0x22   : > { %s2082_s21 = scalar_select %p79_p13, %s1925_s11, %s81_s14  }
  0x23   : > { %p90_p7 = por %p89_p0, %p88_p12  ;;  %s337_s24 = sand.u32 1, %s1925_s11  }
  0x24   : > { %s1423_s23 = sshll.u32 %s337_s24, 7  ;;  %s1570_s25 = sshll.u32 %s1929_s12, 7 }
  0x25   : > { %s346_s27 = scalar_lea.hbm %s2438_s2, %s1570_s25  ;;  %s341_s28 = scalar_lea.vmem [#allocation3], %s1423_s23 }
  0x26   : > { %s349_s29 = sshll.u32 %s341_s28, 4  ;;  %s347_s17 = sshll.u32 %s346_s27, 4  ;;  %s350_s29 = int_to_ptr.vmem [resolvable:$true] %s349_s29  ;;  %s348_s17 = int_to_ptr.hbm [resolvable:$true] %s347_s17 }
  0x27   : > { %p2089_p2 = pnand %p1651_p5, %p90_p7  ;;  %s338_s14 = scalar_lea.sflag [#allocation4], %s337_s24 }
  0x28   : > { %s1825_s5 = sshra.s32 %s348_s17, 4  ;;  %s1832_s19 = scalar_lea.hbm %s2438_s2, 256  ;;  %s1826_s5 = int_to_ptr.hbm [resolvable:$true] %s1825_s5 }
  0x29   : > { %s1827_s7 = scalar_lea.hbm %s1826_s5, 128  ;;  %p1829_p10 = pneg %p2089_p2 }
  0x2a   : > { %p1828_p9 = scmp.ne.s32.totalorder %s1826_s5, %s1827_s7  ;;  %p1833_p0 = scmp.lt.s32.totalorder %s1826_s5, %s2438_s2 }
  0x2b   : > { %p1834_p5 = scmp.lt.s32.totalorder %s1832_s19, %s1827_s7 }
  0x2c   : > { %p1830_p12 = pnand %p1829_p10, %p1828_p9 }
  0x2d   : > { %p1835_p7 = por %p1834_p5, %p1833_p0 }
  0x2e   : > { %p1831_p13 = pneg %p1830_p12 }
  0x30   : > { %p1836_p11 = pnand %p1835_p7, %p1831_p13 }
  0x32   : > { %1839 = shalt.err (!%p1836_p11)
}
  0x33   : > { %s1937_s24 = smov 256   ;;  %s1938_s28 = smov 16  }
  0x34   : > { %1642 = dma.hbm_to_vmem [thread:$0]  (!%p2089_p2), %s348_s17, 2048, %s350_s29, %s338_s14, %s1937_s24, %s1937_s24, %s1938_s28  }
  0x35   : > { %361 = sbr.rel (%p2035_p8) target bundleno = 329 (0x149), region = 56  ;;  %s2106_s25 = sand.u32 (!%p2035_p8), 1, %s1921_s10  }
  0x36   : > { %s1427_s5 = sshll.u32 (!%p2035_p8), %s2106_s25, 7  ;;  %s364_s7 = scalar_lea.sflag (!%p2035_p8), [#allocation4], %s2106_s25 }
  0x37   : > { %s2112_s23 = scalar_lea.vmem (!%p2035_p8), [#allocation3], %s1427_s5 }
  0x3a   : > { %1900 = dma.done.wait (%p2022_p4), %s364_s7, 2048  }
  0x3b   : > { %1902 = vsyncadd (%p2022_p4), %s364_s7, 4294965248 }
  0x3c   : > { %1904 = dma.done.wait (%p95_p1), [#allocation7], 4112  }
  0x3d   : > { %1906 = vsyncadd (%p95_p1), [#allocation7], 4294963184 }
  0x3e   : > { %1908 = dma.done.wait (%p95_p1), [#allocation10], 32  }
  0x3f   : > { %1910 = vsyncadd (%p95_p1), [#allocation10], 4294967264  ;;  %v1580_v0 = vld [vmem:[#allocation6 + $0x38] sm:$0xff]  ;;  %v1579_v4 = vld [vmem:[#allocation6 + $0x30] sm:$0xff]  ;;  %s433_s3 = sshra.s32 %s2013_s13, 1  ;;  %s436_s15 = sand.u32 1, %s2013_s13 }
  0x40   : > { %v1588_v1 = vld [vmem:[#allocation6 + $0x78] sm:$0xff]  ;;  %793 = vmatpush.bf16.msra.mxu0 %v1580_v0  ;;  %v1587_v5 = vld [vmem:[#allocation6 + $0x70] sm:$0xff]  ;;  %v1578_v8 = vld [vmem:[#allocation6 + $0x28] sm:$0xff]  ;;  %s1572_s20 = sshll.u32 %s433_s3, 3  ;;  %p428_p1 = scmp.lt.s32.totalorder %s2013_s13, 1 }
  0x41   : > { %v1596_v2 = vld [vmem:[#allocation6 + $0xb8] sm:$0xff]  ;;  %822 = vmatpush.bf16.msra.mxu1 %v1588_v1  ;;  %v1595_v6 = vld [vmem:[#allocation6 + $0xb0] sm:$0xff]  ;;  %v1586_v9 = vld [vmem:[#allocation6 + $0x68] sm:$0xff]  ;;  %s439_s29 = sadd.s32 %s1572_s20, %s436_s15  ;;  %s1605_s19 = sshll.u32 %s2013_s13, 7 }
  0x42   : > { %v1604_v3 = vld [vmem:[#allocation6 + $0xf8] sm:$0xff]  ;;  %851 = vmatpush.bf16.msra.mxu2 %v1596_v2  ;;  %v1603_v7 = vld [vmem:[#allocation6 + $0xf0] sm:$0xff]  ;;  %v1594_v10 = vld [vmem:[#allocation6 + $0xa8] sm:$0xff]  ;;  %s429_s17 = scalar_select %p428_p1, %s2013_s13, 1 }
  0x43   : > { %880 = vmatpush.bf16.msra.mxu3 %v1604_v3  ;;  %v1602_v11 = vld [vmem:[#allocation6 + $0xe8] sm:$0xff]  ;;  %v1577_v12 = vld [vmem:[#allocation6 + $0x20] sm:$0xff]  ;;  %s440_s22 = scalar_lea.vmem %s2437_s1, %s439_s29  ;;  %v1576_v16 = vld [vmem:[#allocation6 + $0x18] sm:$0xff]  ;;  %s1286_s24 = scalar_lea.hbm %s2445_s9, %s1605_s19 }
  0x44   : > { %794 = vmatpush.bf16.msra.mxu0 %v1579_v4  ;;  %v1585_v13 = vld [vmem:[#allocation6 + $0x60] sm:$0xff]  ;;  %v1584_v17 = vld [vmem:[#allocation6 + $0x58] sm:$0xff]  ;;  %s1571_s27 = sshll.u32 %s429_s17, 8  ;;  %v441_v20 = vld [vmem:[%s440_s22] ss:$2 sm:$0xf] }
  0x45   : > { %823 = vmatpush.bf16.msra.mxu1 %v1587_v5  ;;  %v1593_v14 = vld [vmem:[#allocation6 + $0xa0] sm:$0xff]  ;;  %v1592_v18 = vld [vmem:[#allocation6 + $0x98] sm:$0xff]  ;;  %v1575_v21 = vld [vmem:[#allocation6 + $0x10] sm:$0xff]  ;;  %s2136_s7 = scalar_lea.vmem %s2436_s0, %s1571_s27  ;;  %v2138_v27 = vperm.slane %v441_v20, 0  ;;  %v2142_v32 = vperm.slane %v441_v20, 1  ;;  %v2144_v33 = vperm.slane %v441_v20, 2 }
  0x46   : > { %852 = vmatpush.bf16.msra.mxu2 %v1595_v6  ;;  %v1601_v15 = vld [vmem:[#allocation6 + $0xe0] sm:$0xff]  ;;  %v1600_v19 = vld [vmem:[#allocation6 + $0xd8] sm:$0xff]  ;;  %v1583_v22 = vld [vmem:[#allocation6 + $0x50] sm:$0xff]  ;;  %v2149_v37 = vperm.slane %v441_v20, 3  ;;  %s2239_s17 = scalar_lea.vmem [#allocation12], %s1427_s5  ;;  %s1289_s13 = sshll.u32 %s1286_s24, 4  ;;  %s1290_s13 = int_to_ptr.hbm [resolvable:$true] %s1289_s13 }
  0x47   : > { %881 = vmatpush.bf16.msra.mxu3 %v1603_v7  ;;  %v1591_v23 = vld [vmem:[#allocation6 + $0x90] sm:$0xff]  ;;  %v1574_v25 = vld [vmem:[#allocation6 + $0x8] sm:$0xff]  ;;  %v443_v34 = vld [vmem:[%s2136_s7 + $0x8] sm:$0xff]  ;;  %s1287_s28 = sshll.u32 %s2239_s17, 4  ;;  %s1869_s3 = sshra.s32 %s1290_s13, 4  ;;  %s1288_s28 = int_to_ptr.vmem [resolvable:$true] %s1287_s28  ;;  %s1870_s3 = int_to_ptr.hbm [resolvable:$true] %s1869_s3 }
  0x48   : > { %795 = vmatpush.bf16.msra.mxu0 %v1578_v8  ;;  %v1599_v24 = vld [vmem:[#allocation6 + $0xd0] sm:$0xff]  ;;  %v1582_v26 = vld [vmem:[#allocation6 + $0x48] sm:$0xff]  ;;  %v447_v35 = vld [vmem:[%s2136_s7 + $0x28] sm:$0xff]  ;;  %v484_v43 = vmul.f32 %v2142_v32, %v443_v34  ;;  %s1871_s15 = scalar_lea.hbm %s1870_s3, 128  ;;  %s1875_s5 = scalar_lea.hbm %s2445_s9, 256 }
  0x49   : > { %824 = vmatpush.bf16.msra.mxu1 %v1586_v9  ;;  %v1590_v28 = vld [vmem:[#allocation6 + $0x88] sm:$0xff]  ;;  %v442_v30 = vld [vmem:[%s2136_s7] sm:$0xff]  ;;  %v444_v36 = vld [vmem:[%s2136_s7 + $0x10] sm:$0xff]  ;;  %v488_v44 = vmul.f32 %v2142_v32, %v447_v35  ;;  %p1872_p4 = scmp.ne.s32.totalorder %s1870_s3, %s1871_s15  ;;  %p1876_p2 = scmp.lt.s32.totalorder %s1870_s3, %s2445_s9 }
  0x4a   : > { %853 = vmatpush.bf16.msra.mxu2 %v1594_v10  ;;  %v1598_v29 = vld [vmem:[#allocation6 + $0xc8] sm:$0xff]  ;;  %v446_v31 = vld [vmem:[%s2136_s7 + $0x20] sm:$0xff]  ;;  %v448_v38 = vld [vmem:[%s2136_s7 + $0x30] sm:$0xff]  ;;  %v483_v41 = vmul.f32 %v2138_v27, %v442_v30  ;;  %v485_v45 = vmul.f32 %v2144_v33, %v444_v36  ;;  %p1877_p9 = scmp.lt.s32.totalorder %s1875_s5, %s1871_s15 }
  0x4b   : > { %882 = vmatpush.bf16.msra.mxu3 %v1602_v11  ;;  %v445_v39 = vld [vmem:[%s2136_s7 + $0x18] sm:$0xff]  ;;  %v487_v42 = vmul.f32 %v2138_v27, %v446_v31  ;;  %v1573_v46 = vld [vmem:[#allocation6] sm:$0xff]  ;;  %v489_v48 = vmul.f32 %v2144_v33, %v448_v38  ;;  %v586_v54 = vpack.c.bf16 %v488_v44, %v484_v43  ;;  %v450_v57 = vld [vmem:[%s2136_s7 + $0x40] sm:$0xff]  ;;  %p1873_p8 = pnand %p1872_p4, %p2076_p3 }
  0x4c   : > { %796 = vmatpush.bf16.msra.mxu0 %v1577_v12  ;;  %v449_v40 = vld [vmem:[%s2136_s7 + $0x38] sm:$0xff]  ;;  %v1581_v47 = vld [vmem:[#allocation6 + $0x40] sm:$0xff]  ;;  %v486_v49 = vmul.f32 %v2149_v37, %v445_v39  ;;  %v454_v58 = vld [vmem:[%s2136_s7 + $0x60] sm:$0xff]  ;;  %v491_v1 = vmul.f32 %v2138_v27, %v450_v57  ;;  %p1878_p10 = por %p1877_p9, %p1876_p2 }
  0x4d   : > { %825 = vmatpush.bf16.msra.mxu1 %v1585_v13  ;;  %v490_v50 = vmul.f32 %v2149_v37, %v449_v40  ;;  %v1589_v51 = vld [vmem:[#allocation6 + $0x80] sm:$0xff]  ;;  %v585_v53 = vpack.c.bf16 %v487_v42, %v483_v41  ;;  %v587_v55 = vpack.c.bf16 %v489_v48, %v485_v45  ;;  %v451_v59 = vld [vmem:[%s2136_s7 + $0x48] sm:$0xff]  ;;  %v453_v63 = vld [vmem:[%s2136_s7 + $0x58] sm:$0xff]  ;;  %v495_v2 = vmul.f32 %v2138_v27, %v454_v58  ;;  %p1874_p11 = pneg %p1873_p8 }
  0x4e   : > { %854 = vmatpush.bf16.msra.mxu2 %v1593_v14  ;;  %v1597_v52 = vld [vmem:[#allocation6 + $0xc0] sm:$0xff]  ;;  %v455_v60 = vld [vmem:[%s2136_s7 + $0x68] sm:$0xff]  ;;  %v457_v0 = vld [vmem:[%s2136_s7 + $0x78] sm:$0xff]  ;;  %v492_v3 = vmul.f32 %v2142_v32, %v451_v59  ;;  %v494_v7 = vmul.f32 %v2149_v37, %v453_v63 }
  0x4f   : > { %883 = vmatpush.bf16.msra.mxu3 %v1601_v15  ;;  %v588_v56 = vpack.c.bf16 %v490_v50, %v486_v49  ;;  %v452_v61 = vld [vmem:[%s2136_s7 + $0x50] sm:$0xff]  ;;  %v496_v4 = vmul.f32 %v2142_v32, %v455_v60  ;;  %v498_v8 = vmul.f32 %v2149_v37, %v457_v0  ;;  %v589_v9 = vpack.c.bf16 %v495_v2, %v491_v1  ;;  %v458_v13 = vld [vmem:[%s2136_s7 + $0x80] sm:$0xff]  ;;  %v459_v15 = vld [vmem:[%s2136_s7 + $0x88] sm:$0xff]  ;;  %p1879_p12 = pnand %p1878_p10, %p1874_p11 }
  0x50   : > { %797 = vmatpush.bf16.msra.mxu0 %v1576_v16  ;;  %v456_v62 = vld [vmem:[%s2136_s7 + $0x70] sm:$0xff]  ;;  %v493_v5 = vmul.f32 %v2144_v33, %v452_v61  ;;  %v462_v14 = vld [vmem:[%s2136_s7 + $0xa0] sm:$0xff]  ;;  %v463_v16 = vld [vmem:[%s2136_s7 + $0xa8] sm:$0xff] }
  0x51   : > { %826 = vmatpush.bf16.msra.mxu1 %v1584_v17  ;;  %v497_v6 = vmul.f32 %v2144_v33, %v456_v62  ;;  %v590_v10 = vpack.c.bf16 %v496_v4, %v492_v3  ;;  %v592_v12 = vpack.c.bf16 %v498_v8, %v494_v7  ;;  %v460_v17 = vld [vmem:[%s2136_s7 + $0x90] sm:$0xff]  ;;  %v465_v20 = vld [vmem:[%s2136_s7 + $0xb8] sm:$0xff]  ;;  %v466_v36 = vld [vmem:[%s2136_s7 + $0xc0] sm:$0xff] }
  0x52   : > { %855 = vmatpush.bf16.msra.mxu2 %v1592_v18  ;;  %v464_v18 = vld [vmem:[%s2136_s7 + $0xb0] sm:$0xff]  ;;  %v470_v38 = vld [vmem:[%s2136_s7 + $0xe0] sm:$0xff]  ;;  %v467_v39 = vld [vmem:[%s2136_s7 + $0xc8] sm:$0xff]  ;;  %v507_v45 = vmul.f32 %v2138_v27, %v466_v36 }
  0x53   : > { %884 = vmatpush.bf16.msra.mxu3 %v1600_v19  ;;  %v591_v11 = vpack.c.bf16 %v497_v6, %v493_v5  ;;  %v461_v19 = vld [vmem:[%s2136_s7 + $0x98] sm:$0xff]  ;;  %v471_v40 = vld [vmem:[%s2136_s7 + $0xe8] sm:$0xff]  ;;  %v468_v41 = vld [vmem:[%s2136_s7 + $0xd0] sm:$0xff] }
  0x54   : > { %798 = vmatpush.bf16.msra.mxu0 %v1575_v21  ;;  %v499_v21 = vmul.f32 %v2138_v27, %v458_v13  ;;  %v472_v42 = vld [vmem:[%s2136_s7 + $0xf0] sm:$0xff]  ;;  %v469_v43 = vld [vmem:[%s2136_s7 + $0xd8] sm:$0xff]  ;;  %v512_v48 = vmul.f32 %v2142_v32, %v471_v40  ;;  %v509_v49 = vmul.f32 %v2144_v33, %v468_v41  ;;  %v2213_v60 = vld [vmem:[%s2440_s4] ss:$0 sm:$0xff] }
  0x55   : > { %827 = vmatpush.bf16.msra.mxu1 %v1583_v22  ;;  %v503_v22 = vmul.f32 %v2138_v27, %v462_v14  ;;  %v473_v44 = vld [vmem:[%s2136_s7 + $0xf8] sm:$0xff]  ;;  %v513_v50 = vmul.f32 %v2144_v33, %v472_v42  ;;  %v2218_v63 = vld [vmem:[%s2442_s6] sm:$0xff]  ;;  %v2220_v1 = vld [vmem:[#allocation8] ss:$0 sm:$0xff]  ;;  %s1275_s7 = scalar_lea.sflag [#allocation5], %s2106_s25 }
  0x56   : > { %856 = vmatpush.bf16.msra.mxu2 %v1591_v23  ;;  %v500_v23 = vmul.f32 %v2142_v32, %v459_v15  ;;  %v2224_v3 = vperm.slane %v2218_v63, 0  ;;  %v2227_v5 = vperm.slane %v2218_v63, 1  ;;  %v2234_v14 = vperm.slane %v2218_v63, 2 }
  0x57   : > { %885 = vmatpush.bf16.msra.mxu3 %v1599_v24  ;;  %v504_v24 = vmul.f32 %v2142_v32, %v463_v16  ;;  %v593_v30 = vpack.c.bf16 %v503_v22, %v499_v21  ;;  %v2249_v40 = vperm.slane %v2218_v63, 4 }
  0x58   : > { %799 = vmatpush.bf16.msra.mxu0 %v1574_v25  ;;  %v501_v25 = vmul.f32 %v2144_v33, %v460_v17  ;;  %v1004_v8 = vmul.f32 0.0, %v2227_v5 }
  0x59   : > { %828 = vmatpush.bf16.msra.mxu1 %v1582_v26  ;;  %v505_v26 = vmul.f32 %v2144_v33, %v464_v18  ;;  %v594_v31 = vpack.c.bf16 %v504_v24, %v500_v23 }
  0x5a   : > { %857 = vmatpush.bf16.msra.mxu2 %v1590_v28  ;;  %v502_v28 = vmul.f32 %v2149_v37, %v461_v19 }
  0x5b   : > { %886 = vmatpush.bf16.msra.mxu3 %v1598_v29  ;;  %v506_v29 = vmul.f32 %v2149_v37, %v465_v20  ;;  %v595_v34 = vpack.c.bf16 %v505_v26, %v501_v25  ;;  %v2244_v25 = vperm.slane %v2218_v63, 3 }
  0x5c   : > { %800 = vmatpush.bf16.msra.mxu0 %v1573_v46  ;;  %v511_v46 = vmul.f32 %v2138_v27, %v470_v38  ;;  %v1939_v27 = vmov 0.0  }
  0x5d   : > { %829 = vmatpush.bf16.msra.mxu1 %v1581_v47  ;;  %v596_v35 = vpack.c.bf16 %v506_v29, %v502_v28  ;;  %v508_v47 = vmul.f32 %v2142_v32, %v467_v39  ;;  %939 = vst [vmem:[#allocation2] sm:$0xff] %v1939_v27 }
  0x5e   : > { %858 = vmatpush.bf16.msra.mxu2 %v1589_v51  ;;  %v510_v51 = vmul.f32 %v2149_v37, %v469_v43  ;;  %940 = vst [vmem:[#allocation2 + $0x8] sm:$0xff] %v1939_v27 }
  0x5f   : > { %887 = vmatpush.bf16.msra.mxu3 %v1597_v52  ;;  %801 = vmatmul.bf16.vlgmr.msra.gmra.mxu0 %v585_v53  ;;  %v514_v52 = vmul.f32 %v2149_v37, %v473_v44  ;;  %v597_v53 = vpack.c.bf16 %v511_v46, %v507_v45  ;;  %941 = vst [vmem:[#allocation2 + $0x10] sm:$0xff] %v1939_v27 }
  0x60   : > { %830 = vmatmul.bf16.vlgmr.msra.gmra.mxu1 %v586_v54  ;;  %v598_v54 = vpack.c.bf16 %v512_v48, %v508_v47  ;;  %942 = vst [vmem:[#allocation2 + $0x18] sm:$0xff] %v1939_v27  ;;  %v2255_v47 = vperm.slane %v2218_v63, 5 }
  0x61   : > { %859 = vmatmul.bf16.vlgmr.msra.gmra.mxu2 %v587_v55  ;;  %v599_v55 = vpack.c.bf16 %v513_v50, %v509_v49  ;;  %944 = vst [vmem:[#allocation2 + $0x28] sm:$0xff] %v1939_v27 }
  0x62   : > { %888 = vmatmul.bf16.vlgmr.msra.gmra.mxu3 %v588_v56  ;;  %v600_v56 = vpack.c.bf16 %v514_v52, %v510_v51  ;;  %945 = vst [vmem:[#allocation2 + $0x30] sm:$0xff] %v1939_v27 }
  0x63   : > { %947 = vst [vmem:[#allocation2 + $0x40] sm:$0xff] %v1939_v27 }
  0x64   : > { %948 = vst [vmem:[#allocation2 + $0x48] sm:$0xff] %v1939_v27 }
  0x65   : > { %950 = vst [vmem:[#allocation2 + $0x58] sm:$0xff] %v1939_v27  ;;  %v978_v4 = vld [vmem:[#allocation2 + $0x7] sm:$0xff] }
  0x66   : > { %951 = vst [vmem:[#allocation2 + $0x60] sm:$0xff] %v1939_v27  ;;  %v987_v13 = vmul.f32 %v2224_v3, %v978_v4  ;;  %v1020_v18 = vld [vmem:[#allocation2 + $0x9] sm:$0xff]  ;;  %v2274_v4 = vld [vmem:[%s2442_s6 + $0x8] ss:$0 sm:$0xff] }
  0x67   : > { %953 = vst [vmem:[#allocation2 + $0x70] sm:$0xff] %v1939_v27  ;;  %v1029_v22 = vmul.f32 %v2234_v14, %v1020_v18 }
  0x68   : > { %954 = vst [vmem:[#allocation2 + $0x78] sm:$0xff] %v1939_v27  ;;  %v1012_v21 = vadd.f32 %v1004_v8, %v987_v13 }
  0x69   : > { %956 = vst [vmem:[#allocation2 + $0x88] sm:$0xff] %v1939_v27 }
  0x6a   : > { %957 = vst [vmem:[#allocation2 + $0x90] sm:$0xff] %v1939_v27 }
  0x6b   : > { %959 = vst [vmem:[#allocation2 + $0xa0] sm:$0xff] %v1939_v27 }
  0x6c   : > { %960 = vst [vmem:[#allocation2 + $0xa8] sm:$0xff] %v1939_v27 }
  0x6d   : > { %962 = vst [vmem:[#allocation2 + $0xb8] sm:$0xff] %v1939_v27 }
  0x6e   : > { %963 = vst [vmem:[#allocation2 + $0xc0] sm:$0xff] %v1939_v27 }
  0x6f   : > { %806 = vmatmul.bf16.gmra.mxu0 %v589_v9  ;;  %965 = vst [vmem:[#allocation2 + $0xd0] sm:$0xff] %v1939_v27  ;;  %v1226_v9 = vld [vmem:[%s2112_s23] sm:$0xff] }
  0x70   : > { %835 = vmatmul.bf16.gmra.mxu1 %v590_v10  ;;  %966 = vst [vmem:[#allocation2 + $0xd8] sm:$0xff] %v1939_v27 }
  0x71   : > { %864 = vmatmul.bf16.gmra.mxu2 %v591_v11  ;;  %967 = vst [vmem:[#allocation2 + $0xe0] sm:$0xff] %v1939_v27 }
  0x72   : > { %893 = vmatmul.bf16.gmra.mxu3 %v592_v12  ;;  %968 = vst [vmem:[#allocation2 + $0xe8] sm:$0xff] %v1939_v27 }
  0x7f   : > { %811 = vmatmul.bf16.gmra.mxu0 %v593_v30  ;;  %v1037_v30 = vadd.f32 %v1029_v22, %v1012_v21  ;;  %v2282_v21 = vld [vmem:[#allocation9] ss:$0 sm:$0xff] }
  0x80   : > { %840 = vmatmul.bf16.gmra.mxu1 %v594_v31 }
  0x81   : > { %869 = vmatmul.bf16.gmra.mxu2 %v595_v34  ;;  %v1228_v34 = vld [vmem:[%s2112_s23 + $0x10] sm:$0xff] }
  0x82   : > { %898 = vmatmul.bf16.gmra.mxu3 %v596_v35 }
  0x8f   : > { %816 = vmatmul.bf16.gmra.mxu0 %v597_v53  ;;  %v2261_v53 = vperm.slane %v2218_v63, 6 }
  0x90   : > { %845 = vmatmul.bf16.gmra.mxu1 %v598_v54 }
  0x91   : > { %874 = vmatmul.bf16.gmra.mxu2 %v599_v55 }
  0x92   : > { %903 = vmatmul.bf16.gmra.mxu3 %v600_v56 }
  0xdc   : > { %v802_v32 = vpop.f32.mrf.mxu0 }
  0xdd   : > { %v831_v33 = vpop.f32.mrf.mxu1 }
  0xde   : > { %v832_v37 = vadd.f32 %v831_v33, %v802_v32 }
  0xe4   : > { %v860_v57 = vpop.f32.mrf.mxu2  ;;  %v804_v61 = vpop.f32.mrf.mxu0 }
  0xe5   : > { %v889_v58 = vpop.f32.mrf.mxu3  ;;  %v861_v59 = vadd.f32 %v860_v57, %v832_v37  ;;  %v833_v62 = vpop.f32.mrf.mxu1 }
  0xe6   : > { %v834_v7 = vadd.f32 %v833_v62, %v804_v61 }
  0xe7   : > { %v890_v0 = vadd.f32 %v889_v58, %v861_v59  ;;  %v2266_v59 = vperm.slane %v2218_v63, 7 }
  0xe9   : > { %v912_v2 = vmul.f32 %v2213_v60, %v890_v0 }
  0xeb   : > { %v923_v6 = vadd.f32 %v2220_v1, %v912_v2 }
  0xec   : > { %v862_v10 = vpop.f32.mrf.mxu2  ;;  %v807_v16 = vpop.f32.mrf.mxu0 }
  0xed   : > { %v891_v11 = vpop.f32.mrf.mxu3  ;;  %v931_v12 = vmax.f32 %v923_v6, 0.0  ;;  %v863_v15 = vadd.f32 %v862_v10, %v834_v7  ;;  %v836_v17 = vpop.f32.mrf.mxu1  ;;  %v1230_v7 = vld [vmem:[%s2112_s23 + $0x20] sm:$0xff] }
  0xee   : > { %v837_v24 = vadd.f32 %v836_v17, %v807_v16 }
  0xef   : > { %970 = vst [vmem:[#allocation2 + $0x20] sm:$0xff] %v931_v12  ;;  %v1242_v19 = vadd.f32 %v1226_v9, %v931_v12  ;;  %v892_v20 = vadd.f32 %v891_v11, %v863_v15  ;;  %v1079_v46 = vmul.f32 %v2249_v40, %v931_v12  ;;  %v1005_v48 = vmul.f32 %v2227_v5, %v931_v12 }
  0xf1   : > { %1258 = vst [vmem:[%s2239_s17] sm:$0xff] %v1242_v19  ;;  %v913_v23 = vmul.f32 %v2213_v60, %v892_v20 }
  0xf3   : > { %v924_v26 = vadd.f32 %v2220_v1, %v913_v23 }
  0xf4   : > { %v865_v28 = vpop.f32.mrf.mxu2  ;;  %v809_v36 = vpop.f32.mrf.mxu0 }
  0xf5   : > { %v894_v29 = vpop.f32.mrf.mxu3  ;;  %v932_v31 = vmax.f32 %v924_v26, 0.0  ;;  %v866_v35 = vadd.f32 %v865_v28, %v837_v24  ;;  %v838_v38 = vpop.f32.mrf.mxu1 }
  0xf6   : > { %v979_v39 = vld [vmem:[#allocation2 + $0x1f] sm:$0xff]  ;;  %v839_v51 = vadd.f32 %v838_v38, %v809_v36  ;;  %v2287_v36 = vld [vmem:[#allocation11] ss:$0 sm:$0xff] }
  0xf7   : > { %v1054_v41 = vmul.f32 %v2244_v25, %v979_v39  ;;  %971 = vst [vmem:[#allocation2 + $0x38] sm:$0xff] %v932_v31  ;;  %v1244_v42 = vadd.f32 %v1228_v34, %v932_v31  ;;  %v988_v43 = vmul.f32 %v2224_v3, %v979_v39  ;;  %v895_v45 = vadd.f32 %v894_v29, %v866_v35  ;;  %v1021_v49 = vld [vmem:[#allocation2 + $0x21] sm:$0xff] }
  0xf8   : > { %v1104_v57 = vmul.f32 %v2255_v47, %v1021_v49  ;;  %v1030_v61 = vmul.f32 %v2234_v14, %v1021_v49  ;;  %v1155_v13 = vmul.f32 %v2266_v59, %v932_v31  ;;  %v1006_v18 = vmul.f32 %v2227_v5, %v932_v31  ;;  %v1232_v38 = vld [vmem:[%s2112_s23 + $0x30] sm:$0xff] }
  0xf9   : > { %v1062_v44 = vadd.f32 %v1054_v41, %v1037_v30  ;;  %1260 = vst [vmem:[%s2239_s17 + $0x10] sm:$0xff] %v1244_v42  ;;  %v914_v50 = vmul.f32 %v2213_v60, %v895_v45  ;;  %v1013_v56 = vadd.f32 %v1005_v48, %v988_v43  ;;  %v1080_v24 = vmul.f32 %v2249_v40, %v932_v31 }
  0xfb   : > { %v1087_v52 = vadd.f32 %v1079_v46, %v1062_v44  ;;  %v925_v27 = vadd.f32 %v2220_v1, %v914_v50  ;;  %v1038_v9 = vadd.f32 %v1030_v61, %v1013_v56 }
  0xfc   : > { %v867_v54 = vpop.f32.mrf.mxu2  ;;  %v812_v33 = vpop.f32.mrf.mxu0 }
  0xfd   : > { %v896_v55 = vpop.f32.mrf.mxu3  ;;  %v868_v32 = vadd.f32 %v867_v54, %v839_v51  ;;  %v841_v37 = vpop.f32.mrf.mxu1  ;;  %v1112_v0 = vadd.f32 %v1104_v57, %v1087_v52  ;;  %v933_v6 = vmax.f32 %v925_v27, 0.0 }
  0xfe   : > { %v980_v58 = vld [vmem:[#allocation2 + $0x37] sm:$0xff]  ;;  %v842_v63 = vadd.f32 %v841_v37, %v812_v33 }
  0xff   : > { %v1055_v62 = vmul.f32 %v2244_v25, %v980_v58  ;;  %v1130_v2 = vmul.f32 %v2261_v53, %v980_v58  ;;  %v897_v8 = vadd.f32 %v896_v55, %v868_v32  ;;  %v1022_v10 = vld [vmem:[#allocation2 + $0x39] sm:$0xff]  ;;  %v989_v11 = vmul.f32 %v2224_v3, %v980_v58  ;;  %972 = vst [vmem:[#allocation2 + $0x50] sm:$0xff] %v933_v6 }
 0x100   : > { %v1246_v16 = vadd.f32 %v1230_v7, %v933_v6  ;;  %v1180_v20 = vmul.f32 %v2274_v4, %v1022_v10  ;;  %v1031_v43 = vmul.f32 %v2234_v14, %v1022_v10  ;;  %v1105_v44 = vmul.f32 %v2255_v47, %v1022_v10  ;;  %v1227_v55 = vld [vmem:[%s2112_s23 + $0x8] sm:$0xff] }
 0x101   : > { %v1138_v12 = vadd.f32 %v1130_v2, %v1112_v0  ;;  %v1063_v15 = vadd.f32 %v1055_v62, %v1038_v9  ;;  %v915_v17 = vmul.f32 %v2213_v60, %v897_v8  ;;  %v1014_v34 = vadd.f32 %v1006_v18, %v989_v11 }
 0x102   : > { %1262 = vst [vmem:[%s2239_s17 + $0x20] sm:$0xff] %v1246_v16  ;;  %v1007_v46 = vmul.f32 %v2227_v5, %v933_v6  ;;  %v1081_v61 = vmul.f32 %v2249_v40, %v933_v6  ;;  %v1156_v7 = vmul.f32 %v2266_v59, %v933_v6 }
 0x103   : > { %v1163_v19 = vadd.f32 %v1155_v13, %v1138_v12  ;;  %v926_v26 = vadd.f32 %v2220_v1, %v915_v17  ;;  %v1088_v39 = vadd.f32 %v1080_v24, %v1063_v15  ;;  %v1039_v49 = vadd.f32 %v1031_v43, %v1014_v34 }
 0x104   : > { %v870_v22 = vpop.f32.mrf.mxu2  ;;  %v814_v29 = vpop.f32.mrf.mxu0 }
 0x105   : > { %v899_v23 = vpop.f32.mrf.mxu3  ;;  %v871_v28 = vadd.f32 %v870_v22, %v842_v63  ;;  %v843_v30 = vpop.f32.mrf.mxu1  ;;  %v1188_v35 = vadd.f32 %v1180_v20, %v1163_v19  ;;  %v934_v41 = vmax.f32 %v926_v26, 0.0  ;;  %v1113_v54 = vadd.f32 %v1105_v44, %v1088_v39  ;;  %v1234_v26 = vld [vmem:[%s2112_s23 + $0x40] sm:$0xff] }
 0x106   : > { %v981_v45 = vld [vmem:[#allocation2 + $0x4f] sm:$0xff]  ;;  %v844_v33 = vadd.f32 %v843_v30, %v814_v29 }
 0x107   : > { %v900_v42 = vadd.f32 %v899_v23, %v871_v28  ;;  %v1199_v31 = vmul.f32 %v2282_v21, %v1188_v35  ;;  %973 = vst [vmem:[#allocation2 + $0x68] sm:$0xff] %v934_v41  ;;  %v1248_v48 = vadd.f32 %v1232_v38, %v934_v41  ;;  %v990_v51 = vmul.f32 %v2224_v3, %v981_v45  ;;  %v1023_v56 = vld [vmem:[#allocation2 + $0x51] sm:$0xff] }
 0x108   : > { %v1056_v52 = vmul.f32 %v2244_v25, %v981_v45  ;;  %v1131_v27 = vmul.f32 %v2261_v53, %v981_v45  ;;  %v1032_v63 = vmul.f32 %v2234_v14, %v1023_v56  ;;  %v1181_v16 = vmul.f32 %v2274_v4, %v1023_v56 }
 0x109   : > { %v1210_v50 = vadd.f32 %v2287_v36, %v1199_v31  ;;  %1264 = vst [vmem:[%s2239_s17 + $0x30] sm:$0xff] %v1248_v48  ;;  %v916_v32 = vmul.f32 %v2213_v60, %v900_v42  ;;  %v1015_v57 = vadd.f32 %v1007_v46, %v990_v51  ;;  %v1106_v19 = vmul.f32 %v2255_v47, %v1023_v56 }
 0x10a   : > { %v1064_v58 = vadd.f32 %v1056_v52, %v1039_v49  ;;  %v1139_v2 = vadd.f32 %v1131_v27, %v1113_v54  ;;  %v1008_v35 = vmul.f32 %v2227_v5, %v934_v41  ;;  %v1082_v42 = vmul.f32 %v2249_v40, %v934_v41  ;;  %v1229_v52 = vld [vmem:[%s2112_s23 + $0x18] sm:$0xff] }
 0x10b   : > { %v1218_v37 = vmax.f32 %v1210_v50, 0.0  ;;  %v927_v8 = vadd.f32 %v2220_v1, %v916_v32  ;;  %v1040_v18 = vadd.f32 %v1032_v63, %v1015_v57  ;;  %v1157_v31 = vmul.f32 %v2266_v59, %v934_v41 }
 0x10c   : > { %v872_v62 = vpop.f32.mrf.mxu2  ;;  %v1089_v11 = vadd.f32 %v1081_v61, %v1064_v58  ;;  %v817_v12 = vpop.f32.mrf.mxu0  ;;  %v1164_v15 = vadd.f32 %v1156_v7, %v1139_v2 }
 0x10d   : > { %v901_v0 = vpop.f32.mrf.mxu3  ;;  %v873_v9 = vadd.f32 %v872_v62, %v844_v33  ;;  %v1243_v10 = vadd.f32 %v1227_v55, %v1218_v37  ;;  %v846_v13 = vpop.f32.mrf.mxu1  ;;  %v2306_v17 = vmax.f32 %v927_v8, 0.0  ;;  %v1236_v8 = vld [vmem:[%s2112_s23 + $0x50] sm:$0xff] }
 0x10e   : > { %v982_v6 = vld [vmem:[#allocation2 + $0x67] sm:$0xff]  ;;  %v1189_v22 = vadd.f32 %v1181_v16, %v1164_v15  ;;  %v847_v28 = vadd.f32 %v846_v13, %v817_v12  ;;  %v1114_v29 = vadd.f32 %v1106_v19, %v1089_v11 }
 0x10f   : > { %1259 = vst [vmem:[%s2239_s17 + $0x8] sm:$0xff] %v1243_v10  ;;  %v902_v20 = vadd.f32 %v901_v0, %v873_v9  ;;  %v991_v23 = vmul.f32 %v2224_v3, %v982_v6  ;;  %v1057_v24 = vmul.f32 %v2244_v25, %v982_v6  ;;  %v1132_v30 = vmul.f32 %v2261_v53, %v982_v6  ;;  %v1024_v38 = vld [vmem:[#allocation2 + $0x69] sm:$0xff] }
 0x110   : > { %974 = vst [vmem:[#allocation2 + $0x80] sm:$0xff] %v2306_v17  ;;  %v1200_v34 = vmul.f32 %v2282_v21, %v1189_v22  ;;  %v1250_v44 = vadd.f32 %v1234_v26, %v2306_v17  ;;  %v1182_v56 = vmul.f32 %v2274_v4, %v1024_v38  ;;  %v1033_v32 = vmul.f32 %v2234_v14, %v1024_v38 }
 0x111   : > { %v1065_v39 = vadd.f32 %v1057_v24, %v1040_v18  ;;  %v1140_v43 = vadd.f32 %v1132_v30, %v1114_v29  ;;  %v917_v45 = vmul.f32 %v2213_v60, %v902_v20  ;;  %v1016_v50 = vadd.f32 %v1008_v35, %v991_v23  ;;  %v1231_v24 = vld [vmem:[%s2112_s23 + $0x28] sm:$0xff] }
 0x112   : > { %v1211_v49 = vadd.f32 %v2287_v36, %v1200_v34  ;;  %1266 = vst [vmem:[%s2239_s17 + $0x40] sm:$0xff] %v1250_v44  ;;  %v1107_v33 = vmul.f32 %v2255_v47, %v1024_v38  ;;  %v1009_v13 = vmul.f32 %v2227_v5, %v2306_v17  ;;  %v1158_v20 = vmul.f32 %v2266_v59, %v2306_v17 }
 0x113   : > { %v1090_v54 = vadd.f32 %v1082_v42, %v1065_v39  ;;  %v1165_v55 = vadd.f32 %v1157_v31, %v1140_v43  ;;  %v928_v27 = vadd.f32 %v2220_v1, %v917_v45  ;;  %v1041_v2 = vadd.f32 %v1033_v32, %v1016_v50 }
 0x114   : > { %v875_v46 = vpop.f32.mrf.mxu2  ;;  %v1219_v41 = vmax.f32 %v1211_v49, 0.0  ;;  %v819_v61 = vpop.f32.mrf.mxu0  ;;  %v1083_v26 = vmul.f32 %v2249_v40, %v2306_v17 }
 0x115   : > { %v904_v48 = vpop.f32.mrf.mxu3  ;;  %v876_v51 = vadd.f32 %v875_v46, %v847_v28  ;;  %v1190_v37 = vadd.f32 %v1182_v56, %v1165_v55  ;;  %v936_v58 = vmax.f32 %v928_v27, 0.0  ;;  %v848_v62 = vpop.f32.mrf.mxu1  ;;  %v1115_v10 = vadd.f32 %v1107_v33, %v1090_v54  ;;  %v1238_v55 = vld [vmem:[%s2112_s23 + $0x60] sm:$0xff] }
 0x116   : > { %v1245_v0 = vadd.f32 %v1229_v52, %v1219_v41  ;;  %v849_v18 = vadd.f32 %v848_v62, %v819_v61 }
 0x117   : > { %v983_v57 = vld [vmem:[#allocation2 + $0x7f] sm:$0xff]  ;;  %v905_v9 = vadd.f32 %v904_v48, %v876_v51  ;;  %v1201_v63 = vmul.f32 %v2282_v21, %v1190_v37  ;;  %975 = vst [vmem:[#allocation2 + $0x98] sm:$0xff] %v936_v58  ;;  %v1252_v22 = vadd.f32 %v1236_v8, %v936_v58  ;;  %v1010_v33 = vmul.f32 %v2227_v5, %v936_v58 }
 0x118   : > { %v1058_v7 = vmul.f32 %v2244_v25, %v983_v57  ;;  %v992_v11 = vmul.f32 %v2224_v3, %v983_v57  ;;  %v1133_v12 = vmul.f32 %v2261_v53, %v983_v57  ;;  %1261 = vst [vmem:[%s2239_s17 + $0x18] sm:$0xff] %v1245_v0  ;;  %v1025_v15 = vld [vmem:[#allocation2 + $0x81] sm:$0xff]  ;;  %v1159_v62 = vmul.f32 %v2266_v59, %v936_v58 }
 0x119   : > { %v1212_v19 = vadd.f32 %v2287_v36, %v1201_v63  ;;  %v918_v28 = vmul.f32 %v2213_v60, %v905_v9  ;;  %v1183_v38 = vmul.f32 %v2274_v4, %v1025_v15  ;;  %1268 = vst [vmem:[%s2239_s17 + $0x50] sm:$0xff] %v1252_v22  ;;  %v1034_v45 = vmul.f32 %v2234_v14, %v1025_v15  ;;  %v1233_v57 = vld [vmem:[%s2112_s23 + $0x38] sm:$0xff]  ;;  %v1240_v9 = vld [vmem:[%s2112_s23 + $0x70] sm:$0xff] }
 0x11a   : > { %v1066_v16 = vadd.f32 %v1058_v7, %v1041_v2  ;;  %v1141_v6 = vadd.f32 %v1133_v12, %v1115_v10  ;;  %v1017_v34 = vadd.f32 %v1009_v13, %v992_v11  ;;  %v1108_v46 = vmul.f32 %v2255_v47, %v1025_v15 }
 0x11b   : > { %v1220_v30 = vmax.f32 %v1212_v19, 0.0  ;;  %v929_v43 = vadd.f32 %v2220_v1, %v918_v28  ;;  %v1084_v8 = vmul.f32 %v2249_v40, %v936_v58 }
 0x11c   : > { %v877_v23 = vpop.f32.mrf.mxu2  ;;  %v1166_v35 = vadd.f32 %v1158_v20, %v1141_v6  ;;  %v1091_v42 = vadd.f32 %v1083_v26, %v1066_v16  ;;  %v1042_v51 = vadd.f32 %v1034_v45, %v1017_v34 }
 0x11d   : > { %v878_v29 = vadd.f32 %v877_v23, %v849_v18  ;;  %v906_v39 = vpop.f32.mrf.mxu3  ;;  %v1247_v44 = vadd.f32 %v1231_v24, %v1220_v30  ;;  %v937_v49 = vmax.f32 %v929_v43, 0.0 }
 0x11e   : > { %v1191_v17 = vadd.f32 %v1183_v38, %v1166_v35  ;;  %v984_v48 = vld [vmem:[#allocation2 + $0x97] sm:$0xff]  ;;  %v1116_v56 = vadd.f32 %v1108_v46, %v1091_v42 }
 0x11f   : > { %v907_v31 = vadd.f32 %v906_v39, %v878_v29  ;;  %1263 = vst [vmem:[%s2239_s17 + $0x28] sm:$0xff] %v1247_v44  ;;  %v1059_v54 = vmul.f32 %v2244_v25, %v984_v48  ;;  %v993_v27 = vmul.f32 %v2224_v3, %v984_v48  ;;  %v1134_v41 = vmul.f32 %v2261_v53, %v984_v48  ;;  %v1235_v39 = vld [vmem:[%s2112_s23 + $0x48] sm:$0xff] }
 0x120   : > { %v1202_v52 = vmul.f32 %v2282_v21, %v1191_v17  ;;  %976 = vst [vmem:[#allocation2 + $0xb0] sm:$0xff] %v937_v49  ;;  %v1254_v0 = vadd.f32 %v1238_v55, %v937_v49  ;;  %v1011_v6 = vmul.f32 %v2227_v5, %v937_v49  ;;  %v1085_v38 = vmul.f32 %v2249_v40, %v937_v49 }
 0x121   : > { %v919_v50 = vmul.f32 %v2213_v60, %v907_v31  ;;  %v1026_v60 = vld [vmem:[#allocation2 + $0x99] sm:$0xff]  ;;  %v1067_v37 = vadd.f32 %v1059_v54, %v1042_v51  ;;  %v1142_v61 = vadd.f32 %v1134_v41, %v1116_v56  ;;  %v1018_v10 = vadd.f32 %v1010_v33, %v993_v27 }
 0x122   : > { %v1213_v32 = vadd.f32 %v2287_v36, %v1202_v52  ;;  %v1184_v11 = vmul.f32 %v2274_v4, %v1026_v60  ;;  %1270 = vst [vmem:[%s2239_s17 + $0x60] sm:$0xff] %v1254_v0  ;;  %v1035_v16 = vmul.f32 %v2234_v14, %v1026_v60  ;;  %v1160_v42 = vmul.f32 %v2266_v59, %v937_v49  ;;  %v1128_v49 = vld [vmem:[#allocation2 + $0xdf] sm:$0xff] }
 0x123   : > { %v930_v2 = vadd.f32 %v2220_v1, %v919_v50  ;;  %v1167_v63 = vadd.f32 %v1159_v62, %v1142_v61  ;;  %v1092_v15 = vadd.f32 %v1084_v8, %v1067_v37  ;;  %v1109_v1 = vmul.f32 %v2255_v47, %v1026_v60  ;;  %v1178_v62 = vld [vmem:[#allocation2 + $0xe1] sm:$0xff] }
 0x124   : > { %v1221_v7 = vmax.f32 %v1213_v32, 0.0  ;;  %v1043_v20 = vadd.f32 %v1035_v16, %v1018_v10 }
 0x125   : > { %v938_v12 = vmax.f32 %v930_v2, 0.0  ;;  %v1192_v18 = vadd.f32 %v1184_v11, %v1167_v63  ;;  %v1117_v26 = vadd.f32 %v1109_v1, %v1092_v15 }
 0x126   : > { %v1249_v13 = vadd.f32 %v1233_v57, %v1221_v7  ;;  %v1162_v7 = vmul.f32 0.0, %v2266_v59 }
 0x127   : > { %977 = vst [vmem:[#allocation2 + $0xc8] sm:$0xff] %v938_v12  ;;  %v1256_v19 = vadd.f32 %v1240_v9, %v938_v12  ;;  %v985_v58 = vld [vmem:[#allocation2 + $0xaf] sm:$0xff]  ;;  %v1203_v22 = vmul.f32 %v2282_v21, %v1192_v18  ;;  %v1086_v27 = vmul.f32 %v2249_v40, %v938_v12  ;;  %v1161_v33 = vmul.f32 %v2266_v59, %v938_v12  ;;  %v1239_v59 = vld [vmem:[%s2112_s23 + $0x68] sm:$0xff] }
 0x128   : > { %1265 = vst [vmem:[%s2239_s17 + $0x38] sm:$0xff] %v1249_v13  ;;  %v994_v23 = vmul.f32 %v2224_v3, %v985_v58  ;;  %v1060_v24 = vmul.f32 %v2244_v25, %v985_v58  ;;  %v1027_v28 = vld [vmem:[#allocation2 + $0xb1] sm:$0xff]  ;;  %v1135_v29 = vmul.f32 %v2261_v53, %v985_v58  ;;  %v1237_v40 = vld [vmem:[%s2112_s23 + $0x58] sm:$0xff] }
 0x129   : > { %1272 = vst [vmem:[%s2239_s17 + $0x70] sm:$0xff] %v1256_v19  ;;  %v1214_v30 = vadd.f32 %v2287_v36, %v1203_v22  ;;  %v1036_v3 = vmul.f32 %v2234_v14, %v1027_v28  ;;  %v1110_v44 = vmul.f32 %v2255_v47, %v1027_v28  ;;  %v1185_v17 = vmul.f32 %v2274_v4, %v1027_v28  ;;  %v1241_v19 = vld [vmem:[%s2112_s23 + $0x78] sm:$0xff] }
 0x12a   : > { %v1019_v34 = vadd.f32 %v1011_v6, %v994_v23  ;;  %v1068_v35 = vadd.f32 %v1060_v24, %v1043_v20  ;;  %v1143_v5 = vadd.f32 %v1135_v29, %v1117_v26 }
 0x12b   : > { %v1222_v43 = vmax.f32 %v1214_v30, 0.0 }
 0x12c   : > { %v1093_v31 = vadd.f32 %v1085_v38, %v1068_v35  ;;  %v1168_v45 = vadd.f32 %v1160_v42, %v1143_v5  ;;  %v1044_v50 = vadd.f32 %v1036_v3, %v1019_v34 }
 0x12d   : > { %v1251_v48 = vadd.f32 %v1235_v39, %v1222_v43 }
 0x12e   : > { %v1052_v46 = vld [vmem:[#allocation2 + $0xc7] sm:$0xff]  ;;  %v1118_v52 = vadd.f32 %v1110_v44, %v1093_v31  ;;  %v1193_v54 = vadd.f32 %v1185_v17, %v1168_v45 }
 0x12f   : > { %v1061_v51 = vmul.f32 %v2244_v25, %v1052_v46  ;;  %v1102_v55 = vld [vmem:[#allocation2 + $0xc9] sm:$0xff]  ;;  %v1136_v56 = vmul.f32 %v2261_v53, %v1052_v46  ;;  %1267 = vst [vmem:[%s2239_s17 + $0x48] sm:$0xff] %v1251_v48  ;;  %v1137_v25 = vmul.f32 %v2261_v53, %v1128_v49 }
 0x130   : > { %v1204_v41 = vmul.f32 %v2282_v21, %v1193_v54  ;;  %v1111_v37 = vmul.f32 %v2255_v47, %v1102_v55  ;;  %v1186_v0 = vmul.f32 %v2274_v4, %v1102_v55  ;;  %v1187_v47 = vmul.f32 %v2274_v4, %v1178_v62 }
 0x131   : > { %v1069_v14 = vadd.f32 %v1061_v51, %v1044_v50  ;;  %v1144_v32 = vadd.f32 %v1136_v56, %v1118_v52 }
 0x132   : > { %v1215_v57 = vadd.f32 %v2287_v36, %v1204_v41 }
 0x133   : > { %v1094_v60 = vadd.f32 %v1086_v27, %v1069_v14  ;;  %v1169_v61 = vadd.f32 %v1161_v33, %v1144_v32 }
 0x134   : > { %v1223_v8 = vmax.f32 %v1215_v57, 0.0 }
 0x135   : > { %v1119_v2 = vadd.f32 %v1111_v37, %v1094_v60  ;;  %v1194_v9 = vadd.f32 %v1186_v0, %v1169_v61 }
 0x136   : > { %v1253_v53 = vadd.f32 %v1237_v40, %v1223_v8 }
 0x137   : > { %v1145_v10 = vadd.f32 %v1137_v25, %v1119_v2  ;;  %v1205_v63 = vmul.f32 %v2282_v21, %v1194_v9 }
 0x138   : > { %1269 = vst [vmem:[%s2239_s17 + $0x58] sm:$0xff] %v1253_v53 }
 0x139   : > { %v1170_v11 = vadd.f32 %v1162_v7, %v1145_v10  ;;  %v1216_v12 = vadd.f32 %v2287_v36, %v1205_v63 }
 0x13b   : > { %v1195_v13 = vadd.f32 %v1187_v47, %v1170_v11  ;;  %v1224_v15 = vmax.f32 %v1216_v12, 0.0 }
 0x13d   : > { %v1206_v4 = vmul.f32 %v2282_v21, %v1195_v13  ;;  %v1255_v16 = vadd.f32 %v1239_v59, %v1224_v15 }
 0x13f   : > { %v1217_v18 = vadd.f32 %v2287_v36, %v1206_v4  ;;  %1271 = vst [vmem:[%s2239_s17 + $0x68] sm:$0xff] %v1255_v16 }
 0x141   : > { %v1225_v1 = vmax.f32 %v1217_v18, 0.0 }
 0x143   : > { %v1257_v58 = vadd.f32 %v1241_v19, %v1225_v1 }
 0x145   : > { %1273 = vst [vmem:[%s2239_s17 + $0x78] sm:$0xff] %v1257_v58 }
 0x146   : > { %1882 = shalt.err (!%p1879_p12)
}
 0x147   : > { %s1940_s25 = smov 256   ;;  %s1941_s17 = smov 16  }
 0x148   : > { %1624 = dma.vmem_to_hbm [thread:$0]  (%p2076_p3), %s1288_s28, 2048, %s1290_s13, %s1275_s7, %s1940_s25, %s1940_s25, %s1941_s17  }
 0x149 PF: > { %s1304_s19 = sand.u32 1, %s1917_s30   ;;  %p2458_p13 = scmp.ge.s32.totalorder %s1929_s12, 2 }
 0x14a   : > { %s1305_s22 = scalar_lea.sflag [#allocation5], %s1304_s19 }
 0x14b   : > { %p1644_p0 = pnand %p2458_p13, %p2027_p6 }
 0x14d   : > { %p1645_p5 = pneg %p1644_p0 }
 0x14f   : > { %1912 = dma.done.wait (%p1645_p5), %s1305_s22, 2048  }
 0x150   : > { %1914 = vsyncadd (%p1645_p5), %s1305_s22, 4294965248  ;;  %p24_p7 = scmp.ge.s32.totalorder %s2066_s26, 4   ;;  %s2459_s30 = smov %s1921_s10 }
 0x151   : > { %s2460_s10 = smov %s1925_s11  ;;  %s2461_s11 = smov %s2082_s21 }
 0x152   : > { %s2462_s12 = smov %s2066_s26  ;;  %26 = sbr.rel (!%p24_p7) target bundleno = 11 (0xb), region = 123 }
 0x157   :  { %1311 = vsyncpa [#allocation4], 1 }
 0x158   :  { %1313 = vsyncpa [#allocation4 + $0x1], 1 }
 0x159   :  { %1314 = vsyncpa [#allocation7], 1 }
 0x15a   :  { %1315 = vsyncpa [#allocation10], 1 }
 0x15b   :  { %1316 = vsyncpa [#allocation5], 1 }
 0x15c   :  { %1318 = vsyncpa [#allocation5 + $0x1], 1 }

// kernel: moffn_forward.3
= control target key start
LH: loop header
LB: loop body
LE: loop exit
PB: predicated region body
PF: predicated region fallthrough
CT: control target
= control target key end

     0   :  { %12 = vsyncpa [#allocation4], 0  ;;  %s4337_s0 = inlined_call_operand.hbm [shape: f32[2,8,8,256], index: 0, kind: input, shape index: {}]   ;;  %s4338_s1 = inlined_call_operand.hbm [shape: bf16[256,256], index: 1, kind: input, shape index: {}]   ;;  %s4339_s2 = inlined_call_operand.hbm [shape: f32[1,256], index: 2, kind: input, shape index: {}]   ;;  %s4340_s3 = inlined_call_operand.hbm [shape: f32[1,256], index: 3, kind: input, shape index: {}]   ;;  %s4341_s4 = inlined_call_operand.hbm [shape: f32[9,256], index: 4, kind: input, shape index: {}]   ;;  %s4342_s5 = inlined_call_operand.hbm [shape: f32[1,256], index: 5, kind: input, shape index: {}]   ;;  %s4343_s6 = inlined_call_operand.hbm [shape: f32[1,256], index: 6, kind: input, shape index: {}]   ;;  %s4344_s7 = inlined_call_operand.vmem [shape: f32[2,8,8,512], index: 7, kind: output, shape index: {}]  }
   0x1   :  { %14 = vsyncpa [#allocation4 + $0x1], 0 }
   0x2   :  { %15 = vsyncpa [#allocation6], 0 }
   0x3   :  { %16 = vsyncpa [#allocation9], 0 }
   0x4   :  { %17 = vsyncpa [#allocation12], 0  ;;  %s3067_s24 = smov 0   ;;  %s3069_s25 = smov 0  }
   0x5   :  { %s3071_s26 = smov 0   ;;  %s3073_s27 = smov 0  }
   0x6 LB: > { %s217_s30 = sshll.u32 %s4338_s1, 4  ;;  %s3091_s8 = sadd.s32 4294967295, %s3014_s27   ;;  %s3014_s27 = sphi %s3073_s27, %s4459_s27   ;;  %s3010_s26 = sphi %s3071_s26, %s4458_s26   ;;  %s3006_s25 = sphi %s3069_s25, %s4457_s25   ;;  %s3002_s24 = sphi %s3067_s24, %s4456_s24   ;;  %s218_s30 = int_to_ptr.hbm [resolvable:$true] %s217_s30 }
   0x7   : > { %p2463_p0 = scmp.ge.s32.totalorder %s3014_s27, 1  ;;  %p44_p1 = scmp.eq.s32.totalorder %s3091_s8, 0 }
   0x8   : > { %p206_p2 = scmp.lt.s32.totalorder %s3014_s27, 3  ;;  %s3016_s10 = smov [#allocation5]  }
   0x9   : > { %s219_s11 = sshll.u32 %s3016_s10, 4  ;;  %s244_s14 = sshll.u32 %s4340_s3, 4  ;;  %s220_s11 = int_to_ptr.vmem [resolvable:$true] %s219_s11  ;;  %s245_s14 = int_to_ptr.hbm [resolvable:$true] %s244_s14 }
   0xa   : > { %p3096_p3 = pnand %p2463_p0, %p206_p2  ;;  %s270_s18 = sshll.u32 %s4342_s5, 4  ;;  %s271_s18 = int_to_ptr.hbm [resolvable:$true] %s270_s18 }
   0xb   : > { %s3017_s19 = smov [#allocation8]   ;;  %s3018_s21 = smov 128  }
   0xc   : > { %p2674_p4 = pneg %p3096_p3  ;;  %s246_s20 = sshll.u32 %s3017_s19, 4  ;;  %s247_s20 = int_to_ptr.vmem [resolvable:$true] %s246_s20 }
   0xd   : > { %s3019_s22 = smov 8   ;;  %s232_s29 = sshll.u32 %s4339_s2, 4  ;;  %s233_s29 = int_to_ptr.hbm [resolvable:$true] %s232_s29 }
   0xe   : > { %p3107_p5 = pnand %p2674_p4, %p44_p1  ;;  %s3020_s10 = smov [#allocation11]  }
   0xf   : > { %s272_s12 = sshll.u32 %s3020_s10, 4  ;;  %s3021_s13 = smov [#allocation7]   ;;  %s273_s12 = int_to_ptr.vmem [resolvable:$true] %s272_s12 }
  0x10   : > { %2677 = dma.hbm_to_vmem [thread:$0]  (!%p3107_p5), %s218_s30, 4096, %s220_s11, [#allocation6], %s3018_s21, %s3018_s21, %s3019_s22  }
  0x11   : > { %2683 = dma.hbm_to_vmem [thread:$0]  (!%p3107_p5), %s245_s14, 32, %s247_s20, [#allocation9]  }
  0x12   : > { %2689 = dma.hbm_to_vmem [thread:$0]  (!%p3107_p5), %s271_s18, 32, %s273_s12, [#allocation12]  }
  0x13   : > { %s234_s16 = sshll.u32 %s3021_s13, 4  ;;  %s255_s30 = sshll.u32 %s4341_s4, 4  ;;  %s235_s16 = int_to_ptr.vmem [resolvable:$true] %s234_s16  ;;  %s256_s30 = int_to_ptr.hbm [resolvable:$true] %s255_s30 }
  0x14   : > { %2680 = dma.hbm_to_vmem [thread:$0]  (!%p3107_p5), %s233_s29, 32, %s235_s16, [#allocation6]  }
  0x15   : > { %s3022_s11 = smov [#allocation10]   ;;  %s282_s21 = sshll.u32 %s4343_s6, 4  ;;  %s283_s21 = int_to_ptr.hbm [resolvable:$true] %s282_s21 }
  0x16   : > { %s257_s14 = sshll.u32 %s3022_s11, 4  ;;  %s3023_s22 = smov 256   ;;  %s258_s14 = int_to_ptr.vmem [resolvable:$true] %s257_s14 }
  0x17   : > { %s3024_s23 = smov 16   ;;  %s3025_s28 = smov [#allocation13]  }
  0x18   : > { %2686 = dma.hbm_to_vmem [thread:$0]  (!%p3107_p5), %s256_s30, 512, %s258_s14, [#allocation9], %s3023_s22, %s3023_s22, %s3024_s23  }
  0x19   : > { %s284_s29 = sshll.u32 %s3025_s28, 4  ;;  %s3139_s10 = sadd.s32 1, %s3014_s27   ;;  %s285_s29 = int_to_ptr.vmem [resolvable:$true] %s284_s29 }
  0x1a   : > { %2692 = dma.hbm_to_vmem [thread:$0]  (!%p3107_p5), %s283_s21, 32, %s285_s29, [#allocation12]  }
  0x1b   : > { %s27_s12 = ssub.s32 %s3014_s27, %s3139_s10  ;;  %s30_s13 = sadd.s32 1, %s3010_s26 }
  0x1c   : > { %p28_p6 = scmp.eq.s32.totalorder %s27_s12, 0  ;;  %p37_p7 = scmp.ne.s32.totalorder %s3010_s26, %s3006_s25 }
  0x1d   : > { %p38_p8 = scmp.eq.s32.totalorder %s3014_s27, 0  ;;  %p43_p9 = scmp.ne.s32.totalorder %s3006_s25, %s3002_s24 }
  0x1e   : > { %s3150_s16 = scalar_select %p28_p6, %s3010_s26, %s30_s13  }
  0x1f   : > { %p3154_p10 = por %p44_p1, %p43_p9  ;;  %p2703_p11 = scmp.lt.s32.totalorder %s3014_s27, 2 }
  0x20   : > { %s295_s19 = sand.u32 1, %s3010_s26   ;;  %s2614_s15 = sshll.u32 %s3014_s27, 7 }
  0x21   : > { %p39_p12 = por %p38_p8, %p37_p7  ;;  %s2471_s30 = sshll.u32 %s295_s19, 7 }
  0x22   : > { %s304_s18 = scalar_lea.hbm %s4337_s0, %s2614_s15  ;;  %s299_s21 = scalar_lea.vmem [#allocation3], %s2471_s30 }
  0x23   : > { %s305_s20 = sshll.u32 %s304_s18, 4  ;;  %s307_s28 = sshll.u32 %s299_s21, 4  ;;  %s306_s20 = int_to_ptr.hbm [resolvable:$true] %s305_s20  ;;  %s308_s28 = int_to_ptr.vmem [resolvable:$true] %s307_s28 }
  0x24   : > { %p3164_p13 = pnand %p2703_p11, %p39_p12  ;;  %s296_s29 = scalar_lea.sflag [#allocation4], %s295_s19 }
  0x25   : > { %s2938_s12 = sshra.s32 %s306_s20, 4  ;;  %s2945_s30 = scalar_lea.hbm %s4337_s0, 256  ;;  %s2939_s12 = int_to_ptr.hbm [resolvable:$true] %s2938_s12 }
  0x26   : > { %s2940_s27 = scalar_lea.hbm %s2939_s12, 128  ;;  %p2942_p2 = pneg %p3164_p13 }
  0x27   : > { %p2941_p0 = scmp.ne.s32.totalorder %s2939_s12, %s2940_s27  ;;  %p2946_p6 = scmp.lt.s32.totalorder %s2939_s12, %s4337_s0 }
  0x28   : > { %p2947_p7 = scmp.lt.s32.totalorder %s2945_s30, %s2940_s27 }
  0x29   : > { %p2943_p4 = pnand %p2942_p2, %p2941_p0 }
  0x2a   : > { %p2948_p8 = por %p2947_p7, %p2946_p6 }
  0x2b   : > { %p2944_p5 = pneg %p2943_p4 }
  0x2d   : > { %p2949_p9 = pnand %p2948_p8, %p2944_p5 }
  0x2f   : > { %2952 = shalt.err (!%p2949_p9)
}
  0x30   : > { %2696 = dma.hbm_to_vmem [thread:$0]  (!%p3164_p13), %s306_s20, 2048, %s308_s28, %s296_s29, %s3023_s22, %s3023_s22, %s3024_s23  }
  0x31   : > { %319 = sbr.rel (%p3096_p3) target bundleno = 468 (0x1d4), region = 48 }
  0x36   : > { %s321_s19 = sand.u32 1, %s3006_s25  }
  0x37   : > { %s2475_s18 = sshll.u32 %s321_s19, 7  ;;  %s322_s21 = scalar_lea.sflag [#allocation4], %s321_s19 }
  0x38   : > { %s3184_s13 = scalar_lea.vmem [#allocation3], %s2475_s18 }
  0x39   : > { %2985 = dma.done.wait (%p3154_p10), %s322_s21, 2048  }
  0x3a   : > { %2987 = vsyncadd (%p3154_p10), %s322_s21, 4294965248 }
  0x3b   : > { %2989 = dma.done.wait (%p44_p1), [#allocation6], 4128  }
  0x3c   : > { %2991 = vsyncadd (%p44_p1), [#allocation6], 4294963168 }
  0x3d   : > { %2993 = dma.done.wait (%p44_p1), [#allocation9], 544  }
  0x3e   : > { %2995 = vsyncadd (%p44_p1), [#allocation9], 4294966752 }
  0x3f   : > { %2997 = dma.done.wait (%p44_p1), [#allocation12], 64  }
  0x40   : > { %2999 = vsyncadd (%p44_p1), [#allocation12], 4294967232  ;;  %v2542_v0 = vld [vmem:[#allocation5 + $0x70] sm:$0xf]  ;;  %v2631_v1 = vld [vmem:[#allocation5 + $0x74] sm:$0xf0] }
  0x41   : > { %v2606_v2 = vld [vmem:[#allocation5 + $0xf0] sm:$0xf]  ;;  %v2543_v3 = vor.u32 %v2631_v1, %v2542_v0  ;;  %v2647_v4 = vld [vmem:[#allocation5 + $0xf4] sm:$0xf0]  ;;  %v2630_v5 = vld [vmem:[#allocation5 + $0x74] sm:$0xf] }
  0x42   : > { %v2544_v6 = vld [vmem:[#allocation5 + $0x78] sm:$0xf0]  ;;  %v2607_v7 = vor.u32 %v2647_v4, %v2606_v2  ;;  %v2646_v9 = vld [vmem:[#allocation5 + $0xf4] sm:$0xf]  ;;  %v2534_v11 = vld [vmem:[#allocation5 + $0x60] sm:$0xf] }
  0x43   : > { %v2547_v8 = vor.u32 %v2630_v5, %v2544_v6  ;;  %v2608_v10 = vld [vmem:[#allocation5 + $0xf8] sm:$0xf0]  ;;  %616 = vmatpush.bf16.msra.mxu0 %v2543_v3  ;;  %v2629_v13 = vld [vmem:[#allocation5 + $0x64] sm:$0xf0]  ;;  %v2598_v14 = vld [vmem:[#allocation5 + $0xe0] sm:$0xf] }
  0x44   : > { %v2611_v12 = vor.u32 %v2646_v9, %v2608_v10  ;;  %v2645_v15 = vld [vmem:[#allocation5 + $0xe4] sm:$0xf0]  ;;  %645 = vmatpush.bf16.msra.mxu1 %v2607_v7  ;;  %v2535_v16 = vor.u32 %v2629_v13, %v2534_v11  ;;  %v2628_v18 = vld [vmem:[#allocation5 + $0x64] sm:$0xf]  ;;  %v2536_v19 = vld [vmem:[#allocation5 + $0x68] sm:$0xf0] }
  0x45   : > { %674 = vmatpush.bf16.msra.mxu2 %v2547_v8  ;;  %v2599_v17 = vor.u32 %v2645_v15, %v2598_v14  ;;  %v2644_v20 = vld [vmem:[#allocation5 + $0xe4] sm:$0xf]  ;;  %v2539_v21 = vor.u32 %v2628_v18, %v2536_v19  ;;  %v2600_v22 = vld [vmem:[#allocation5 + $0xe8] sm:$0xf0]  ;;  %v2526_v23 = vld [vmem:[#allocation5 + $0x50] sm:$0xf] }
  0x46   : > { %703 = vmatpush.bf16.msra.mxu3 %v2611_v12  ;;  %v2627_v24 = vld [vmem:[#allocation5 + $0x54] sm:$0xf0]  ;;  %v2603_v25 = vor.u32 %v2644_v20, %v2600_v22  ;;  %v2590_v26 = vld [vmem:[#allocation5 + $0xd0] sm:$0xf]  ;;  %v2626_v28 = vld [vmem:[#allocation5 + $0x54] sm:$0xf] }
  0x47   : > { %v2643_v27 = vld [vmem:[#allocation5 + $0xd4] sm:$0xf0]  ;;  %617 = vmatpush.bf16.msra.mxu0 %v2535_v16  ;;  %v2527_v29 = vor.u32 %v2627_v24, %v2526_v23  ;;  %v2528_v30 = vld [vmem:[#allocation5 + $0x58] sm:$0xf0]  ;;  %v2642_v31 = vld [vmem:[#allocation5 + $0xd4] sm:$0xf] }
  0x48   : > { %v2592_v32 = vld [vmem:[#allocation5 + $0xd8] sm:$0xf0]  ;;  %646 = vmatpush.bf16.msra.mxu1 %v2599_v17  ;;  %v2591_v33 = vor.u32 %v2643_v27, %v2590_v26  ;;  %v2531_v34 = vor.u32 %v2626_v28, %v2528_v30  ;;  %v2518_v35 = vld [vmem:[#allocation5 + $0x40] sm:$0xf]  ;;  %v2625_v36 = vld [vmem:[#allocation5 + $0x44] sm:$0xf0] }
  0x49   : > { %675 = vmatpush.bf16.msra.mxu2 %v2539_v21  ;;  %v2582_v37 = vld [vmem:[#allocation5 + $0xc0] sm:$0xf]  ;;  %v2595_v38 = vor.u32 %v2642_v31, %v2592_v32  ;;  %v2641_v39 = vld [vmem:[#allocation5 + $0xc4] sm:$0xf0]  ;;  %v2624_v40 = vld [vmem:[#allocation5 + $0x44] sm:$0xf]  ;;  %v2519_v44 = vor.u32 %v2625_v36, %v2518_v35 }
  0x4a   : > { %704 = vmatpush.bf16.msra.mxu3 %v2603_v25  ;;  %v2520_v41 = vld [vmem:[#allocation5 + $0x48] sm:$0xf0]  ;;  %v2640_v42 = vld [vmem:[#allocation5 + $0xc4] sm:$0xf]  ;;  %v2583_v45 = vor.u32 %v2641_v39, %v2582_v37  ;;  %v2510_v47 = vld [vmem:[#allocation5 + $0x30] sm:$0xf] }
  0x4b   : > { %v2584_v43 = vld [vmem:[#allocation5 + $0xc8] sm:$0xf0]  ;;  %618 = vmatpush.bf16.msra.mxu0 %v2527_v29  ;;  %v2523_v46 = vor.u32 %v2624_v40, %v2520_v41  ;;  %v2623_v48 = vld [vmem:[#allocation5 + $0x34] sm:$0xf0]  ;;  %v2574_v49 = vld [vmem:[#allocation5 + $0xb0] sm:$0xf] }
  0x4c   : > { %647 = vmatpush.bf16.msra.mxu1 %v2591_v33  ;;  %v2587_v50 = vor.u32 %v2640_v42, %v2584_v43  ;;  %v2639_v51 = vld [vmem:[#allocation5 + $0xb4] sm:$0xf0]  ;;  %v2622_v52 = vld [vmem:[#allocation5 + $0x34] sm:$0xf]  ;;  %v2512_v53 = vld [vmem:[#allocation5 + $0x38] sm:$0xf0]  ;;  %v2511_v56 = vor.u32 %v2623_v48, %v2510_v47 }
  0x4d   : > { %676 = vmatpush.bf16.msra.mxu2 %v2531_v34  ;;  %v2638_v54 = vld [vmem:[#allocation5 + $0xb4] sm:$0xf]  ;;  %v2576_v55 = vld [vmem:[#allocation5 + $0xb8] sm:$0xf0]  ;;  %v2575_v57 = vor.u32 %v2639_v51, %v2574_v49  ;;  %v2515_v58 = vor.u32 %v2622_v52, %v2512_v53  ;;  %v2502_v59 = vld [vmem:[#allocation5 + $0x20] sm:$0xf] }
  0x4e   : > { %705 = vmatpush.bf16.msra.mxu3 %v2595_v38  ;;  %v2621_v60 = vld [vmem:[#allocation5 + $0x24] sm:$0xf0]  ;;  %v2566_v61 = vld [vmem:[#allocation5 + $0xa0] sm:$0xf]  ;;  %v2579_v62 = vor.u32 %v2638_v54, %v2576_v55  ;;  %v2620_v0 = vld [vmem:[#allocation5 + $0x24] sm:$0xf] }
  0x4f   : > { %619 = vmatpush.bf16.msra.mxu0 %v2519_v44  ;;  %v2637_v63 = vld [vmem:[#allocation5 + $0xa4] sm:$0xf0]  ;;  %v2504_v1 = vld [vmem:[#allocation5 + $0x28] sm:$0xf0]  ;;  %v2636_v2 = vld [vmem:[#allocation5 + $0xa4] sm:$0xf]  ;;  %v2503_v4 = vor.u32 %v2621_v60, %v2502_v59 }
  0x50   : > { %648 = vmatpush.bf16.msra.mxu1 %v2583_v45  ;;  %v2568_v3 = vld [vmem:[#allocation5 + $0xa8] sm:$0xf0]  ;;  %v2567_v5 = vor.u32 %v2637_v63, %v2566_v61  ;;  %v2507_v6 = vor.u32 %v2620_v0, %v2504_v1  ;;  %v2494_v7 = vld [vmem:[#allocation5 + $0x10] sm:$0xf]  ;;  %v2619_v8 = vld [vmem:[#allocation5 + $0x14] sm:$0xf0] }
  0x51   : > { %677 = vmatpush.bf16.msra.mxu2 %v2523_v46  ;;  %v2558_v9 = vld [vmem:[#allocation5 + $0x90] sm:$0xf]  ;;  %v2571_v10 = vor.u32 %v2636_v2, %v2568_v3  ;;  %v2635_v11 = vld [vmem:[#allocation5 + $0x94] sm:$0xf0]  ;;  %v2618_v12 = vld [vmem:[#allocation5 + $0x14] sm:$0xf]  ;;  %v2495_v16 = vor.u32 %v2619_v8, %v2494_v7 }
  0x52   : > { %706 = vmatpush.bf16.msra.mxu3 %v2587_v50  ;;  %v2496_v13 = vld [vmem:[#allocation5 + $0x18] sm:$0xf0]  ;;  %v2634_v14 = vld [vmem:[#allocation5 + $0x94] sm:$0xf]  ;;  %v2486_v17 = vld [vmem:[#allocation5] sm:$0xf]  ;;  %v2559_v19 = vor.u32 %v2635_v11, %v2558_v9 }
  0x53   : > { %620 = vmatpush.bf16.msra.mxu0 %v2511_v56  ;;  %v2560_v15 = vld [vmem:[#allocation5 + $0x98] sm:$0xf0]  ;;  %v2617_v18 = vld [vmem:[#allocation5 + $0x4] sm:$0xf0]  ;;  %v2499_v20 = vor.u32 %v2618_v12, %v2496_v13  ;;  %v2550_v21 = vld [vmem:[#allocation5 + $0x80] sm:$0xf] }
  0x54   : > { %649 = vmatpush.bf16.msra.mxu1 %v2575_v57  ;;  %v2633_v22 = vld [vmem:[#allocation5 + $0x84] sm:$0xf0]  ;;  %v2563_v23 = vor.u32 %v2634_v14, %v2560_v15  ;;  %v2616_v24 = vld [vmem:[#allocation5 + $0x4] sm:$0xf]  ;;  %v2488_v25 = vld [vmem:[#allocation5 + $0x8] sm:$0xf0]  ;;  %v2487_v28 = vor.u32 %v2617_v18, %v2486_v17 }
  0x55   : > { %678 = vmatpush.bf16.msra.mxu2 %v2515_v58  ;;  %v2632_v26 = vld [vmem:[#allocation5 + $0x84] sm:$0xf]  ;;  %v2552_v27 = vld [vmem:[#allocation5 + $0x88] sm:$0xf0]  ;;  %v394_v30 = vld [vmem:[%s3184_s13 + $0x10] sm:$0xff]  ;;  %v2551_v31 = vor.u32 %v2633_v22, %v2550_v21  ;;  %v2491_v32 = vor.u32 %v2616_v24, %v2488_v25  ;;  %v3026_v56 = vmov 0.0  }
  0x56   : > { %707 = vmatpush.bf16.msra.mxu3 %v2579_v62  ;;  %v392_v29 = vld [vmem:[%s3184_s13] sm:$0xff]  ;;  %v393_v33 = vld [vmem:[%s3184_s13 + $0x8] sm:$0xff]  ;;  %v395_v34 = vld [vmem:[%s3184_s13 + $0x18] sm:$0xff]  ;;  %v2555_v35 = vor.u32 %v2632_v26, %v2552_v27  ;;  %790 = vst [vmem:[#allocation2 + $0xb0] sm:$0xff] %v3026_v56  ;;  %p387_p1 = scmp.lt.s32.totalorder %s3091_s8, 1  ;;  %vm1145_vm0 = vcmask 1045504  }
  0x57   : > { %621 = vmatpush.bf16.msra.mxu0 %v2503_v4  ;;  %v448_v36 = vpack.c.bf16 %v394_v30, %v392_v29  ;;  %v449_v37 = vpack.c.bf16 %v395_v34, %v393_v33  ;;  %v396_v38 = vld [vmem:[%s3184_s13 + $0x20] sm:$0xff]  ;;  %v398_v39 = vld [vmem:[%s3184_s13 + $0x30] sm:$0xff]  ;;  %v397_v40 = vld [vmem:[%s3184_s13 + $0x28] sm:$0xff]  ;;  %792 = vst [vmem:[#allocation2 + $0xd8] sm:$0xff] %v3026_v56  ;;  %vm2241_vm1 = vcmask 1040384  }
  0x58   : > { %650 = vmatpush.bf16.msra.mxu1 %v2567_v5  ;;  %v399_v41 = vld [vmem:[%s3184_s13 + $0x38] sm:$0xff]  ;;  %v450_v42 = vpack.c.bf16 %v398_v39, %v396_v38  ;;  %v400_v44 = vld [vmem:[%s3184_s13 + $0x40] sm:$0xff]  ;;  %v402_v45 = vld [vmem:[%s3184_s13 + $0x50] sm:$0xff]  ;;  %794 = vst [vmem:[#allocation2 + $0x50] sm:$0xff] %v3026_v56  ;;  %s4461_s8 = smov (!%p387_p1, %s3091_s8), 1 }
  0x59   : > { %679 = vmatpush.bf16.msra.mxu2 %v2507_v6  ;;  %v451_v43 = vpack.c.bf16 %v399_v41, %v397_v40  ;;  %v401_v46 = vld [vmem:[%s3184_s13 + $0x48] sm:$0xff]  ;;  %v403_v47 = vld [vmem:[%s3184_s13 + $0x58] sm:$0xff]  ;;  %v452_v48 = vpack.c.bf16 %v402_v45, %v400_v44  ;;  %v404_v50 = vld [vmem:[%s3184_s13 + $0x60] sm:$0xff]  ;;  %796 = vst [vmem:[#allocation2 + $0x130] sm:$0xff] %v3026_v56  ;;  %s2615_s9 = sshll.u32 %s4461_s8, 8 }
  0x5a   : > { %708 = vmatpush.bf16.msra.mxu3 %v2571_v10  ;;  %v453_v49 = vpack.c.bf16 %v403_v47, %v401_v46  ;;  %v406_v51 = vld [vmem:[%s3184_s13 + $0x70] sm:$0xff]  ;;  %v405_v52 = vld [vmem:[%s3184_s13 + $0x68] sm:$0xff]  ;;  %v407_v53 = vld [vmem:[%s3184_s13 + $0x78] sm:$0xff]  ;;  %791 = vst [vmem:[#allocation2 + $0x1b0] sm:$0xff] %v3026_v56  ;;  %s3356_s23 = scalar_lea.vmem %s4344_s7, %s2615_s9 }
  0x5b   : > { %622 = vmatpush.bf16.msra.mxu0 %v2495_v16  ;;  %v454_v54 = vpack.c.bf16 %v406_v51, %v404_v50  ;;  %v455_v55 = vpack.c.bf16 %v407_v53, %v405_v52  ;;  %793 = vst [vmem:[#allocation2 + $0x18] sm:$0xff] %v3026_v56  ;;  %v3228_v57 = vld [vmem:[#allocation10] sm:$0xff]  ;;  %v3233_v58 = vld [vmem:[#allocation10 + $0x8] sm:$0xff]  ;;  %v440_v8 = vld [vmem:[#allocation7] sm:$0x3] }
  0x5c   : > { %651 = vmatpush.bf16.msra.mxu1 %v2559_v19  ;;  %795 = vst [vmem:[#allocation2 + $0x168] sm:$0xff] %v3026_v56  ;;  %v3236_v59 = vperm.slane %v3228_v57, 1  ;;  %v3242_v60 = vperm.slane %v3233_v58, 1  ;;  %v3246_v61 = vperm.slane %v3228_v57, 0  ;;  %v3250_v63 = vperm.slane %v3228_v57, 2 }
  0x5d   : > { %680 = vmatpush.bf16.msra.mxu2 %v2499_v20  ;;  %797 = vst [vmem:[#allocation2 + $0x48] sm:$0xff] %v3026_v56  ;;  %v867_v0 = vld [vmem:[#allocation2 + $0xb0] sm:$0x80]  ;;  %v3256_v3 = vperm.slane %v3233_v58, 0  ;;  %v3262_v5 = vperm.slane %v3233_v58, 2  ;;  %v3277_v18 = vperm.slane %v440_v8, 0 }
  0x5e   : > { %709 = vmatpush.bf16.msra.mxu3 %v2563_v23  ;;  %800 = vst [vmem:[#allocation2 + $0x118] sm:$0xff] %v3026_v56  ;;  %v951_v62 = vmul.f32 0.0, %v3236_v59  ;;  %v1047_v1 = vld [vmem:[#allocation2 + $0xd8] sm:$0xfe]  ;;  %v3259_v4 = vmul.f32 0.0, %v3242_v60  ;;  %v901_v10 = vmul.f32 %v3246_v61, %v867_v0  ;;  %v3289_v23 = vperm.slane %v3228_v57, 3 }
  0x5f   : > { %623 = vmatpush.bf16.msra.mxu0 %v2487_v28  ;;  %801 = vst [vmem:[#allocation2 + $0x98] sm:$0xff] %v3026_v56  ;;  %v1049_v2 = vld [vmem:[#allocation2 + $0x50] sm:$0x1]  ;;  %v441_v9 = vld [vmem:[#allocation8] sm:$0x3]  ;;  %v1081_v12 = vmul.f32 %v3250_v63, %v1047_v1  ;;  %v3293_v27 = vperm.slane %v440_v8, 1 }
  0x60   : > { %652 = vmatpush.bf16.msra.mxu1 %v2551_v31  ;;  %802 = vst [vmem:[#allocation2 + $0x120] sm:$0xff] %v3026_v56  ;;  %v983_v11 = vrot.slane %v951_v62, 1  ;;  %v869_v13 = vld [vmem:[#allocation2 + $0xd8] sm:$0x7f]  ;;  %v1083_v14 = vmul.f32 %v3250_v63, %v1049_v2  ;;  %v984_v16 = vrot.slane %v3259_v4, 1  ;;  %v3279_v19 = vperm.slane %v441_v9, 0 }
  0x61   : > { %681 = vmatpush.bf16.msra.mxu2 %v2491_v32  ;;  %803 = vst [vmem:[#allocation2 + $0x150] sm:$0xff] %v3026_v56  ;;  %v868_v6 = vld [vmem:[#allocation2 + $0x1b0] sm:$0x80]  ;;  %v903_v20 = vmul.f32 %v3246_v61, %v869_v13  ;;  %v1146_v22 = vrot.slane %v1081_v12, 2  ;;  %v3295_v28 = vperm.slane %v441_v9, 1  ;;  %v3302_v32 = vperm.slane %v3233_v58, 3 }
  0x62   : > { %710 = vmatpush.bf16.msra.mxu3 %v2555_v35  ;;  %624 = vmatmul.bf16.vlgmr.msra.gmra.mxu0 %v448_v36  ;;  %806 = vst [vmem:[#allocation2 + $0xe0] sm:$0xff] %v3026_v56  ;;  %v1048_v7 = vld [vmem:[#allocation2 + $0x18] sm:$0xfe]  ;;  %v902_v15 = vmul.f32 %v3256_v3, %v868_v6  ;;  %v1015_v21 = vadd.f32 %v983_v11, %v901_v10  ;;  %v1148_v25 = vrot.slane %v1083_v14, 2  ;;  %v1258_v26 = vld [vmem:[#allocation2 + $0x130] sm:$0x80] }
  0x63   : > { %653 = vmatmul.bf16.vlgmr.msra.gmra.mxu1 %v449_v37  ;;  %4393 = vst [vmem:[#allocation18_spill] sm:$0xff] %v3236_v59  ;;  %v3275_v17 = vmul.f32 %v3262_v5, %v1048_v7  ;;  %v1050_v24 = vld [vmem:[#allocation2 + $0x168] sm:$0x1]  ;;  %v3305_v35 = vperm.slane %v3228_v57, 4  ;;  %v871_v40 = vld [vmem:[#allocation2 + $0x130] sm:$0x80]  ;;  %v1017_v41 = vadd.f32 %v983_v11, %v903_v20 }
  0x64   : > { %682 = vmatmul.bf16.vlgmr.msra.gmra.mxu2 %v448_v36  ;;  %807 = vst [vmem:[#allocation2 + $0x188] sm:$0xff] %v3026_v56  ;;  %v1016_v30 = vadd.f32 %v984_v16, %v902_v15  ;;  %v870_v36 = vld [vmem:[#allocation2 + $0x18] sm:$0x7f]  ;;  %v1259_v38 = vld [vmem:[#allocation2 + $0x48] sm:$0x80]  ;;  %v1149_v44 = vsel %vm1145_vm0, %v1146_v22, %v1148_v25  ;;  %v3313_v45 = vperm.slane %v3228_v57, 5 }
  0x65   : > { %711 = vmatmul.bf16.vlgmr.msra.gmra.mxu3 %v449_v37  ;;  %808 = vst [vmem:[#allocation2 + $0x138] sm:$0xff] %v3026_v56  ;;  %v1147_v31 = vrot.slane %v3275_v17, 2  ;;  %v1053_v33 = vld [vmem:[#allocation2 + $0x118] sm:$0x1]  ;;  %v1084_v37 = vmul.f32 %v3262_v5, %v1050_v24  ;;  %v872_v46 = vld [vmem:[#allocation2 + $0x48] sm:$0x80]  ;;  %v904_v50 = vmul.f32 %v3256_v3, %v870_v36  ;;  %v1293_v52 = vmul.f32 %v3302_v32, %v1259_v38 }
  0x66   : > { %809 = vst [vmem:[#allocation2 + $0x140] sm:$0xff] %v3026_v56  ;;  %v3317_v47 = vperm.slane %v3233_v58, 4  ;;  %v1472_v53 = vld [vmem:[#allocation2 + $0x118] sm:$0x1]  ;;  %v3331_v0 = vld [vmem:[#allocation10 + $0x10] ss:$0 sm:$0xff]  ;;  %v3334_v2 = vadd.f32 %v1149_v44, %v1017_v41  ;;  %v3340_v7 = vmul.f32 %v3256_v3, %v872_v46 }
  0x67   : > { %812 = vst [vmem:[#allocation2 + $0x1b8] sm:$0xff] %v3026_v56  ;;  %v1227_v51 = vadd.f32 %v1147_v31, %v1016_v30  ;;  %v875_v62 = vld [vmem:[#allocation2 + $0x120] sm:$0x80]  ;;  %v3344_v10 = vperm.slane %v3233_v58, 5  ;;  %v3348_v12 = vmul.f32 %v3313_v45, %v1472_v53  ;;  %v3351_v13 = vperm.slane %v3228_v57, 7 }
  0x68   : > { %4394 = vst [vmem:[#allocation19_spill] sm:$0xff] %v3246_v61  ;;  %v1054_v14 = vld [vmem:[#allocation2 + $0x98] sm:$0x1]  ;;  %v1018_v20 = vadd.f32 %v984_v16, %v904_v50  ;;  %v3364_v24 = vmul.f32 %v3246_v61, %v875_v62  ;;  %v1262_v25 = vld [vmem:[#allocation2 + $0x120] sm:$0x80] }
  0x69   : > { %4395 = vst [vmem:[#allocation20_spill] sm:$0xff] %v3250_v63  ;;  %v1895_v8 = vld [vmem:[#allocation2 + $0xe0] sm:$0x1]  ;;  %v1681_v38 = vld [vmem:[#allocation2 + $0x120] sm:$0x80]  ;;  %v3388_v41 = vmul.f32 %v3289_v23, %v1262_v25 }
  0x6a   : > { %813 = vst [vmem:[#allocation2 + $0x28] sm:$0xff] %v3026_v56  ;;  %v3372_v4 = vmul.f32 %v3331_v0, %v1895_v8  ;;  %v1682_v8 = vld [vmem:[#allocation2 + $0x150] sm:$0x80] }
  0x6b   : > { %814 = vst [vmem:[#allocation2 + $0xf0] sm:$0xff] %v3026_v56 }
  0x6c   : > { %815 = vst [vmem:[#allocation2 + $0x158] sm:$0xff] %v3026_v56 }
  0x6d   : > { %818 = vst [vmem:[#allocation2 + $0x8] sm:$0xff] %v3026_v56 }
  0x6e   : > { %819 = vst [vmem:[#allocation2 + $0x170] sm:$0xff] %v3026_v56 }
  0x6f   : > { %820 = vst [vmem:[#allocation2 + $0xc0] sm:$0xff] %v3026_v56 }
  0x70   : > { %821 = vst [vmem:[#allocation2 + $0xa0] sm:$0xff] %v3026_v56 }
  0x71   : > { %4396 = vst [vmem:[#allocation21_spill] sm:$0xff] %v3277_v18 }
  0x72   : > { %629 = vmatmul.bf16.gmra.mxu0 %v450_v42  ;;  %4397 = vst [vmem:[#allocation22_spill] sm:$0xff] %v3279_v19 }
  0x73   : > { %658 = vmatmul.bf16.gmra.mxu1 %v451_v43  ;;  %824 = vst [vmem:[#allocation2 + $0x100] sm:$0xff] %v3026_v56 }
  0x74   : > { %687 = vmatmul.bf16.gmra.mxu2 %v450_v42  ;;  %4398 = vst [vmem:[#allocation23_spill] sm:$0xff] %v3289_v23  ;;  %v1226_v42 = vadd.f32 %v1146_v22, %v1015_v21  ;;  %v3361_v21 = vadd.f32 %v1293_v52, %v1227_v51  ;;  %v3402_v51 = vperm.slane %v3233_v58, 6 }
  0x75   : > { %716 = vmatmul.bf16.gmra.mxu3 %v451_v43  ;;  %825 = vst [vmem:[#allocation2 + $0xf8] sm:$0xff] %v3026_v56  ;;  %v1292_v43 = vmul.f32 %v3289_v23, %v1258_v26  ;;  %v1473_v26 = vld [vmem:[#allocation2 + $0x98] sm:$0x1] }
  0x76   : > { %826 = vst [vmem:[#allocation2 + $0x40] sm:$0xff] %v3026_v56 }
  0x77   : > { %4399 = vst [vmem:[#allocation24_spill] sm:$0xff] %v3293_v27  ;;  %v3336_v6 = vadd.f32 %v1292_v43, %v1226_v42  ;;  %v3392_v43 = vmul.f32 %v3344_v10, %v1473_v26 }
  0x78   : > { %4400 = vst [vmem:[#allocation25_spill] sm:$0xff] %v3295_v28 }
  0x79   : > { %827 = vst [vmem:[#allocation2 + $0xa8] sm:$0xff] %v3026_v56 }
  0x7a   : > { %830 = vst [vmem:[#allocation2 + $0xb8] sm:$0xff] %v3026_v56 }
  0x7b   : > { %831 = vst [vmem:[#allocation2] sm:$0xff] %v3026_v56 }
  0x7c   : > { %4401 = vst [vmem:[#allocation26_spill] sm:$0xff] %v3313_v45 }
  0x7d   : > { %832 = vst [vmem:[#allocation2 + $0x38] sm:$0xff] %v3026_v56 }
  0x7e   : > { %833 = vst [vmem:[#allocation2 + $0x20] sm:$0xff] %v3026_v56 }
  0x7f   : > { %836 = vst [vmem:[#allocation2 + $0x88] sm:$0xff] %v3026_v56 }
  0x80   : > { %837 = vst [vmem:[#allocation2 + $0xd0] sm:$0xff] %v3026_v56 }
  0x81   : > { %838 = vst [vmem:[#allocation2 + $0x68] sm:$0xff] %v3026_v56 }
  0x82   : > { %634 = vmatmul.bf16.gmra.mxu0 %v452_v48  ;;  %4402 = vst [vmem:[#allocation27_spill] sm:$0xff] %v3351_v13 }
  0x83   : > { %663 = vmatmul.bf16.gmra.mxu1 %v453_v49  ;;  %839 = vst [vmem:[#allocation2 + $0xc8] sm:$0xff] %v3026_v56 }
  0x84   : > { %692 = vmatmul.bf16.gmra.mxu2 %v452_v48  ;;  %v3320_v48 = vmul.f32 %v3250_v63, %v1053_v33  ;;  %842 = vst [vmem:[#allocation2 + $0x178] sm:$0xff] %v3026_v56 }
  0x85   : > { %721 = vmatmul.bf16.gmra.mxu3 %v453_v49  ;;  %843 = vst [vmem:[#allocation2 + $0x70] sm:$0xff] %v3026_v56 }
  0x86   : > { %4403 = vst [vmem:[#allocation28_spill] sm:$0xff] %v3402_v51 }
  0x87   : > { %844 = vst [vmem:[#allocation2 + $0x1c8] sm:$0xff] %v3026_v56 }
  0x88   : > { %845 = vst [vmem:[#allocation2 + $0x90] sm:$0xff] %v3026_v56 }
  0x89   : > { %846 = vst [vmem:[#allocation2 + $0x160] sm:$0xff] %v3026_v56 }
  0x8a   : > { %847 = vst [vmem:[#allocation2 + $0x30] sm:$0xff] %v3026_v56 }
  0x8b   : > { %848 = vst [vmem:[#allocation2 + $0x78] sm:$0xff] %v3026_v56 }
  0x8c   : > { %849 = vst [vmem:[#allocation2 + $0x1c0] sm:$0xff] %v3026_v56 }
  0x92   : > { %639 = vmatmul.bf16.gmra.mxu0 %v454_v54 }
  0x93   : > { %668 = vmatmul.bf16.gmra.mxu1 %v455_v55 }
  0x94   : > { %697 = vmatmul.bf16.gmra.mxu2 %v454_v54  ;;  %v3328_v54 = vmul.f32 %v3246_v61, %v871_v40  ;;  %v3381_v40 = vmul.f32 %v3262_v5, %v1054_v14 }
  0x95   : > { %726 = vmatmul.bf16.gmra.mxu3 %v455_v55  ;;  %v1150_v55 = vrot.slane %v1084_v37, 2 }
  0x97   : > { %v1151_v30 = vsel %vm1145_vm0, %v1147_v31, %v1150_v55  ;;  %v3385_v31 = vld [vmem:[#allocation11] sm:$0x3] }
  0x98   : > { %v3396_v46 = vadd.f32 %v1151_v30, %v1018_v20 }
  0xdf   : > { %v625_v29 = vpop.f32.mrf.mxu0 }
  0xe0   : > { %v654_v34 = vpop.f32.mrf.mxu1 }
  0xe1   : > { %v655_v39 = vadd.f32 %v654_v34, %v625_v29  ;;  %v3369_v34 = vperm.slane %v3228_v57, 6 }
  0xe3   : > { %v737_v49 = vmul.f32 %v3277_v18, %v655_v39  ;;  %v876_v39 = vld [vmem:[#allocation2 + $0x150] sm:$0x80]  ;;  %v3408_v55 = vmul.f32 %v3369_v34, %v1681_v38  ;;  %v3436_v38 = vld [vmem:[#allocation10 + $0x18] ss:$0 sm:$0xff] }
  0xe4   : > { %v3411_v62 = vmul.f32 %v3256_v3, %v876_v39 }
  0xe5   : > { %v758_v1 = vadd.f32 %v3279_v19, %v737_v49  ;;  %v3398_v49 = vld [vmem:[#allocation13] sm:$0x3] }
  0xe6   : > { %v3425_v25 = vperm.slane %v3398_v49, 0 }
  0xe7   : > { %v683_v9 = vpop.f32.mrf.mxu2  ;;  %v774_v15 = vmax.f32 %v758_v1, 0.0  ;;  %v627_v22 = vpop.f32.mrf.mxu0  ;;  %v1263_v1 = vld [vmem:[#allocation2 + $0x150] sm:$0x80] }
  0xe8   : > { %v712_v17 = vpop.f32.mrf.mxu3  ;;  %v656_v33 = vpop.f32.mrf.mxu1  ;;  %4405 = vst [vmem:[#allocation30_spill] sm:$0xff] %v3425_v25 }
  0xe9   : > { %v713_v29 = vadd.f32 %v712_v17, %v683_v9  ;;  %851 = vst [vmem:[#allocation2 + $0x180] sm:$0xff] %v774_v15  ;;  %v3375_v16 = vmul.f32 %v3236_v59, %v774_v15  ;;  %v3378_v36 = vmul.f32 %v3305_v35, %v774_v15  ;;  %v657_v37 = vadd.f32 %v656_v33, %v627_v22 }
  0xea   : > { %2306 = vst [vmem:[%s3356_s23] sm:$0xff] %v774_v15  ;;  %v3418_v17 = vperm.slane %v3233_v58, 7  ;;  %v3422_v22 = vperm.slane %v3385_v31, 0  ;;  %v3431_v58 = vmul.f32 %v3302_v32, %v1263_v1 }
  0xeb   : > { %v738_v57 = vmul.f32 %v3293_v27, %v713_v29  ;;  %v985_v44 = vrot.slane %v3375_v16, 1  ;;  %v739_v50 = vmul.f32 %v3277_v18, %v657_v37  ;;  %v1406_v52 = vrot.slane %v3378_v36, 1  ;;  %v1896_v37 = vld [vmem:[#allocation2 + $0x188] sm:$0x1] }
  0xec   : > { %4404 = vst [vmem:[#allocation29_spill] sm:$0xff] %v3418_v17  ;;  %v3434_v36 = vmul.f32 %v3402_v51, %v1682_v8 }
  0xed   : > { %v759_v53 = vadd.f32 %v3295_v28, %v738_v57  ;;  %v760_v9 = vadd.f32 %v3279_v19, %v739_v50  ;;  %v1019_v30 = vadd.f32 %v985_v44, %v3328_v54 }
  0xef   : > { %v775_v20 = vmax.f32 %v759_v53, 0.0  ;;  %v685_v26 = vpop.f32.mrf.mxu2  ;;  %v776_v33 = vmax.f32 %v760_v9, 0.0  ;;  %v1438_v53 = vadd.f32 %v1406_v52, %v3336_v6  ;;  %v1057_v6 = vld [vmem:[#allocation2 + $0xe0] sm:$0x1] }
  0xf0   : > { %v714_v16 = vpop.f32.mrf.mxu3  ;;  %v873_v39 = vld [vmem:[#allocation2 + $0x180] sm:$0x7f] }
  0xf1   : > { %v1051_v57 = vld [vmem:[#allocation2 + $0x180] sm:$0xfe]  ;;  %v3440_v54 = vmul.f32 %v3242_v60, %v775_v20  ;;  %v3443_v9 = vmul.f32 %v3317_v47, %v775_v20  ;;  %v715_v14 = vadd.f32 %v714_v16, %v685_v26  ;;  %v907_v1 = vmul.f32 %v3246_v61, %v873_v39  ;;  %852 = vst [vmem:[#allocation2 + $0x110] sm:$0xff] %v775_v20 }
  0xf2   : > { %v1260_v50 = vld [vmem:[#allocation2 + $0x180] sm:$0x7f]  ;;  %v1085_v8 = vmul.f32 %v3250_v63, %v1051_v57  ;;  %v3450_v42 = vmul.f32 %v3236_v59, %v776_v33  ;;  %v3457_v39 = vmul.f32 %v3305_v35, %v776_v33  ;;  %2307 = vst [vmem:[%s3356_s23 + $0x8] sm:$0xff] %v775_v20  ;;  %v3471_v16 = vmul.f32 %v3250_v63, %v1057_v6 }
  0xf3   : > { %v1294_v29 = vmul.f32 %v3289_v23, %v1260_v50  ;;  %v1470_v15 = vld [vmem:[#allocation2 + $0x180] sm:$0xfe]  ;;  %v4351_v26 = vrot.slane %v3440_v54, 1  ;;  %v1021_v57 = vadd.f32 %v985_v44, %v907_v1  ;;  %853 = vst [vmem:[#allocation2 + $0x108] sm:$0xff] %v776_v33  ;;  %v3501_v20 = vperm.slane %v3385_v31, 1 }
  0xf4   : > { %v1504_v11 = vmul.f32 %v3313_v45, %v1470_v15  ;;  %v1152_v50 = vrot.slane %v1085_v8, 2  ;;  %v4352_v59 = vrot.slane %v3450_v42, 1  ;;  %v3468_v15 = vmul.f32 %v3436_v38, %v1896_v37  ;;  %2310 = vst [vmem:[%s3356_s23 + $0x20] sm:$0xff] %v776_v33 }
  0xf5   : > { %v1326_v19 = vadd.f32 %v1294_v29, %v3334_v2  ;;  %v3464_v56 = vadd.f32 %v4351_v26, %v3340_v7  ;;  %v4406_v2 = vrot.slane %v3443_v9, 1  ;;  %v4408_v37 = vrot.slane %v3348_v12, 2  ;;  %v1266_v12 = vld [vmem:[#allocation2 + $0x138] sm:$0x80] }
  0xf6   : > { %v1568_v51 = vrot.slane %v1504_v11, 2  ;;  %v1230_v44 = vadd.f32 %v1152_v50, %v1019_v30  ;;  %v4407_v11 = vrot.slane %v3320_v48, 2  ;;  %v3486_v30 = vmul.f32 %v3351_v13, %v776_v33 }
  0xf7   : > { %v1440_v1 = vadd.f32 %v1406_v52, %v1326_v19  ;;  %v3476_v29 = vadd.f32 %v4406_v2, %v3361_v21  ;;  %v630_v19 = vpop.f32.mrf.mxu0  ;;  %v659_v52 = vpop.f32.mrf.mxu1  ;;  %v3492_v21 = vadd.f32 %v4352_v59, %v3364_v24  ;;  %v879_v2 = vld [vmem:[#allocation2 + $0x138] sm:$0x80]  ;;  %v3504_v24 = vperm.slane %v3398_v49, 1  ;;  %v1899_v59 = vld [vmem:[#allocation2 + $0x1b8] sm:$0x1] }
  0xf8   : > { %v1155_v7 = vsel %vm1145_vm0, %v1152_v50, %v4407_v11  ;;  %v1648_v8 = vadd.f32 %v1568_v51, %v1438_v53  ;;  %v1571_v6 = vsel %vm1145_vm0, %v1568_v51, %v4408_v37  ;;  %v1328_v53 = vadd.f32 %v3388_v41, %v1230_v44  ;;  %v874_v44 = vld [vmem:[#allocation2 + $0x110] sm:$0x7f] }
  0xf9   : > { %v1232_v48 = vadd.f32 %v1155_v7, %v1021_v57  ;;  %v740_v50 = vmul.f32 %v3293_v27, %v715_v14  ;;  %v1650_v11 = vadd.f32 %v1571_v6, %v1440_v1  ;;  %v1829_v37 = vrot.slane %v3486_v30, 1  ;;  %4409 = vst [vmem:[#allocation31_spill] sm:$0xff] %v3504_v24  ;;  %v1476_v57 = vld [vmem:[#allocation2 + $0xe0] sm:$0x1]  ;;  %v1685_v14 = vld [vmem:[#allocation2 + $0x138] sm:$0x80] }
  0xfa   : > { %v1747_v51 = vadd.f32 %v3408_v55, %v1648_v8  ;;  %v660_v41 = vadd.f32 %v659_v52, %v630_v19  ;;  %v1052_v7 = vld [vmem:[#allocation2 + $0x110] sm:$0xfe]  ;;  %v4410_v55 = vrot.slane %v3457_v39, 1  ;;  %v3509_v30 = vmul.f32 %v3246_v61, %v879_v2  ;;  %v877_v27 = vld [vmem:[#allocation2 + $0x108] sm:$0x7f] }
  0xfb   : > { %v761_v26 = vadd.f32 %v3295_v28, %v740_v50  ;;  %v1261_v1 = vld [vmem:[#allocation2 + $0x110] sm:$0x7f]  ;;  %v3512_v50 = vmul.f32 %v3289_v23, %v1266_v12  ;;  %v908_v31 = vmul.f32 %v3256_v3, %v874_v44  ;;  %v1086_v49 = vmul.f32 %v3262_v5, %v1052_v7  ;;  %v688_v7 = vpop.f32.mrf.mxu2  ;;  %v1683_v24 = vld [vmem:[#allocation2 + $0x108] sm:$0x7f] }
  0xfc   : > { %v1442_v8 = vadd.f32 %v4410_v55, %v1328_v53  ;;  %v1861_v6 = vadd.f32 %v1829_v37, %v1747_v51  ;;  %4411 = vst [vmem:[#allocation32_spill] sm:$0xff] %v3509_v30  ;;  %v1295_v19 = vmul.f32 %v3302_v32, %v1261_v1  ;;  %v1471_v52 = vld [vmem:[#allocation2 + $0x110] sm:$0xfe]  ;;  %v1055_v53 = vld [vmem:[#allocation2 + $0x108] sm:$0xfe]  ;;  %v3519_v2 = vmul.f32 %v3277_v18, %v660_v41  ;;  %v717_v1 = vpop.f32.mrf.mxu3 }
  0xfd   : > { %v777_v33 = vmax.f32 %v761_v26, 0.0  ;;  %v1505_v28 = vmul.f32 %v3344_v10, %v1471_v52  ;;  %v1264_v51 = vld [vmem:[#allocation2 + $0x108] sm:$0x7f]  ;;  %v3522_v12 = vmul.f32 %v3313_v45, %v1476_v57  ;;  %v3525_v44 = vmul.f32 %v3369_v34, %v1685_v14 }
  0xfe   : > { %v1153_v55 = vrot.slane %v1086_v49, 2  ;;  %v1327_v26 = vadd.f32 %v1295_v19, %v3396_v46  ;;  %v911_v52 = vmul.f32 %v3246_v61, %v877_v27  ;;  %v1474_v30 = vld [vmem:[#allocation2 + $0x108] sm:$0xfe]  ;;  %v3530_v41 = vmul.f32 %v3331_v0, %v1899_v59 }
  0xff   : > { %854 = vst [vmem:[#allocation2 + $0x60] sm:$0xff] %v777_v33  ;;  %v1569_v18 = vrot.slane %v1505_v28, 2  ;;  %v3533_v57 = vmul.f32 %v3250_v63, %v1055_v53  ;;  %v1298_v14 = vmul.f32 %v3289_v23, %v1264_v51  ;;  %v3537_v13 = vmul.f32 %v3313_v45, %v1474_v30  ;;  %v1893_v49 = vld [vmem:[#allocation2 + $0x108] sm:$0xfe] }
 0x100   : > { %2311 = vst [vmem:[%s3356_s23 + $0x28] sm:$0xff] %v777_v33  ;;  %v4412_v46 = vrot.slane %v3440_v54, 1  ;;  %v1231_v19 = vadd.f32 %v1153_v55, %v3464_v56  ;;  %v1717_v61 = vmul.f32 %v3369_v34, %v1683_v24  ;;  %v3544_v59 = vadd.f32 %v717_v1, %v688_v7 }
 0x101   : > { %v4413_v28 = vrot.slane %v3443_v9, 1  ;;  %v1158_v63 = vrot.slane %v3533_v57, 2  ;;  %v1330_v51 = vadd.f32 %v1298_v14, %v1232_v48  ;;  %v1574_v30 = vrot.slane %v3537_v13, 2 }
 0x102   : > { %v1022_v27 = vadd.f32 %v4412_v46, %v908_v31  ;;  %v1749_v45 = vadd.f32 %v1717_v61, %v1650_v11  ;;  %v1927_v23 = vmul.f32 %v3331_v0, %v1893_v49  ;;  %v956_v54 = vmul.f32 %v3242_v60, %v777_v33 }
 0x103   : > { %v1441_v53 = vadd.f32 %v4413_v28, %v1327_v26  ;;  %v4414_v31 = vrot.slane %v3381_v40, 2  ;;  %v1649_v24 = vadd.f32 %v1569_v18, %v3476_v29  ;;  %v4415_v7 = vrot.slane %v3450_v42, 1 }
 0x104   : > { %v1234_v48 = vadd.f32 %v1158_v63, %v3492_v21  ;;  %v4416_v61 = vrot.slane %v3457_v39, 1  ;;  %v3569_v1 = vadd.f32 %v1574_v30, %v1442_v8  ;;  %v1863_v40 = vadd.f32 %v1829_v37, %v1749_v45 }
 0x105   : > { %v1157_v56 = vsel %vm1145_vm0, %v1153_v55, %v4414_v31  ;;  %v3558_v9 = vadd.f32 %v4415_v7, %v911_v52  ;;  %v1991_v55 = vrot.slane %v1927_v23, 2  ;;  %v988_v26 = vrot.slane %v956_v54, 1 }
 0x106   : > { %v3565_v11 = vadd.f32 %v4416_v61, %v1330_v51  ;;  %v878_v29 = vld [vmem:[#allocation2 + $0x60] sm:$0x7f]  ;;  %v1233_v42 = vadd.f32 %v1157_v56, %v1022_v27  ;;  %v1329_v49 = vadd.f32 %v3431_v58, %v1231_v19  ;;  %v1377_v46 = vmul.f32 %v3317_v47, %v777_v33 }
 0x107   : > { %v1056_v14 = vld [vmem:[#allocation2 + $0x60] sm:$0xfe]  ;;  %v4417_v21 = vrot.slane %v3392_v43, 2  ;;  %v4418_v28 = vrot.slane %v3372_v4, 2  ;;  %v2071_v51 = vadd.f32 %v1991_v55, %v1861_v6  ;;  %v912_v23 = vmul.f32 %v3256_v3, %v878_v29 }
 0x108   : > { %v1265_v52 = vld [vmem:[#allocation2 + $0x60] sm:$0x7f]  ;;  %v1798_v37 = vmul.f32 %v3418_v17, %v777_v33  ;;  %v3582_v58 = vmul.f32 %v3262_v5, %v1056_v14  ;;  %v1024_v54 = vadd.f32 %v988_v26, %v3411_v62  ;;  %v1409_v6 = vrot.slane %v1377_v46, 1 }
 0x109   : > { %v1573_v39 = vsel %vm1145_vm0, %v1569_v18, %v4417_v21  ;;  %v1994_v8 = vsel %vm1145_vm0, %v1991_v55, %v4418_v28  ;;  %v1475_v45 = vld [vmem:[#allocation2 + $0x60] sm:$0xfe]  ;;  %v1299_v19 = vmul.f32 %v3302_v32, %v1265_v52  ;;  %v1748_v18 = vadd.f32 %v3434_v36, %v1649_v24  ;;  %v4419_v36 = vld [vmem:[#allocation28_spill] sm:$0xff] }
 0x10a   : > { %v2073_v27 = vadd.f32 %v1994_v8, %v1863_v40  ;;  %v1684_v43 = vld [vmem:[#allocation2 + $0x60] sm:$0x7f]  ;;  %v2108_v4 = vmul.f32 %v3422_v22, %v2071_v51  ;;  %v3589_v31 = vmul.f32 %v3344_v10, %v1475_v45  ;;  %v3592_v7 = vadd.f32 %v988_v26, %v912_v23 }
 0x10b   : > { %v1894_v56 = vld [vmem:[#allocation2 + $0x60] sm:$0xfe]  ;;  %v1159_v61 = vrot.slane %v3582_v58, 2  ;;  %v1651_v40 = vadd.f32 %v1573_v39, %v1441_v53  ;;  %v1331_v29 = vadd.f32 %v1299_v19, %v1233_v42  ;;  %v1718_v24 = vmul.f32 %v4419_v36, %v1684_v43  ;;  %v4420_v42 = vld [vmem:[#allocation22_spill] sm:$0xff] }
 0x10c   : > { %v2110_v33 = vmul.f32 %v3422_v22, %v2073_v27  ;;  %v2145_v55 = vadd.f32 %v3425_v25, %v2108_v4  ;;  %v1830_v14 = vrot.slane %v1798_v37, 1  ;;  %v1443_v52 = vadd.f32 %v1409_v6, %v1329_v49 }
 0x10d   : > { %v4370_v46 = vrot.slane %v3589_v31, 2  ;;  %v1928_v21 = vmul.f32 %v3436_v38, %v1894_v56  ;;  %v1235_v26 = vadd.f32 %v1159_v61, %v1024_v54  ;;  %v1750_v8 = vadd.f32 %v1718_v24, %v1651_v40  ;;  %v4422_v40 = vld [vmem:[#allocation18_spill] sm:$0xff] }
 0x10e   : > { %v2147_v62 = vadd.f32 %v3425_v25, %v2110_v33  ;;  %v2177_v28 = vmax.f32 %v2145_v55, 0.0  ;;  %v1862_v51 = vadd.f32 %v1830_v14, %v1748_v18  ;;  %v762_v23 = vadd.f32 %v4420_v42, %v3519_v2 }
 0x10f   : > { %v1992_v39 = vrot.slane %v1928_v21, 2  ;;  %v1160_v45 = vrot.slane %v3471_v16, 2  ;;  %v3605_v27 = vadd.f32 %v1409_v6, %v1331_v29  ;;  %v1864_v49 = vadd.f32 %v1830_v14, %v1750_v8  ;;  %v1058_v14 = vld [vmem:[#allocation2 + $0x188] sm:$0x1]  ;;  %v880_v8 = vld [vmem:[#allocation2 + $0x140] sm:$0x80] }
 0x110   : > { %v2179_v53 = vmax.f32 %v2147_v62, 0.0  ;;  %v2242_v37 = vrot.slane %v2177_v28, 7  ;;  %v1576_v19 = vrot.slane %v3522_v12, 2  ;;  %v4421_v4 = vrot.slane %v3468_v15, 2  ;;  %v4424_v62 = vld [vmem:[#allocation31_spill] sm:$0xff] }
 0x111   : > { %v2072_v18 = vadd.f32 %v1992_v39, %v1862_v51  ;;  %v778_v56 = vmax.f32 %v762_v23, 0.0  ;;  %v3613_v33 = vadd.f32 %v4370_v46, %v1443_v52  ;;  %v1161_v16 = vsel %vm1145_vm0, %v1158_v63, %v1160_v45  ;;  %v1267_v51 = vld [vmem:[#allocation2 + $0x140] sm:$0x80] }
 0x112   : > { %v2243_v43 = vrot.slane %v2179_v53, 7  ;;  %v1996_v54 = vsel %vm1145_vm0, %v1992_v39, %v4421_v4  ;;  %v1332_v6 = vadd.f32 %v3512_v50, %v1234_v48  ;;  %v1577_v29 = vsel %vm1145_vm0, %v1574_v30, %v1576_v19  ;;  %v4423_v50 = vld [vmem:[#allocation27_spill] sm:$0xff]  ;;  %v4425_v30 = vld [vmem:[#allocation24_spill] sm:$0xff]  ;;  %v1477_v19 = vld [vmem:[#allocation2 + $0x188] sm:$0x1] }
 0x113   : > { %v2074_v2 = vadd.f32 %v1996_v54, %v1864_v49  ;;  %v2109_v15 = vmul.f32 %v3501_v20, %v2072_v18  ;;  %855 = vst [vmem:[#allocation2 + $0x80] sm:$0xff] %v778_v56  ;;  %v957_v55 = vmul.f32 %v4422_v40, %v778_v56  ;;  %v3628_v57 = vmul.f32 %v3305_v35, %v778_v56 }
 0x114   : > { %v2244_v12 = vsel %vm2241_vm1, %v2242_v37, %v2243_v43  ;;  %v1751_v63 = vadd.f32 %v3525_v44, %v3569_v1  ;;  %v3633_v48 = vmul.f32 %v4423_v50, %v778_v56  ;;  %v1236_v13 = vadd.f32 %v1161_v16, %v3558_v9  ;;  %2314 = vst [vmem:[%s3356_s23 + $0x40] sm:$0xff] %v778_v56  ;;  %v4426_v37 = vld [vmem:[#allocation25_spill] sm:$0xff] }
 0x115   : > { %2308 = vst [vmem:[%s3356_s23 + $0x10] sm:$0xff] %v2244_v12  ;;  %v2111_v24 = vmul.f32 %v3501_v20, %v2074_v2  ;;  %v2146_v52 = vadd.f32 %v4424_v62, %v2109_v15  ;;  %v989_v21 = vrot.slane %v957_v55, 1  ;;  %v742_v28 = vmul.f32 %v4425_v30, %v3544_v59  ;;  %v4427_v59 = vld [vmem:[#allocation32_spill] sm:$0xff]  ;;  %v1686_v12 = vld [vmem:[#allocation2 + $0x140] sm:$0x80] }
 0x116   : > { %v1410_v39 = vrot.slane %v3628_v57, 1  ;;  %v1654_v44 = vadd.f32 %v1577_v29, %v3565_v11  ;;  %v1831_v1 = vrot.slane %v3633_v48, 1  ;;  %v1999_v45 = vrot.slane %v3530_v41, 2  ;;  %v1900_v15 = vld [vmem:[#allocation2 + $0x28] sm:$0x1] }
 0x117   : > { %v2148_v53 = vadd.f32 %v4424_v62, %v2111_v24  ;;  %v2178_v23 = vmax.f32 %v2146_v52, 0.0  ;;  %v763_v49 = vadd.f32 %v4426_v37, %v742_v28  ;;  %v1092_v9 = vmul.f32 %v3262_v5, %v1058_v14  ;;  %v4428_v14 = vld [vmem:[#allocation19_spill] sm:$0xff]  ;;  %v4429_v28 = vld [vmem:[#allocation20_spill] sm:$0xff] }
 0x118   : > { %v1027_v4 = vadd.f32 %v989_v21, %v4427_v59  ;;  %v914_v54 = vmul.f32 %v3256_v3, %v880_v8  ;;  %v1301_v18 = vmul.f32 %v3302_v32, %v1267_v51  ;;  %v1446_v56 = vadd.f32 %v1410_v39, %v1332_v6 }
 0x119   : > { %v2180_v43 = vmax.f32 %v2148_v53, 0.0  ;;  %v1865_v2 = vadd.f32 %v1831_v1, %v1751_v63  ;;  %v779_v11 = vmax.f32 %v763_v49, 0.0  ;;  %v1162_v16 = vrot.slane %v1092_v9, 2  ;;  %v4430_v49 = vld [vmem:[#allocation23_spill] sm:$0xff] }
 0x11a   : > { %v2245_v55 = vrot.slane %v2178_v23, 7  ;;  %v881_v29 = vld [vmem:[#allocation2 + $0x80] sm:$0x7f]  ;;  %v3650_v57 = vadd.f32 %v1301_v18, %v1235_v26  ;;  %v1511_v48 = vmul.f32 %v3344_v10, %v1477_v19  ;;  %v4431_v19 = vld [vmem:[#allocation26_spill] sm:$0xff] }
 0x11b   : > { %v2246_v41 = vrot.slane %v2180_v43, 7  ;;  %v1059_v24 = vld [vmem:[#allocation2 + $0x80] sm:$0xfe]  ;;  %v915_v52 = vmul.f32 %v4428_v14, %v881_v29  ;;  %v958_v53 = vmul.f32 %v3242_v60, %v779_v11  ;;  %v1163_v23 = vsel %vm1145_vm0, %v1159_v61, %v1162_v16  ;;  %856 = vst [vmem:[#allocation2 + $0x1a8] sm:$0xff] %v779_v11 }
 0x11c   : > { %v3655_v8 = vmul.f32 %v4429_v28, %v1059_v24  ;;  %v1268_v6 = vld [vmem:[#allocation2 + $0x80] sm:$0x7f]  ;;  %v1720_v61 = vmul.f32 %v4419_v36, %v1686_v12  ;;  %2315 = vst [vmem:[%s3356_s23 + $0x48] sm:$0xff] %v779_v11  ;;  %v1379_v46 = vmul.f32 %v3317_v47, %v779_v11 }
 0x11d   : > { %v1478_v63 = vld [vmem:[#allocation2 + $0x80] sm:$0xfe]  ;;  %v2247_v26 = vsel %vm2241_vm1, %v2245_v55, %v2246_v41  ;;  %v1302_v9 = vmul.f32 %v4430_v49, %v1268_v6  ;;  %v990_v58 = vrot.slane %v958_v53, 1  ;;  %v3671_v16 = vadd.f32 %v989_v21, %v915_v52 }
 0x11e   : > { %v1687_v51 = vld [vmem:[#allocation2 + $0x80] sm:$0x7f]  ;;  %v3664_v43 = vmul.f32 %v4431_v19, %v1478_v63  ;;  %2309 = vst [vmem:[%s3356_s23 + $0x18] sm:$0xff] %v2247_v26  ;;  %v4371_v29 = vrot.slane %v3655_v8, 2  ;;  %v3674_v6 = vmul.f32 %v3436_v38, %v1900_v15  ;;  %v1237_v26 = vadd.f32 %v1163_v23, %v3592_v7 }
 0x11f   : > { %v1721_v59 = vmul.f32 %v3369_v34, %v1687_v51  ;;  %v1897_v18 = vld [vmem:[#allocation2 + $0x80] sm:$0xfe]  ;;  %v1334_v55 = vadd.f32 %v1302_v9, %v1236_v13  ;;  %v1028_v21 = vadd.f32 %v990_v58, %v914_v54  ;;  %v1578_v52 = vrot.slane %v1511_v48, 2 }
 0x120   : > { %v1931_v24 = vmul.f32 %v3331_v0, %v1897_v18  ;;  %v4372_v63 = vrot.slane %v3664_v43, 2  ;;  %v3682_v53 = vadd.f32 %v4371_v29, %v1027_v4  ;;  %v1411_v9 = vrot.slane %v1379_v46, 1  ;;  %v632_v4 = vpop.f32.mrf.mxu0  ;;  %v661_v29 = vpop.f32.mrf.mxu1 }
 0x121   : > { %v1753_v41 = vadd.f32 %v1721_v59, %v1654_v44  ;;  %v3684_v13 = vadd.f32 %v1410_v39, %v1334_v55  ;;  %v4432_v18 = vrot.slane %v3589_v31, 2  ;;  %v1800_v23 = vmul.f32 %v3418_v17, %v779_v11 }
 0x122   : > { %v1997_v51 = vrot.slane %v1931_v24, 2  ;;  %v2001_v24 = vrot.slane %v3674_v6, 2  ;;  %v1060_v54 = vld [vmem:[#allocation2 + $0x1a8] sm:$0xfe]  ;;  %v1752_v31 = vadd.f32 %v1720_v61, %v3613_v33  ;;  %v662_v33 = vadd.f32 %v661_v29, %v632_v4  ;;  %v1270_v4 = vld [vmem:[#allocation2 + $0xf0] sm:$0x80] }
 0x123   : > { %v1867_v12 = vadd.f32 %v1831_v1, %v1753_v41  ;;  %v1579_v7 = vsel %vm1145_vm0, %v4432_v18, %v1578_v52  ;;  %v3694_v1 = vadd.f32 %v4372_v63, %v1446_v56  ;;  %v1269_v46 = vld [vmem:[#allocation2 + $0x1a8] sm:$0x7f]  ;;  %v3702_v55 = vmul.f32 %v3262_v5, %v1060_v54 }
 0x124   : > { %v2000_v44 = vsel %vm1145_vm0, %v1997_v51, %v1999_v45  ;;  %v2075_v15 = vadd.f32 %v1997_v51, %v1865_v2  ;;  %v882_v45 = vld [vmem:[#allocation2 + $0x1a8] sm:$0x7f]  ;;  %v1655_v2 = vadd.f32 %v1579_v7, %v3605_v27  ;;  %v1303_v41 = vmul.f32 %v3302_v32, %v1269_v46  ;;  %v1480_v46 = vld [vmem:[#allocation2 + $0x1b8] sm:$0x1] }
 0x125   : > { %v2077_v59 = vadd.f32 %v2000_v44, %v1867_v12  ;;  %v916_v11 = vmul.f32 %v3256_v3, %v882_v45  ;;  %v1479_v56 = vld [vmem:[#allocation2 + $0x1a8] sm:$0xfe]  ;;  %v4373_v44 = vrot.slane %v3702_v55, 2  ;;  %v1447_v45 = vadd.f32 %v1411_v9, %v3650_v57 }
 0x126   : > { %v2112_v39 = vmul.f32 %v3422_v22, %v2075_v15  ;;  %v1688_v6 = vld [vmem:[#allocation2 + $0x1a8] sm:$0x7f]  ;;  %v3707_v12 = vmul.f32 %v3344_v10, %v1479_v56  ;;  %v1335_v15 = vadd.f32 %v1303_v41, %v1237_v26  ;;  %v1514_v63 = vmul.f32 %v4431_v19, %v1480_v46 }
 0x127   : > { %v2114_v48 = vmul.f32 %v3422_v22, %v2077_v59  ;;  %v1722_v27 = vmul.f32 %v4419_v36, %v1688_v6  ;;  %v1898_v52 = vld [vmem:[#allocation2 + $0x1a8] sm:$0xfe]  ;;  %v1832_v59 = vrot.slane %v1800_v23, 1  ;;  %v3712_v7 = vadd.f32 %v990_v58, %v916_v11  ;;  %v4433_v11 = vld [vmem:[#allocation21_spill] sm:$0xff] }
 0x128   : > { %v2149_v51 = vadd.f32 %v3425_v25, %v2112_v39  ;;  %v1061_v39 = vld [vmem:[#allocation2 + $0x1b8] sm:$0x1]  ;;  %v1932_v29 = vmul.f32 %v3436_v38, %v1898_v52  ;;  %v3719_v26 = vadd.f32 %v4373_v44, %v1028_v21  ;;  %v3721_v23 = vadd.f32 %v1411_v9, %v1335_v15  ;;  %v883_v52 = vld [vmem:[#allocation2 + $0xf0] sm:$0x80]  ;;  %v1903_v9 = vld [vmem:[#allocation2 + $0x8] sm:$0x1] }
 0x129   : > { %v2151_v61 = vadd.f32 %v3425_v25, %v2114_v48  ;;  %v1754_v54 = vadd.f32 %v1722_v27, %v1655_v2  ;;  %v1866_v6 = vadd.f32 %v1832_v59, %v1752_v31  ;;  %v1689_v48 = vld [vmem:[#allocation2 + $0xf0] sm:$0x80]  ;;  %v743_v57 = vmul.f32 %v4433_v11, %v662_v33 }
 0x12a   : > { %v2181_v18 = vmax.f32 %v2149_v51, 0.0  ;;  %v1998_v51 = vrot.slane %v1932_v29, 2  ;;  %v1095_v27 = vmul.f32 %v4429_v28, %v1061_v39  ;;  %v1723_v21 = vmul.f32 %v3369_v34, %v1689_v48 }
 0x12b   : > { %v2183_v56 = vmax.f32 %v2151_v61, 0.0  ;;  %v1868_v58 = vadd.f32 %v1832_v59, %v1754_v54  ;;  %v764_v31 = vadd.f32 %v4420_v42, %v743_v57  ;;  %v1304_v61 = vmul.f32 %v4430_v49, %v1270_v4 }
 0x12c   : > { %v2248_v2 = vrot.slane %v2181_v18, 7  ;;  %v2002_v59 = vsel %vm1145_vm0, %v1998_v51, %v2001_v24  ;;  %v2076_v33 = vadd.f32 %v1998_v51, %v1866_v6  ;;  %v1166_v18 = vrot.slane %v1095_v27, 2  ;;  %v719_v51 = vpop.f32.mrf.mxu3 }
 0x12d   : > { %v2249_v41 = vrot.slane %v2183_v56, 7  ;;  %v4434_v54 = vrot.slane %v3707_v12, 2  ;;  %v2078_v56 = vadd.f32 %v2002_v59, %v1868_v58  ;;  %v780_v29 = vmax.f32 %v764_v31, 0.0  ;;  %v1062_v59 = vld [vmem:[#allocation2 + $0x28] sm:$0x1] }
 0x12e   : > { %v1582_v57 = vrot.slane %v1514_v63, 2  ;;  %v2113_v46 = vmul.f32 %v3501_v20, %v2076_v33  ;;  %v917_v4 = vmul.f32 %v4428_v14, %v883_v52  ;;  %v4435_v48 = vrot.slane %v3655_v8, 2 }
 0x12f   : > { %v2250_v15 = vsel %vm2241_vm1, %v2248_v2, %v2249_v41  ;;  %v3734_v39 = vadd.f32 %v4434_v54, %v1447_v45  ;;  %v3742_v24 = vmul.f32 %v3331_v0, %v1903_v9  ;;  %v2115_v6 = vmul.f32 %v3501_v20, %v2078_v56  ;;  %857 = vst [vmem:[#allocation2 + $0x128] sm:$0xff] %v780_v29  ;;  %v690_v41 = vpop.f32.mrf.mxu2  ;;  %v1271_v54 = vld [vmem:[#allocation2 + $0x158] sm:$0x80] }
 0x130   : > { %2312 = vst [vmem:[%s3356_s23 + $0x30] sm:$0xff] %v2250_v15  ;;  %v1167_v2 = vsel %vm1145_vm0, %v4435_v48, %v1166_v18  ;;  %v3746_v45 = vmul.f32 %v4422_v40, %v780_v29  ;;  %v1336_v63 = vadd.f32 %v1304_v61, %v3682_v53  ;;  %v3750_v58 = vmul.f32 %v3305_v35, %v780_v29  ;;  %v884_v15 = vld [vmem:[#allocation2 + $0x158] sm:$0x80] }
 0x131   : > { %v2150_v8 = vadd.f32 %v4424_v62, %v2113_v46  ;;  %v4436_v27 = vrot.slane %v3664_v43, 2  ;;  %v1755_v52 = vadd.f32 %v1723_v21, %v3694_v1  ;;  %v3758_v9 = vmul.f32 %v4423_v50, %v780_v29  ;;  %2318 = vst [vmem:[%s3356_s23 + $0x60] sm:$0xff] %v780_v29 }
 0x132   : > { %v2152_v53 = vadd.f32 %v4424_v62, %v2115_v6  ;;  %v991_v61 = vrot.slane %v3746_v45, 1  ;;  %v1240_v33 = vadd.f32 %v1167_v2, %v3671_v16  ;;  %v2005_v18 = vrot.slane %v3742_v24, 2  ;;  %v1481_v6 = vld [vmem:[#allocation2 + $0x28] sm:$0x1]  ;;  %v1690_v45 = vld [vmem:[#allocation2 + $0x158] sm:$0x80] }
 0x133   : > { %v1583_v31 = vsel %vm1145_vm0, %v4436_v27, %v1582_v57  ;;  %v2182_v43 = vmax.f32 %v2150_v8, 0.0  ;;  %v1412_v56 = vrot.slane %v3750_v58, 1  ;;  %v720_v21 = vadd.f32 %v719_v51, %v690_v41  ;;  %v1904_v51 = vld [vmem:[#allocation2 + $0x170] sm:$0x1] }
 0x134   : > { %v1658_v1 = vadd.f32 %v1583_v31, %v3684_v13  ;;  %v2184_v57 = vmax.f32 %v2152_v53, 0.0  ;;  %v1833_v29 = vrot.slane %v3758_v9, 1  ;;  %v3769_v46 = vmul.f32 %v3256_v3, %v884_v15 }
 0x135   : > { %v1096_v48 = vmul.f32 %v3262_v5, %v1062_v59  ;;  %v1031_v16 = vadd.f32 %v991_v61, %v917_v4  ;;  %v1450_v2 = vadd.f32 %v1412_v56, %v1336_v63  ;;  %v744_v24 = vmul.f32 %v4425_v30, %v720_v21 }
 0x136   : > { %v1305_v8 = vmul.f32 %v3302_v32, %v1271_v54  ;;  %v2251_v58 = vrot.slane %v2182_v43, 7  ;;  %v2252_v27 = vrot.slane %v2184_v57, 7  ;;  %v1869_v13 = vadd.f32 %v1833_v29, %v1755_v52  ;;  %v885_v31 = vld [vmem:[#allocation2 + $0x128] sm:$0x7f] }
 0x137   : > { %v1168_v41 = vrot.slane %v1096_v48, 2  ;;  %v1063_v9 = vld [vmem:[#allocation2 + $0x128] sm:$0xfe]  ;;  %v765_v53 = vadd.f32 %v4426_v37, %v744_v24  ;;  %v1515_v4 = vmul.f32 %v3344_v10, %v1481_v6  ;;  %v1724_v63 = vmul.f32 %v4419_v36, %v1690_v45 }
 0x138   : > { %v1272_v15 = vld [vmem:[#allocation2 + $0x128] sm:$0x7f]  ;;  %v1337_v59 = vadd.f32 %v1305_v8, %v3719_v26  ;;  %v2253_v21 = vsel %vm2241_vm1, %v2251_v58, %v2252_v27  ;;  %v919_v54 = vmul.f32 %v4428_v14, %v885_v31  ;;  %v3781_v52 = vmul.f32 %v4429_v28, %v1063_v9  ;;  %v635_v8 = vpop.f32.mrf.mxu0  ;;  %v664_v58 = vpop.f32.mrf.mxu1 }
 0x139   : > { %v1306_v43 = vmul.f32 %v4430_v49, %v1272_v15  ;;  %v1482_v57 = vld [vmem:[#allocation2 + $0x128] sm:$0xfe]  ;;  %2313 = vst [vmem:[%s3356_s23 + $0x38] sm:$0xff] %v2253_v21  ;;  %v781_v45 = vmax.f32 %v765_v53, 0.0  ;;  %v4437_v9 = vrot.slane %v3702_v55, 2  ;;  %v3795_v21 = vmul.f32 %v3436_v38, %v1904_v51 }
 0x13a   : > { %v1691_v48 = vld [vmem:[#allocation2 + $0x128] sm:$0x7f]  ;;  %v3786_v24 = vmul.f32 %v4431_v19, %v1482_v57  ;;  %v4375_v27 = vrot.slane %v3781_v52, 2 }
 0x13b   : > { %v1901_v44 = vld [vmem:[#allocation2 + $0x128] sm:$0xfe]  ;;  %v1725_v26 = vmul.f32 %v3369_v34, %v1691_v48  ;;  %v1338_v31 = vadd.f32 %v1306_v43, %v1240_v33  ;;  %v1169_v15 = vsel %vm1145_vm0, %v4437_v9, %v1168_v41  ;;  %858 = vst [vmem:[#allocation2 + $0x1d8] sm:$0xff] %v781_v45  ;;  %v3806_v55 = vmul.f32 %v3317_v47, %v781_v45 }
 0x13c   : > { %v1935_v6 = vmul.f32 %v3331_v0, %v1901_v44  ;;  %v4376_v57 = vrot.slane %v3786_v24, 2  ;;  %v960_v0 = vmul.f32 %v3242_v60, %v781_v45  ;;  %v3799_v44 = vadd.f32 %v991_v61, %v919_v54  ;;  %2319 = vst [vmem:[%s3356_s23 + $0x68] sm:$0xff] %v781_v45 }
 0x13d   : > { %v1757_v37 = vadd.f32 %v1725_v26, %v1658_v1  ;;  %v3803_v53 = vadd.f32 %v4375_v27, %v1031_v16  ;;  %v665_v33 = vadd.f32 %v664_v58, %v635_v8  ;;  %v3809_v41 = vadd.f32 %v1412_v56, %v1338_v31  ;;  %v1065_v8 = vld [vmem:[#allocation2 + $0x8] sm:$0x1] }
 0x13e   : > { %v2003_v48 = vrot.slane %v1935_v6, 2  ;;  %v3814_v26 = vadd.f32 %v4376_v57, %v1450_v2  ;;  %v992_v61 = vrot.slane %v960_v0, 1  ;;  %v1241_v54 = vadd.f32 %v1169_v15, %v3712_v7  ;;  %v887_v15 = vld [vmem:[#allocation2 + $0xc0] sm:$0x80] }
 0x13f   : > { %v1871_v51 = vadd.f32 %v1833_v29, %v1757_v37  ;;  %v1584_v16 = vrot.slane %v1515_v4, 2  ;;  %v1413_v27 = vrot.slane %v3806_v55, 1  ;;  %v1802_v56 = vmul.f32 %v3418_v17, %v781_v45  ;;  %v1274_v45 = vld [vmem:[#allocation2 + $0xc0] sm:$0x80] }
 0x140   : > { %v2006_v1 = vsel %vm1145_vm0, %v2003_v48, %v2005_v18  ;;  %v2079_v43 = vadd.f32 %v2003_v48, %v1869_v13  ;;  %v4438_v37 = vrot.slane %v3707_v12, 2  ;;  %v1756_v29 = vadd.f32 %v1724_v63, %v3734_v39 }
 0x141   : > { %v2081_v6 = vadd.f32 %v2006_v1, %v1871_v51  ;;  %v2007_v2 = vrot.slane %v3795_v21, 2  ;;  %v745_v13 = vmul.f32 %v4433_v11, %v665_v33  ;;  %v1032_v58 = vadd.f32 %v992_v61, %v3769_v46 }
 0x142   : > { %v2116_v9 = vmul.f32 %v3422_v22, %v2079_v43  ;;  %v1585_v18 = vsel %vm1145_vm0, %v4438_v37, %v1584_v16  ;;  %v1834_v31 = vrot.slane %v1802_v56, 1  ;;  %v886_v48 = vld [vmem:[#allocation2 + $0x1d8] sm:$0x7f]  ;;  %v1451_v55 = vadd.f32 %v1413_v27, %v1337_v59 }
 0x143   : > { %v2118_v7 = vmul.f32 %v3422_v22, %v2081_v6  ;;  %v1064_v0 = vld [vmem:[#allocation2 + $0x1d8] sm:$0xfe]  ;;  %v1659_v51 = vadd.f32 %v1585_v18, %v3721_v23  ;;  %v766_v39 = vadd.f32 %v4420_v42, %v745_v13  ;;  %v1099_v63 = vmul.f32 %v4429_v28, %v1065_v8 }
 0x144   : > { %v2153_v4 = vadd.f32 %v3425_v25, %v2116_v9  ;;  %v1273_v12 = vld [vmem:[#allocation2 + $0x1d8] sm:$0x7f]  ;;  %v920_v1 = vmul.f32 %v3256_v3, %v886_v48  ;;  %v3835_v46 = vmul.f32 %v3262_v5, %v1064_v0  ;;  %v921_v56 = vmul.f32 %v4428_v14, %v887_v15 }
 0x145   : > { %v2155_v21 = vadd.f32 %v3425_v25, %v2118_v7  ;;  %v1483_v43 = vld [vmem:[#allocation2 + $0x1d8] sm:$0xfe]  ;;  %v1307_v6 = vmul.f32 %v3302_v32, %v1273_v12  ;;  %v1870_v18 = vadd.f32 %v1834_v31, %v1756_v29  ;;  %v1308_v13 = vmul.f32 %v4430_v49, %v1274_v45  ;;  %v1484_v45 = vld [vmem:[#allocation2 + $0x8] sm:$0x1] }
 0x146   : > { %v2185_v33 = vmax.f32 %v2153_v4, 0.0  ;;  %v1692_v16 = vld [vmem:[#allocation2 + $0x1d8] sm:$0x7f]  ;;  %v3839_v59 = vmul.f32 %v3344_v10, %v1483_v43  ;;  %v1171_v37 = vrot.slane %v3835_v46, 2  ;;  %v3846_v43 = vadd.f32 %v992_v61, %v920_v1 }
 0x147   : > { %v1726_v23 = vmul.f32 %v4419_v36, %v1692_v16  ;;  %v1902_v9 = vld [vmem:[#allocation2 + $0x1d8] sm:$0xfe]  ;;  %v2187_v8 = vmax.f32 %v2155_v21, 0.0  ;;  %v1339_v4 = vadd.f32 %v1307_v6, %v1241_v54  ;;  %v782_v57 = vmax.f32 %v766_v39, 0.0  ;;  %v1907_v39 = vld [vmem:[#allocation2 + $0x100] sm:$0x1] }
 0x148   : > { %v2254_v7 = vrot.slane %v2185_v33, 7  ;;  %v1936_v0 = vmul.f32 %v3436_v38, %v1902_v9  ;;  %v1172_v16 = vrot.slane %v1099_v63, 2  ;;  %v3850_v15 = vadd.f32 %v1171_v37, %v1032_v58  ;;  %v1693_v33 = vld [vmem:[#allocation2 + $0xc0] sm:$0x80] }
 0x149   : > { %v1758_v48 = vadd.f32 %v1726_v23, %v1659_v51  ;;  %v2255_v12 = vrot.slane %v2187_v8, 7  ;;  %v4378_v21 = vrot.slane %v3839_v59, 2  ;;  %v3854_v38 = vadd.f32 %v1413_v27, %v1339_v4  ;;  %859 = vst [vmem:[#allocation2 + $0x148] sm:$0xff] %v782_v57 }
 0x14a   : > { %v2004_v42 = vrot.slane %v1936_v0, 2  ;;  %v3857_v61 = vmul.f32 %v4422_v40, %v782_v57  ;;  %v4439_v51 = vrot.slane %v3781_v52, 2  ;;  %v1340_v1 = vadd.f32 %v1308_v13, %v3803_v53  ;;  %2322 = vst [vmem:[%s3356_s23 + $0x80] sm:$0xff] %v782_v57  ;;  %v722_v13 = vpop.f32.mrf.mxu3 }
 0x14b   : > { %v1872_v29 = vadd.f32 %v1834_v31, %v1758_v48  ;;  %v2256_v54 = vsel %vm2241_vm1, %v2254_v7, %v2255_v12  ;;  %v3866_v6 = vmul.f32 %v3305_v35, %v782_v57  ;;  %v1518_v9 = vmul.f32 %v4431_v19, %v1484_v45 }
 0x14c   : > { %v1173_v58 = vsel %vm1145_vm0, %v4439_v51, %v1172_v16  ;;  %2316 = vst [vmem:[%s3356_s23 + $0x50] sm:$0xff] %v2256_v54  ;;  %v2008_v31 = vsel %vm1145_vm0, %v2004_v42, %v2007_v2  ;;  %v2080_v63 = vadd.f32 %v2004_v42, %v1870_v18  ;;  %v993_v23 = vrot.slane %v3857_v61, 1  ;;  %v3875_v42 = vld [vmem:[#allocation10 + $0x10] ss:$0 sm:$0xff]  ;;  %v693_v18 = vpop.f32.mrf.mxu2  ;;  %v888_v16 = vld [vmem:[#allocation2 + $0xa0] sm:$0x80] }
 0x14d   : > { %v2082_v27 = vadd.f32 %v2008_v31, %v1872_v29  ;;  %v1727_v8 = vmul.f32 %v3369_v34, %v1693_v33  ;;  %v1414_v7 = vrot.slane %v3866_v6, 1  ;;  %v1803_v2 = vmul.f32 %v4423_v50, %v782_v57  ;;  %v1066_v29 = vld [vmem:[#allocation2 + $0x170] sm:$0x1] }
 0x14e   : > { %v2117_v52 = vmul.f32 %v3501_v20, %v2080_v63  ;;  %v1941_v53 = vmul.f32 %v3875_v42, %v1907_v39  ;;  %v3880_v4 = vadd.f32 %v4378_v21, %v1451_v55  ;;  %v1244_v0 = vadd.f32 %v1173_v58, %v3799_v44  ;;  %v1485_v21 = vld [vmem:[#allocation2 + $0x170] sm:$0x1] }
 0x14f   : > { %v2119_v48 = vmul.f32 %v3501_v20, %v2082_v27  ;;  %v1588_v12 = vrot.slane %v1518_v9, 2  ;;  %v1035_v57 = vadd.f32 %v993_v23, %v921_v56  ;;  %v1454_v33 = vadd.f32 %v1414_v7, %v1340_v1 }
 0x150   : > { %v2154_v45 = vadd.f32 %v4424_v62, %v2117_v52  ;;  %v1759_v54 = vadd.f32 %v1727_v8, %v3814_v26  ;;  %v4440_v51 = vrot.slane %v3786_v24, 2  ;;  %v1835_v39 = vrot.slane %v1803_v2, 1  ;;  %v889_v6 = vld [vmem:[#allocation2 + $0x148] sm:$0x7f] }
 0x151   : > { %v2156_v61 = vadd.f32 %v4424_v62, %v2119_v48  ;;  %v723_v31 = vadd.f32 %v722_v13, %v693_v18  ;;  %v1067_v44 = vld [vmem:[#allocation2 + $0x148] sm:$0xfe]  ;;  %v2011_v58 = vrot.slane %v1941_v53, 2  ;;  %v922_v27 = vmul.f32 %v3256_v3, %v888_v16 }
 0x152   : > { %v1589_v55 = vsel %vm1145_vm0, %v4440_v51, %v1588_v12  ;;  %v2186_v63 = vmax.f32 %v2154_v45, 0.0  ;;  %v1100_v9 = vmul.f32 %v3262_v5, %v1066_v29  ;;  %v923_v1 = vmul.f32 %v4428_v14, %v889_v6  ;;  %v1276_v8 = vld [vmem:[#allocation2 + $0x148] sm:$0x7f] }
 0x153   : > { %v2188_v56 = vmax.f32 %v2156_v61, 0.0  ;;  %v3894_v26 = vmul.f32 %v4429_v28, %v1067_v44  ;;  %v1486_v24 = vld [vmem:[#allocation2 + $0x148] sm:$0xfe]  ;;  %v746_v52 = vmul.f32 %v4425_v30, %v723_v31  ;;  %v1310_v2 = vmul.f32 %v4430_v49, %v1276_v8  ;;  %v4441_v44 = vld [vmem:[#allocation25_spill] sm:$0xff] }
 0x154   : > { %v3899_v18 = vmul.f32 %v4431_v19, %v1486_v24  ;;  %v1662_v53 = vadd.f32 %v1589_v55, %v3809_v41  ;;  %v1695_v13 = vld [vmem:[#allocation2 + $0x148] sm:$0x7f]  ;;  %v1174_v12 = vrot.slane %v1100_v9, 2  ;;  %v2257_v16 = vrot.slane %v2186_v63, 7  ;;  %v1275_v24 = vld [vmem:[#allocation2 + $0xa0] sm:$0x80] }
 0x155   : > { %v1905_v48 = vld [vmem:[#allocation2 + $0x148] sm:$0xfe]  ;;  %v2258_v29 = vrot.slane %v2188_v56, 7  ;;  %v4380_v45 = vrot.slane %v3894_v26, 2  ;;  %v1729_v61 = vmul.f32 %v3369_v34, %v1695_v13  ;;  %v1342_v51 = vadd.f32 %v1310_v2, %v1244_v0  ;;  %v1694_v2 = vld [vmem:[#allocation2 + $0xa0] sm:$0x80] }
 0x156   : > { %v1873_v6 = vadd.f32 %v1835_v39, %v1759_v54  ;;  %v1939_v31 = vmul.f32 %v3875_v42, %v1905_v48  ;;  %v767_v8 = vadd.f32 %v4441_v44, %v746_v52  ;;  %v3907_v55 = vadd.f32 %v993_v23, %v923_v1 }
 0x157   : > { %v2259_v41 = vsel %vm2241_vm1, %v2257_v16, %v2258_v29  ;;  %v4379_v9 = vrot.slane %v3899_v18, 2  ;;  %v1761_v63 = vadd.f32 %v1729_v61, %v1662_v53  ;;  %v3913_v56 = vadd.f32 %v4380_v45, %v1035_v57 }
 0x158   : > { %2317 = vst [vmem:[%s3356_s23 + $0x58] sm:$0xff] %v2259_v41  ;;  %v2009_v0 = vrot.slane %v1939_v31, 2  ;;  %v783_v54 = vmax.f32 %v767_v8, 0.0  ;;  %v1175_v52 = vsel %vm1145_vm0, %v1171_v37, %v1174_v12  ;;  %v3918_v13 = vadd.f32 %v1414_v7, %v1342_v51  ;;  %v1908_v37 = vld [vmem:[#allocation2 + $0xf8] sm:$0x1]  ;;  %v666_v31 = vpop.f32.mrf.mxu1 }
 0x159   : > { %v1875_v23 = vadd.f32 %v1835_v39, %v1761_v63  ;;  %v1309_v1 = vmul.f32 %v3302_v32, %v1275_v24  ;;  %v1519_v53 = vmul.f32 %v3344_v10, %v1485_v21  ;;  %v1728_v39 = vmul.f32 %v4419_v36, %v1694_v2  ;;  %v3946_v63 = vld [vmem:[#allocation10 + $0x18] ss:$0 sm:$0xff] }
 0x15a   : > { %v2012_v48 = vsel %vm1145_vm0, %v2009_v0, %v2011_v58  ;;  %v2083_v16 = vadd.f32 %v2009_v0, %v1873_v6  ;;  %860 = vst [vmem:[#allocation2 + $0x1d0] sm:$0xff] %v783_v54  ;;  %v3924_v57 = vmul.f32 %v3242_v60, %v783_v54  ;;  %v3927_v46 = vmul.f32 %v3317_v47, %v783_v54  ;;  %v637_v6 = vpop.f32.mrf.mxu0  ;;  %v1069_v0 = vld [vmem:[#allocation2 + $0x100] sm:$0x1] }
 0x15b   : > { %v2085_v12 = vadd.f32 %v2012_v48, %v1875_v23  ;;  %v1341_v7 = vadd.f32 %v1309_v1, %v3850_v15  ;;  %v1590_v29 = vrot.slane %v1519_v53, 2  ;;  %2323 = vst [vmem:[%s3356_s23 + $0x88] sm:$0xff] %v783_v54  ;;  %v3934_v21 = vadd.f32 %v4379_v9, %v1454_v33  ;;  %v891_v53 = vld [vmem:[#allocation2 + $0x40] sm:$0x80] }
 0x15c   : > { %v2120_v58 = vmul.f32 %v3422_v22, %v2083_v16  ;;  %v994_v61 = vrot.slane %v3924_v57, 1  ;;  %v3939_v51 = vmul.f32 %v3418_v17, %v783_v54  ;;  %v1415_v15 = vrot.slane %v3927_v46, 1  ;;  %v1278_v48 = vld [vmem:[#allocation2 + $0x40] sm:$0x80] }
 0x15d   : > { %v2122_v8 = vmul.f32 %v3422_v22, %v2085_v12  ;;  %v4442_v24 = vrot.slane %v3839_v59, 2  ;;  %v1942_v33 = vmul.f32 %v3946_v63, %v1908_v37  ;;  %v1245_v54 = vadd.f32 %v1175_v52, %v3846_v43 }
 0x15e   : > { %v2157_v2 = vadd.f32 %v3425_v25, %v2120_v58  ;;  %v1036_v23 = vadd.f32 %v994_v61, %v922_v27  ;;  %v1760_v1 = vadd.f32 %v1728_v39, %v3880_v4  ;;  %v1455_v57 = vadd.f32 %v1415_v15, %v1341_v7  ;;  %v1488_v58 = vld [vmem:[#allocation2 + $0x100] sm:$0x1] }
 0x15f   : > { %v1591_v41 = vsel %vm1145_vm0, %v4442_v24, %v1590_v29  ;;  %v2159_v16 = vadd.f32 %v3425_v25, %v2122_v8  ;;  %v667_v46 = vadd.f32 %v666_v31, %v637_v6  ;;  %v1836_v29 = vrot.slane %v3939_v51, 1 }
 0x160   : > { %v1663_v59 = vadd.f32 %v1591_v41, %v3854_v38  ;;  %v2189_v12 = vmax.f32 %v2157_v2, 0.0  ;;  %v2013_v37 = vrot.slane %v1942_v33, 2  ;;  %v1103_v24 = vmul.f32 %v4429_v28, %v1069_v0 }
 0x161   : > { %v2191_v27 = vmax.f32 %v2159_v16, 0.0  ;;  %v890_v9 = vld [vmem:[#allocation2 + $0x1d0] sm:$0x7f]  ;;  %v747_v4 = vmul.f32 %v4433_v11, %v667_v46  ;;  %v925_v52 = vmul.f32 %v4428_v14, %v891_v53  ;;  %v1312_v39 = vmul.f32 %v4430_v49, %v1278_v48  ;;  %v4443_v16 = vld [vmem:[#allocation22_spill] sm:$0xff]  ;;  %v1697_v46 = vld [vmem:[#allocation2 + $0x40] sm:$0x80] }
 0x162   : > { %v1068_v43 = vld [vmem:[#allocation2 + $0x1d0] sm:$0xfe]  ;;  %v2260_v7 = vrot.slane %v2189_v12, 7  ;;  %v924_v38 = vmul.f32 %v3256_v3, %v890_v9  ;;  %v1178_v8 = vrot.slane %v1103_v24, 2  ;;  %v1874_v12 = vadd.f32 %v1836_v29, %v1760_v1 }
 0x163   : > { %v3961_v6 = vmul.f32 %v3262_v5, %v1068_v43  ;;  %v1277_v51 = vld [vmem:[#allocation2 + $0x1d0] sm:$0x7f]  ;;  %v2261_v41 = vrot.slane %v2191_v27, 7  ;;  %v768_v48 = vadd.f32 %v4443_v16, %v747_v4 }
 0x164   : > { %v1487_v31 = vld [vmem:[#allocation2 + $0x1d0] sm:$0xfe]  ;;  %v1311_v33 = vmul.f32 %v3302_v32, %v1277_v51  ;;  %v1522_v51 = vmul.f32 %v4431_v19, %v1488_v58  ;;  %v1911_v58 = vld [vmem:[#allocation2 + $0xb8] sm:$0x1] }
 0x165   : > { %v3965_v0 = vmul.f32 %v3344_v10, %v1487_v31  ;;  %v1696_v2 = vld [vmem:[#allocation2 + $0x1d0] sm:$0x7f]  ;;  %v2262_v45 = vsel %vm2241_vm1, %v2260_v7, %v2261_v41  ;;  %v784_v27 = vmax.f32 %v768_v48, 0.0  ;;  %v3974_v31 = vadd.f32 %v994_v61, %v924_v38 }
 0x166   : > { %v1906_v53 = vld [vmem:[#allocation2 + $0x1d0] sm:$0xfe]  ;;  %v1730_v9 = vmul.f32 %v4419_v36, %v1696_v2  ;;  %v1343_v24 = vadd.f32 %v1311_v33, %v1245_v54  ;;  %2320 = vst [vmem:[%s3356_s23 + $0x70] sm:$0xff] %v2262_v45  ;;  %v4444_v2 = vrot.slane %v3961_v6, 2  ;;  %v4445_v45 = vrot.slane %v3894_v26, 2 }
 0x167   : > { %v1940_v43 = vmul.f32 %v3946_v63, %v1906_v53  ;;  %v4382_v11 = vrot.slane %v3965_v0, 2  ;;  %861 = vst [vmem:[#allocation2 + $0x190] sm:$0xff] %v784_v27  ;;  %v3984_v54 = vmul.f32 %v4422_v40, %v784_v27  ;;  %v1344_v41 = vadd.f32 %v1312_v39, %v3913_v56 }
 0x168   : > { %v1762_v4 = vadd.f32 %v1730_v9, %v1663_v59  ;;  %v3979_v1 = vadd.f32 %v4444_v2, %v1036_v23  ;;  %v3981_v53 = vadd.f32 %v1415_v15, %v1343_v24  ;;  %v1179_v61 = vsel %vm1145_vm0, %v4445_v45, %v1178_v8  ;;  %2326 = vst [vmem:[%s3356_s23 + $0xa0] sm:$0xff] %v784_v27  ;;  %v892_v24 = vld [vmem:[#allocation2 + $0xa8] sm:$0x80] }
 0x169   : > { %v2010_v16 = vrot.slane %v1940_v43, 2  ;;  %v995_v23 = vrot.slane %v3984_v54, 1  ;;  %v1384_v15 = vmul.f32 %v3305_v35, %v784_v27  ;;  %v1594_v33 = vrot.slane %v1522_v51, 2  ;;  %v695_v43 = vpop.f32.mrf.mxu2  ;;  %v1070_v54 = vld [vmem:[#allocation2 + $0xf8] sm:$0x1] }
 0x16a   : > { %v1876_v7 = vadd.f32 %v1836_v29, %v1762_v4  ;;  %v1731_v48 = vmul.f32 %v3369_v34, %v1697_v46  ;;  %v1805_v8 = vmul.f32 %v4423_v50, %v784_v27  ;;  %v1945_v29 = vmul.f32 %v3875_v42, %v1911_v58 }
 0x16b   : > { %v2014_v59 = vsel %vm1145_vm0, %v2010_v16, %v2013_v37  ;;  %v2084_v38 = vadd.f32 %v2010_v16, %v1874_v12  ;;  %v724_v37 = vpop.f32.mrf.mxu3  ;;  %v4000_v56 = vadd.f32 %v4382_v11, %v1455_v57  ;;  %v1416_v39 = vrot.slane %v1384_v15, 1 }
 0x16c   : > { %v2086_v9 = vadd.f32 %v2014_v59, %v1876_v7  ;;  %v4446_v16 = vrot.slane %v3899_v18, 2  ;;  %v1763_v46 = vadd.f32 %v1731_v48, %v3934_v21  ;;  %v1039_v4 = vadd.f32 %v995_v23, %v925_v52 }
 0x16d   : > { %v2121_v26 = vmul.f32 %v3501_v20, %v2084_v38  ;;  %v1248_v2 = vadd.f32 %v1179_v61, %v3907_v55  ;;  %v1458_v45 = vadd.f32 %v1416_v39, %v1344_v41  ;;  %v1837_v58 = vrot.slane %v1805_v8, 1 }
 0x16e   : > { %v1595_v12 = vsel %vm1145_vm0, %v4446_v16, %v1594_v33  ;;  %v2123_v51 = vmul.f32 %v3501_v20, %v2086_v9  ;;  %v725_v7 = vadd.f32 %v724_v37, %v695_v43  ;;  %v893_v38 = vld [vmem:[#allocation2 + $0x190] sm:$0x7f]  ;;  %v2017_v21 = vrot.slane %v1945_v29, 2  ;;  %v1279_v16 = vld [vmem:[#allocation2 + $0xa8] sm:$0x80] }
 0x16f   : > { %v2158_v27 = vadd.f32 %v4424_v62, %v2121_v26  ;;  %v1666_v57 = vadd.f32 %v1595_v12, %v3918_v13  ;;  %v1071_v15 = vld [vmem:[#allocation2 + $0x190] sm:$0xfe]  ;;  %v926_v33 = vmul.f32 %v3256_v3, %v892_v24  ;;  %v1877_v61 = vadd.f32 %v1837_v58, %v1763_v46 }
 0x170   : > { %v2160_v18 = vadd.f32 %v4424_v62, %v2123_v51  ;;  %v4013_v48 = vmul.f32 %v4429_v28, %v1071_v15  ;;  %v1280_v52 = vld [vmem:[#allocation2 + $0x190] sm:$0x7f]  ;;  %v748_v41 = vmul.f32 %v4425_v30, %v725_v7  ;;  %v1104_v13 = vmul.f32 %v3262_v5, %v1070_v54 }
 0x171   : > { %v2190_v59 = vmax.f32 %v2158_v27, 0.0  ;;  %v1490_v9 = vld [vmem:[#allocation2 + $0x190] sm:$0xfe]  ;;  %v927_v8 = vmul.f32 %v4428_v14, %v893_v38  ;;  %v1314_v43 = vmul.f32 %v4430_v49, %v1280_v52 }
 0x172   : > { %v1699_v55 = vld [vmem:[#allocation2 + $0x190] sm:$0x7f]  ;;  %v2192_v26 = vmax.f32 %v2160_v18, 0.0  ;;  %v4020_v29 = vmul.f32 %v4431_v19, %v1490_v9  ;;  %v4384_v24 = vrot.slane %v4013_v48, 2  ;;  %v769_v18 = vadd.f32 %v4441_v44, %v748_v41 }
 0x173   : > { %v1909_v37 = vld [vmem:[#allocation2 + $0x190] sm:$0xfe]  ;;  %v2263_v12 = vrot.slane %v2190_v59, 7  ;;  %v1733_v51 = vmul.f32 %v3369_v34, %v1699_v55  ;;  %v1346_v54 = vadd.f32 %v1314_v43, %v1248_v2  ;;  %v1180_v52 = vrot.slane %v1104_v13, 2  ;;  %v1698_v2 = vld [vmem:[#allocation2 + $0xa8] sm:$0x80] }
 0x174   : > { %v1943_v46 = vmul.f32 %v3875_v42, %v1909_v37  ;;  %v2264_v27 = vrot.slane %v2192_v26, 7  ;;  %v4383_v7 = vrot.slane %v4020_v29, 2  ;;  %v1313_v9 = vmul.f32 %v3302_v32, %v1279_v16  ;;  %v1489_v26 = vld [vmem:[#allocation2 + $0xf8] sm:$0x1]  ;;  %v1912_v16 = vld [vmem:[#allocation2] sm:$0x1] }
 0x175   : > { %v1765_v38 = vadd.f32 %v1733_v51, %v1666_v57  ;;  %v4029_v11 = vadd.f32 %v995_v23, %v927_v8  ;;  %v4033_v55 = vadd.f32 %v4384_v24, %v1039_v4  ;;  %v785_v37 = vmax.f32 %v769_v18, 0.0  ;;  %v669_v18 = vpop.f32.mrf.mxu1 }
 0x176   : > { %v2015_v15 = vrot.slane %v1943_v46, 2  ;;  %v2265_v59 = vsel %vm2241_vm1, %v2263_v12, %v2264_v27  ;;  %v4036_v43 = vadd.f32 %v1416_v39, %v1346_v54  ;;  %v4041_v23 = vadd.f32 %v4383_v7, %v1458_v45  ;;  %v640_v54 = vpop.f32.mrf.mxu0 }
 0x177   : > { %2321 = vst [vmem:[%s3356_s23 + $0x78] sm:$0xff] %v2265_v59  ;;  %v1879_v57 = vadd.f32 %v1837_v58, %v1765_v38  ;;  %v4044_v4 = vmul.f32 %v3242_v60, %v785_v37  ;;  %v4447_v8 = vrot.slane %v3961_v6, 2  ;;  %v4050_v39 = vmul.f32 %v3317_v47, %v785_v37 }
 0x178   : > { %v2018_v41 = vsel %vm1145_vm0, %v2015_v15, %v2017_v21  ;;  %v2087_v13 = vadd.f32 %v2015_v15, %v1877_v61  ;;  %862 = vst [vmem:[#allocation2 + $0x1a0] sm:$0xff] %v785_v37  ;;  %v1523_v61 = vmul.f32 %v3344_v10, %v1489_v26  ;;  %v1732_v51 = vmul.f32 %v4419_v36, %v1698_v2 }
 0x179   : > { %v1181_v12 = vsel %vm1145_vm0, %v4447_v8, %v1180_v52  ;;  %v2089_v58 = vadd.f32 %v2018_v41, %v1879_v57  ;;  %2327 = vst [vmem:[%s3356_s23 + $0xa8] sm:$0xff] %v785_v37  ;;  %v996_v45 = vrot.slane %v4044_v4, 1  ;;  %v1345_v46 = vadd.f32 %v1313_v9, %v3979_v1  ;;  %v895_v1 = vld [vmem:[#allocation2 + $0x38] sm:$0x80]  ;;  %v1073_v8 = vld [vmem:[#allocation2 + $0xb8] sm:$0x1] }
 0x17a   : > { %v2124_v21 = vmul.f32 %v3422_v22, %v2087_v13  ;;  %v1806_v27 = vmul.f32 %v3418_v17, %v785_v37  ;;  %v1946_v6 = vmul.f32 %v3946_v63, %v1912_v16  ;;  %v1596_v52 = vrot.slane %v1523_v61, 2 }
 0x17b   : > { %v2126_v38 = vmul.f32 %v3422_v22, %v2089_v58  ;;  %v1764_v59 = vadd.f32 %v1732_v51, %v4000_v56  ;;  %v1040_v26 = vadd.f32 %v996_v45, %v926_v33  ;;  %v1249_v2 = vadd.f32 %v1181_v12, %v3974_v31  ;;  %v1282_v58 = vld [vmem:[#allocation2 + $0x38] sm:$0x80]  ;;  %v1492_v12 = vld [vmem:[#allocation2 + $0xb8] sm:$0x1] }
 0x17c   : > { %v2161_v15 = vadd.f32 %v3425_v25, %v2124_v21  ;;  %v1417_v57 = vrot.slane %v4050_v39, 1  ;;  %v1838_v41 = vrot.slane %v1806_v27, 1  ;;  %v4448_v13 = vrot.slane %v3965_v0, 2  ;;  %v1701_v39 = vld [vmem:[#allocation2 + $0x38] sm:$0x80] }
 0x17d   : > { %v2163_v9 = vadd.f32 %v3425_v25, %v2126_v38  ;;  %v670_v4 = vadd.f32 %v669_v18, %v640_v54  ;;  %v2019_v31 = vrot.slane %v1946_v6, 2  ;;  %v929_v0 = vmul.f32 %v4428_v14, %v895_v1 }
 0x17e   : > { %v2193_v37 = vmax.f32 %v2161_v15, 0.0  ;;  %v1597_v16 = vsel %vm1145_vm0, %v4448_v13, %v1596_v52  ;;  %v4069_v21 = vadd.f32 %v1417_v57, %v1345_v46  ;;  %v1878_v33 = vadd.f32 %v1838_v41, %v1764_v59  ;;  %v4449_v15 = vld [vmem:[#allocation21_spill] sm:$0xff] }
 0x17f   : > { %v1667_v56 = vadd.f32 %v1597_v16, %v3981_v53  ;;  %v2195_v61 = vmax.f32 %v2163_v9, 0.0  ;;  %v894_v27 = vld [vmem:[#allocation2 + $0x1a0] sm:$0x7f]  ;;  %v749_v7 = vmul.f32 %v4449_v15, %v670_v4  ;;  %v1107_v6 = vmul.f32 %v4429_v28, %v1073_v8 }
 0x180   : > { %v2266_v51 = vrot.slane %v2193_v37, 7  ;;  %v1072_v38 = vld [vmem:[#allocation2 + $0x1a0] sm:$0xfe]  ;;  %v928_v54 = vmul.f32 %v3256_v3, %v894_v27  ;;  %v1316_v59 = vmul.f32 %v4430_v49, %v1282_v58  ;;  %v1526_v15 = vmul.f32 %v4431_v19, %v1492_v12 }
 0x181   : > { %v4076_v18 = vmul.f32 %v3262_v5, %v1072_v38  ;;  %v1281_v46 = vld [vmem:[#allocation2 + $0x1a0] sm:$0x7f]  ;;  %v2267_v9 = vrot.slane %v2195_v61, 7  ;;  %v4450_v38 = vld [vmem:[#allocation22_spill] sm:$0xff]  ;;  %v1184_v17 = vrot.slane %v1107_v6, 2  ;;  %v4451_v6 = vrot.slane %v4013_v48, 2 }
 0x182   : > { %v1491_v52 = vld [vmem:[#allocation2 + $0x1a0] sm:$0xfe]  ;;  %v1315_v37 = vmul.f32 %v3302_v32, %v1281_v46  ;;  %v770_v24 = vadd.f32 %v4450_v38, %v749_v7  ;;  %v1735_v46 = vmul.f32 %v3369_v34, %v1701_v39  ;;  %v1348_v39 = vadd.f32 %v1316_v59, %v4033_v55  ;;  %v727_v55 = vpop.f32.mrf.mxu3 }
 0x183   : > { %v1700_v53 = vld [vmem:[#allocation2 + $0x1a0] sm:$0x7f]  ;;  %v4082_v13 = vmul.f32 %v3344_v10, %v1491_v52  ;;  %v1183_v4 = vrot.slane %v4076_v18, 2  ;;  %v2268_v8 = vsel %vm2241_vm1, %v2266_v51, %v2267_v9  ;;  %v4092_v52 = vadd.f32 %v996_v45, %v928_v54 }
 0x184   : > { %v1734_v1 = vmul.f32 %v4419_v36, %v1700_v53  ;;  %v1910_v16 = vld [vmem:[#allocation2 + $0x1a0] sm:$0xfe]  ;;  %v1347_v58 = vadd.f32 %v1315_v37, %v1249_v2  ;;  %2324 = vst [vmem:[%s3356_s23 + $0x90] sm:$0xff] %v2268_v8  ;;  %v786_v53 = vmax.f32 %v770_v24, 0.0  ;;  %v1915_v24 = vld [vmem:[#allocation2 + $0x88] sm:$0x1] }
 0x185   : > { %v1944_v27 = vmul.f32 %v3946_v63, %v1910_v16  ;;  %v4096_v16 = vadd.f32 %v1183_v4, %v1040_v26  ;;  %v1599_v12 = vrot.slane %v4082_v13, 2  ;;  %v1185_v26 = vsel %vm1145_vm0, %v4451_v6, %v1184_v17  ;;  %v1496_v13 = vld [vmem:[#allocation2 + $0x88] sm:$0x1] }
 0x186   : > { %v1766_v61 = vadd.f32 %v1734_v1, %v1667_v56  ;;  %v4098_v7 = vadd.f32 %v1417_v57, %v1347_v58  ;;  %863 = vst [vmem:[#allocation2 + $0x10] sm:$0xff] %v786_v53  ;;  %v965_v45 = vmul.f32 %v4422_v40, %v786_v53  ;;  %v4108_v57 = vmul.f32 %v3305_v35, %v786_v53  ;;  %v1074_v1 = vld [vmem:[#allocation2] sm:$0x1] }
 0x187   : > { %v2016_v25 = vrot.slane %v1944_v27, 2  ;;  %v1600_v9 = vrot.slane %v1526_v15, 2  ;;  %2330 = vst [vmem:[%s3356_s23 + $0xc0] sm:$0xff] %v786_v53  ;;  %v1807_v40 = vmul.f32 %v4423_v50, %v786_v53  ;;  %v4452_v17 = vrot.slane %v4020_v29, 2 }
 0x188   : > { %v1880_v51 = vadd.f32 %v1838_v41, %v1766_v61  ;;  %v1418_v48 = vrot.slane %v4108_v57, 1  ;;  %v1949_v15 = vmul.f32 %v3875_v42, %v1915_v24  ;;  %v4123_v27 = vadd.f32 %v1599_v12, %v4069_v21  ;;  %v896_v61 = vld [vmem:[#allocation2 + $0x20] sm:$0x80]  ;;  %v1493_v21 = vld [vmem:[#allocation2] sm:$0x1] }
 0x189   : > { %v2020_v2 = vsel %vm1145_vm0, %v2016_v25, %v2019_v31  ;;  %v2088_v56 = vadd.f32 %v2016_v25, %v1878_v33  ;;  %v997_v31 = vrot.slane %v965_v45, 1  ;;  %v1767_v25 = vadd.f32 %v1735_v46, %v4041_v23  ;;  %v698_v33 = vpop.f32.mrf.mxu2 }
 0x18a   : > { %v2090_v54 = vadd.f32 %v2020_v2, %v1880_v51  ;;  %v1601_v37 = vsel %vm1145_vm0, %v4452_v17, %v1600_v9  ;;  %v1252_v8 = vadd.f32 %v1185_v26, %v4029_v11  ;;  %v1839_v58 = vrot.slane %v1807_v40, 1 }
 0x18b   : > { %v2125_v41 = vmul.f32 %v3501_v20, %v2088_v56  ;;  %v1043_v53 = vadd.f32 %v997_v31, %v929_v0  ;;  %v1670_v29 = vadd.f32 %v1601_v37, %v4036_v43  ;;  %v728_v51 = vadd.f32 %v727_v55, %v698_v33 }
 0x18c   : > { %v2127_v59 = vmul.f32 %v3501_v20, %v2090_v54  ;;  %v1462_v56 = vadd.f32 %v1418_v48, %v1348_v39  ;;  %v2023_v45 = vrot.slane %v1949_v15, 2  ;;  %v1108_v24 = vmul.f32 %v3262_v5, %v1074_v1  ;;  %v1283_v54 = vld [vmem:[#allocation2 + $0x20] sm:$0x80] }
 0x18d   : > { %v2162_v23 = vadd.f32 %v4424_v62, %v2125_v41  ;;  %v897_v57 = vld [vmem:[#allocation2 + $0x10] sm:$0x7f]  ;;  %v1881_v41 = vadd.f32 %v1839_v58, %v1767_v25  ;;  %v750_v11 = vmul.f32 %v4425_v30, %v728_v51  ;;  %v930_v26 = vmul.f32 %v3256_v3, %v896_v61 }
 0x18e   : > { %v2164_v46 = vadd.f32 %v4424_v62, %v2127_v59  ;;  %v1075_v9 = vld [vmem:[#allocation2 + $0x10] sm:$0xfe]  ;;  %v931_v0 = vmul.f32 %v4428_v14, %v897_v57  ;;  %v1186_v55 = vrot.slane %v1108_v24, 2 }
 0x18f   : > { %v2194_v2 = vmax.f32 %v2162_v23, 0.0  ;;  %v4134_v43 = vmul.f32 %v4429_v28, %v1075_v9  ;;  %v1284_v39 = vld [vmem:[#allocation2 + $0x10] sm:$0x7f]  ;;  %v771_v1 = vadd.f32 %v4441_v44, %v750_v11 }
 0x190   : > { %v2196_v6 = vmax.f32 %v2164_v46, 0.0  ;;  %v1494_v33 = vld [vmem:[#allocation2 + $0x10] sm:$0xfe]  ;;  %v1318_v17 = vmul.f32 %v4430_v49, %v1284_v39  ;;  %v1317_v46 = vmul.f32 %v3302_v32, %v1283_v54  ;;  %v4148_v57 = vadd.f32 %v997_v31, %v931_v0  ;;  %v1916_v31 = vld [vmem:[#allocation2 + $0xd0] sm:$0x1] }
 0x191   : > { %v2269_v40 = vrot.slane %v2194_v2, 7  ;;  %v4138_v37 = vmul.f32 %v4431_v19, %v1494_v33  ;;  %v1703_v25 = vld [vmem:[#allocation2 + $0x10] sm:$0x7f]  ;;  %v1188_v23 = vrot.slane %v4134_v43, 2  ;;  %v787_v24 = vmax.f32 %v771_v1, 0.0  ;;  %v4453_v1 = vld [vmem:[#allocation29_spill] sm:$0xff] }
 0x192   : > { %v2270_v59 = vrot.slane %v2196_v6, 7  ;;  %v1913_v15 = vld [vmem:[#allocation2 + $0x10] sm:$0xfe]  ;;  %v1737_v14 = vmul.f32 %v3369_v34, %v1703_v25  ;;  %v1350_v2 = vadd.f32 %v1318_v17, %v1252_v8  ;;  %v1527_v6 = vmul.f32 %v3344_v10, %v1493_v21  ;;  %v1702_v33 = vld [vmem:[#allocation2 + $0x20] sm:$0x80] }
 0x193   : > { %v1947_v61 = vmul.f32 %v3875_v42, %v1913_v15  ;;  %v1604_v9 = vrot.slane %v4138_v37, 2  ;;  %v4153_v25 = vadd.f32 %v1188_v23, %v1043_v53  ;;  %864 = vst [vmem:[#allocation2 + $0x58] sm:$0xff] %v787_v24  ;;  %v966_v8 = vmul.f32 %v3242_v60, %v787_v24  ;;  %v1078_v37 = vld [vmem:[#allocation2 + $0xd0] sm:$0x1] }
 0x194   : > { %v2271_v51 = vsel %vm2241_vm1, %v2269_v40, %v2270_v59  ;;  %v1769_v11 = vadd.f32 %v1737_v14, %v1670_v29  ;;  %v4155_v54 = vadd.f32 %v1418_v48, %v1350_v2  ;;  %v1187_v21 = vsel %vm1145_vm0, %v1183_v4, %v1186_v55  ;;  %2331 = vst [vmem:[%s3356_s23 + $0xc8] sm:$0xff] %v787_v24  ;;  %v642_v55 = vpop.f32.mrf.mxu0  ;;  %v4454_v2 = vld [vmem:[#allocation30_spill] sm:$0xff] }
 0x195   : > { %2325 = vst [vmem:[%s3356_s23 + $0x98] sm:$0xff] %v2271_v51  ;;  %v2021_v39 = vrot.slane %v1947_v61, 2  ;;  %v1349_v59 = vadd.f32 %v1317_v46, %v4096_v16  ;;  %v998_v17 = vrot.slane %v966_v8, 1  ;;  %v4165_v53 = vmul.f32 %v3317_v47, %v787_v24  ;;  %v1077_v46 = vld [vmem:[#allocation2 + $0x88] sm:$0x1] }
 0x196   : > { %v1883_v40 = vadd.f32 %v1839_v58, %v1769_v11  ;;  %v1602_v48 = vrot.slane %v1527_v6, 2  ;;  %v1736_v15 = vmul.f32 %v4419_v36, %v1702_v33  ;;  %v1808_v4 = vmul.f32 %v4453_v1, %v787_v24 }
 0x197   : > { %v2024_v0 = vsel %vm1145_vm0, %v2021_v39, %v2023_v45  ;;  %v2091_v29 = vadd.f32 %v2021_v39, %v1881_v41  ;;  %v1950_v58 = vmul.f32 %v3946_v63, %v1916_v31  ;;  %v671_v45 = vpop.f32.mrf.mxu1  ;;  %v4173_v16 = vadd.f32 %v1604_v9, %v1462_v56  ;;  %v1286_v31 = vld [vmem:[#allocation2 + $0x68] sm:$0x80] }
 0x198   : > { %v2093_v60 = vadd.f32 %v2024_v0, %v1883_v40  ;;  %v1419_v41 = vrot.slane %v4165_v53, 1  ;;  %v1603_v14 = vsel %vm1145_vm0, %v1599_v12, %v1602_v48  ;;  %v1768_v61 = vadd.f32 %v1736_v15, %v4123_v27  ;;  %v4455_v15 = vld [vmem:[#allocation21_spill] sm:$0xff] }
 0x199   : > { %v2128_v18 = vmul.f32 %v3422_v22, %v2091_v29  ;;  %v1044_v6 = vadd.f32 %v998_v17, %v930_v26  ;;  %v1253_v11 = vadd.f32 %v1187_v21, %v4092_v52  ;;  %v1671_v56 = vadd.f32 %v1603_v14, %v4098_v7 }
 0x19a   : > { %v2130_v51 = vmul.f32 %v3422_v22, %v2093_v60  ;;  %v4183_v39 = vadd.f32 %v1419_v41, %v1349_v59  ;;  %v1840_v33 = vrot.slane %v1808_v4, 1  ;;  %v672_v8 = vadd.f32 %v671_v45, %v642_v55  ;;  %v898_v27 = vld [vmem:[#allocation2 + $0x58] sm:$0x7f] }
 0x19b   : > { %v2165_v24 = vadd.f32 %v4454_v2, %v2128_v18  ;;  %v1076_v0 = vld [vmem:[#allocation2 + $0x58] sm:$0xfe]  ;;  %v2025_v29 = vrot.slane %v1950_v58, 2  ;;  %v1111_v53 = vmul.f32 %v4429_v28, %v1077_v46  ;;  %v932_v26 = vmul.f32 %v3256_v3, %v898_v27 }
 0x19c   : > { %v2167_v12 = vadd.f32 %v4454_v2, %v2130_v51  ;;  %v4190_v52 = vmul.f32 %v3262_v5, %v1076_v0  ;;  %v1285_v21 = vld [vmem:[#allocation2 + $0x58] sm:$0x7f]  ;;  %v1882_v48 = vadd.f32 %v1840_v33, %v1768_v61  ;;  %v751_v60 = vmul.f32 %v4455_v15, %v672_v8 }
 0x19d   : > { %v2197_v40 = vmax.f32 %v2165_v24, 0.0  ;;  %v1495_v59 = vld [vmem:[#allocation2 + $0x58] sm:$0xfe]  ;;  %v1319_v4 = vmul.f32 %v3302_v32, %v1285_v21  ;;  %v1320_v28 = vmul.f32 %v4430_v49, %v1286_v31  ;;  %v1530_v61 = vmul.f32 %v4431_v19, %v1496_v13  ;;  %v1500_v31 = vld [vmem:[#allocation2 + $0x178] sm:$0x1] }
 0x19e   : > { %v1704_v7 = vld [vmem:[#allocation2 + $0x58] sm:$0x7f]  ;;  %v2199_v18 = vmax.f32 %v2167_v12, 0.0  ;;  %v4195_v55 = vmul.f32 %v3344_v10, %v1495_v59  ;;  %v1189_v3 = vrot.slane %v4190_v52, 2  ;;  %v772_v8 = vadd.f32 %v4450_v38, %v751_v60 }
 0x19f   : > { %v1914_v58 = vld [vmem:[#allocation2 + $0x58] sm:$0xfe]  ;;  %v1738_v45 = vmul.f32 %v4419_v36, %v1704_v7  ;;  %v2272_v46 = vrot.slane %v2197_v40, 7  ;;  %v1351_v24 = vadd.f32 %v1319_v4, %v1253_v11  ;;  %v4203_v12 = vadd.f32 %v998_v17, %v932_v26  ;;  %v1705_v40 = vld [vmem:[#allocation2 + $0x68] sm:$0x80] }
 0x1a0   : > { %v1948_v14 = vmul.f32 %v3946_v63, %v1914_v58  ;;  %v2273_v51 = vrot.slane %v2199_v18, 7  ;;  %v1190_v21 = vrot.slane %v1111_v53, 2  ;;  %v4208_v7 = vadd.f32 %v1189_v3, %v1044_v6  ;;  %v1709_v53 = vld [vmem:[#allocation2 + $0x1c8] sm:$0x80]  ;;  %v1711_v4 = vld [vmem:[#allocation2 + $0x160] sm:$0x7f] }
 0x1a1   : > { %v1770_v27 = vadd.f32 %v1738_v45, %v1671_v56  ;;  %v1605_v15 = vrot.slane %v4195_v55, 2  ;;  %v788_v13 = vmax.f32 %v772_v8, 0.0  ;;  %v4216_v26 = vadd.f32 %v1419_v41, %v1351_v24  ;;  %v729_v24 = vpop.f32.mrf.mxu3 }
 0x1a2   : > { %v2022_v0 = vrot.slane %v1948_v14, 2  ;;  %v2274_v59 = vsel %vm2241_vm1, %v2272_v46, %v2273_v51  ;;  %v1191_v56 = vsel %vm1145_vm0, %v1188_v23, %v1190_v21  ;;  %v1352_v6 = vadd.f32 %v1320_v28, %v4153_v25  ;;  %v1919_v28 = vld [vmem:[#allocation2 + $0x178] sm:$0x1]  ;;  %v4239_v21 = vld [vmem:[#allocation2 + $0xb0] sm:$0xff] }
 0x1a3   : > { %2328 = vst [vmem:[%s3356_s23 + $0xb0] sm:$0xff] %v2274_v59  ;;  %v1884_v11 = vadd.f32 %v1840_v33, %v1770_v27  ;;  %v1388_v60 = vmul.f32 %v3305_v35, %v788_v13  ;;  %v4221_v18 = vmul.f32 %v4431_v19, %v1500_v31  ;;  %v1739_v43 = vmul.f32 %v3369_v34, %v1705_v40  ;;  %v1921_v35 = vld [vmem:[#allocation2 + $0x160] sm:$0xfe]  ;;  %v1923_v51 = vld [vmem:[#allocation2 + $0x78] sm:$0x1] }
 0x1a4   : > { %v2026_v38 = vsel %vm1145_vm0, %v2022_v0, %v2025_v29  ;;  %v2092_v17 = vadd.f32 %v2022_v0, %v1882_v48  ;;  %865 = vst [vmem:[#allocation2 + $0x198] sm:$0xff] %v788_v13  ;;  %v1606_v48 = vrot.slane %v1530_v61, 2  ;;  %v1256_v23 = vadd.f32 %v1191_v56, %v4148_v57  ;;  %v700_v57 = vpop.f32.mrf.mxu2 }
 0x1a5   : > { %v2094_v33 = vadd.f32 %v2026_v38, %v1884_v11  ;;  %2334 = vst [vmem:[%s3356_s23 + $0xe0] sm:$0xff] %v788_v13  ;;  %v1420_v41 = vrot.slane %v1388_v60, 1  ;;  %v1612_v58 = vrot.slane %v4221_v18, 2  ;;  %v1743_v25 = vmul.f32 %v3369_v34, %v1709_v53 }
 0x1a6   : > { %v2129_v29 = vmul.f32 %v3501_v20, %v2092_v17  ;;  %v1607_v61 = vsel %vm1145_vm0, %v1604_v9, %v1606_v48  ;;  %v4235_v46 = vmul.f32 %v3369_v34, %v1711_v4  ;;  %v1771_v27 = vadd.f32 %v1739_v43, %v4173_v16 }
 0x1a7   : > { %v2131_v45 = vmul.f32 %v3501_v20, %v2094_v33  ;;  %v1466_v8 = vadd.f32 %v1420_v41, %v1352_v6  ;;  %v1809_v0 = vmul.f32 %v4423_v50, %v788_v13  ;;  %v4243_v31 = vmul.f32 %v4239_v21, %v4423_v50 }
 0x1a8   : > { %v2166_v14 = vadd.f32 %v4424_v62, %v2129_v29  ;;  %v1953_v40 = vmul.f32 %v3875_v42, %v1919_v28  ;;  %v1955_v11 = vmul.f32 %v3875_v42, %v1921_v35  ;;  %v1957_v16 = vmul.f32 %v3875_v42, %v1923_v51 }
 0x1a9   : > { %v2168_v9 = vadd.f32 %v4424_v62, %v2131_v45  ;;  %v1841_v38 = vrot.slane %v1809_v0, 1  ;;  %v1843_v17 = vrot.slane %v4243_v31, 1  ;;  %v730_v13 = vadd.f32 %v729_v24, %v700_v57  ;;  %v1287_v57 = vld [vmem:[#allocation2 + $0xc8] sm:$0x80] }
 0x1aa   : > { %v2198_v59 = vmax.f32 %v2166_v14, 0.0  ;;  %v1674_v50 = vadd.f32 %v1607_v61, %v4155_v54  ;;  %v1112_v18 = vmul.f32 %v3262_v5, %v1078_v37  ;;  %v2029_v28 = vrot.slane %v1953_v40, 2 }
 0x1ab   : > { %v2200_v56 = vmax.f32 %v2168_v9, 0.0  ;;  %v1288_v6 = vld [vmem:[#allocation2 + $0x198] sm:$0x7f]  ;;  %v1885_v48 = vadd.f32 %v1841_v38, %v1771_v27  ;;  %v2033_v51 = vrot.slane %v1955_v11, 2  ;;  %v2035_v61 = vrot.slane %v1957_v16, 2 }
 0x1ac   : > { %v2275_v53 = vrot.slane %v2198_v59, 7  ;;  %v1498_v60 = vld [vmem:[#allocation2 + $0x198] sm:$0xfe]  ;;  %v1322_v4 = vmul.f32 %v4430_v49, %v1288_v6  ;;  %v752_v5 = vmul.f32 %v4425_v30, %v730_v13  ;;  %v1192_v27 = vrot.slane %v1112_v18, 2  ;;  %v1497_v11 = vld [vmem:[#allocation2 + $0xd0] sm:$0x1] }
 0x1ad   : > { %v1532_v33 = vmul.f32 %v4431_v19, %v1498_v60  ;;  %v1707_v29 = vld [vmem:[#allocation2 + $0x198] sm:$0x7f]  ;;  %v2276_v35 = vrot.slane %v2200_v56, 7  ;;  %v1501_v30 = vld [vmem:[#allocation2 + $0x70] sm:$0x1]  ;;  %v1673_v16 = vadd.f32 %v1605_v15, %v4183_v39  ;;  %v1531_v60 = vmul.f32 %v3344_v10, %v1497_v11 }
 0x1ae   : > { %v1917_v43 = vld [vmem:[#allocation2 + $0x198] sm:$0xfe]  ;;  %v1741_v45 = vmul.f32 %v3369_v34, %v1707_v29  ;;  %v1354_v24 = vadd.f32 %v1322_v4, %v1256_v23  ;;  %v1321_v34 = vmul.f32 %v3302_v32, %v1287_v57  ;;  %v773_v40 = vadd.f32 %v4441_v44, %v752_v5  ;;  %v1922_v5 = vld [vmem:[#allocation2 + $0x30] sm:$0xfe] }
 0x1af   : > { %v1951_v14 = vmul.f32 %v3875_v42, %v1917_v43  ;;  %v1610_v54 = vrot.slane %v1532_v33, 2  ;;  %v2277_v49 = vsel %vm2241_vm1, %v2275_v53, %v2276_v35  ;;  %v4274_v39 = vmul.f32 %v3344_v10, %v1501_v30  ;;  %v1712_v43 = vld [vmem:[#allocation2 + $0x30] sm:$0x7f] }
 0x1b0   : > { %v1773_v19 = vadd.f32 %v1741_v45, %v1674_v50  ;;  %2329 = vst [vmem:[%s3356_s23 + $0xb8] sm:$0xff] %v2277_v49  ;;  %v1468_v31 = vadd.f32 %v1420_v41, %v1354_v24  ;;  %v2036_v41 = vsel %vm1145_vm0, %v2033_v51, %v2035_v61  ;;  %v789_v53 = vmax.f32 %v773_v40, 0.0 }
 0x1b1   : > { %v2027_v0 = vrot.slane %v1951_v14, 2  ;;  %v1613_v37 = vsel %vm1145_vm0, %v1610_v54, %v1612_v58  ;;  %v1676_v9 = vadd.f32 %v1610_v54, %v1466_v8  ;;  %v1353_v4 = vadd.f32 %v1321_v34, %v4208_v7 }
 0x1b2   : > { %v1887_v42 = vadd.f32 %v1841_v38, %v1773_v19  ;;  %v1678_v13 = vadd.f32 %v1613_v37, %v1468_v31  ;;  %v1193_v38 = vsel %vm1145_vm0, %v1189_v3, %v1192_v27  ;;  %866 = vst [vmem:[#allocation2 + $0xe8] sm:$0xff] %v789_v53  ;;  %v1389_v52 = vmul.f32 %v3317_v47, %v789_v53  ;;  %v1924_v37 = vld [vmem:[#allocation2 + $0x1c0] sm:$0x1] }
 0x1b3   : > { %v2030_v59 = vsel %vm1145_vm0, %v2027_v0, %v2029_v28  ;;  %v2095_v23 = vadd.f32 %v2027_v0, %v1885_v48  ;;  %v1775_v56 = vadd.f32 %v1743_v25, %v1676_v9  ;;  %v1706_v25 = vld [vmem:[#allocation2 + $0xc8] sm:$0x80]  ;;  %v1608_v29 = vrot.slane %v1531_v60, 2  ;;  %v1710_v48 = vld [vmem:[#allocation2 + $0x90] sm:$0x80]  ;;  %2335 = vst [vmem:[%s3356_s23 + $0xe8] sm:$0xff] %v789_v53 }
 0x1b4   : > { %v2097_v58 = vadd.f32 %v2030_v59, %v1887_v42  ;;  %v1777_v44 = vadd.f32 %v4235_v46, %v1678_v13  ;;  %v1257_v46 = vadd.f32 %v1193_v38, %v4203_v12  ;;  %v1614_v45 = vrot.slane %v4274_v39, 2  ;;  %v1920_v12 = vld [vmem:[#allocation2 + $0x70] sm:$0x1] }
 0x1b5   : > { %v2132_v8 = vmul.f32 %v3422_v22, %v2095_v23  ;;  %v1889_v6 = vadd.f32 %v1843_v17, %v1775_v56  ;;  %v1740_v14 = vmul.f32 %v4419_v36, %v1706_v25  ;;  %v1421_v24 = vrot.slane %v1389_v52, 1 }
 0x1b6   : > { %v2134_v50 = vmul.f32 %v3422_v22, %v2097_v58  ;;  %v1891_v3 = vadd.f32 %v1843_v17, %v1777_v44  ;;  %v1609_v47 = vsel %vm1145_vm0, %v1605_v15, %v1608_v29  ;;  %v1744_v54 = vmul.f32 %v4419_v36, %v1710_v48 }
 0x1b7   : > { %v2169_v18 = vadd.f32 %v4454_v2, %v2132_v8  ;;  %v2099_v33 = vadd.f32 %v2033_v51, %v1889_v6  ;;  %v1746_v61 = vmul.f32 %v4419_v36, %v1712_v43  ;;  %v1467_v0 = vadd.f32 %v1421_v24, %v1353_v4 }
 0x1b8   : > { %v2171_v28 = vadd.f32 %v4454_v2, %v2134_v50  ;;  %v2101_v57 = vadd.f32 %v2036_v41, %v1891_v3  ;;  %v1810_v27 = vmul.f32 %v4453_v1, %v789_v53  ;;  %v1675_v55 = vadd.f32 %v1609_v47, %v4216_v26 }
 0x1b9   : > { %v2201_v35 = vmax.f32 %v2169_v18, 0.0  ;;  %v2136_v7 = vmul.f32 %v3422_v22, %v2099_v33  ;;  %v1812_v15 = vmul.f32 %v4239_v21, %v4453_v1  ;;  %v1954_v9 = vmul.f32 %v3946_v63, %v1920_v12  ;;  %v1289_v59 = vld [vmem:[#allocation2 + $0xe8] sm:$0x7f] }
 0x1ba   : > { %v2203_v17 = vmax.f32 %v2171_v28, 0.0  ;;  %v2138_v49 = vmul.f32 %v3422_v22, %v2101_v57  ;;  %v1499_v22 = vld [vmem:[#allocation2 + $0xe8] sm:$0xfe]  ;;  %v1772_v23 = vadd.f32 %v1740_v14, %v1673_v16  ;;  %v1956_v40 = vmul.f32 %v3946_v63, %v1922_v5 }
 0x1bb   : > { %v2278_v51 = vrot.slane %v2201_v35, 7  ;;  %v2173_v19 = vadd.f32 %v4454_v2, %v2136_v7  ;;  %v1323_v30 = vmul.f32 %v3302_v32, %v1289_v59  ;;  %v1533_v26 = vmul.f32 %v3344_v10, %v1499_v22  ;;  %v1708_v13 = vld [vmem:[#allocation2 + $0xe8] sm:$0x7f] }
 0x1bc   : > { %v2279_v31 = vrot.slane %v2203_v17, 7  ;;  %v2175_v34 = vadd.f32 %v4454_v2, %v2138_v49  ;;  %v1842_v1 = vrot.slane %v1810_v27, 1  ;;  %v1918_v21 = vld [vmem:[#allocation2 + $0xe8] sm:$0xfe]  ;;  %v1742_v41 = vmul.f32 %v4419_v36, %v1708_v13 }
 0x1bd   : > { %v2205_v42 = vmax.f32 %v2173_v19, 0.0  ;;  %v1844_v2 = vrot.slane %v1812_v15, 1  ;;  %v1958_v58 = vmul.f32 %v3946_v63, %v1924_v37  ;;  %v1355_v8 = vadd.f32 %v1323_v30, %v1257_v46 }
 0x1be   : > { %v2280_v11 = vsel %vm2241_vm1, %v2278_v51, %v2279_v31  ;;  %v2207_v56 = vmax.f32 %v2175_v34, 0.0  ;;  %v1611_v16 = vrot.slane %v1533_v26, 2  ;;  %v1952_v53 = vmul.f32 %v3946_v63, %v1918_v21 }
 0x1bf   : > { %2332 = vst [vmem:[%s3356_s23 + $0xd0] sm:$0xff] %v2280_v11  ;;  %v2031_v38 = vrot.slane %v1954_v9, 2  ;;  %v2284_v44 = vrot.slane %v2205_v42, 7  ;;  %v1774_v6 = vadd.f32 %v1742_v41, %v1675_v55  ;;  %v1886_v10 = vadd.f32 %v1842_v1, %v1772_v23 }
 0x1c0   : > { %v2285_v32 = vrot.slane %v2207_v56, 7  ;;  %v1469_v60 = vadd.f32 %v1421_v24, %v1355_v8  ;;  %v1615_v39 = vsel %vm1145_vm0, %v1611_v16, %v1614_v45  ;;  %v1677_v25 = vadd.f32 %v1611_v16, %v1467_v0 }
 0x1c1   : > { %v2028_v50 = vrot.slane %v1952_v53, 2  ;;  %v1888_v18 = vadd.f32 %v1842_v1, %v1774_v6  ;;  %v2034_v4 = vrot.slane %v1956_v40, 2  ;;  %v2037_v52 = vrot.slane %v1958_v58, 2 }
 0x1c2   : > { %v2286_v36 = vsel %vm2241_vm1, %v2284_v44, %v2285_v32  ;;  %v1679_v3 = vadd.f32 %v1615_v39, %v1469_v60  ;;  %v1776_v33 = vadd.f32 %v1744_v54, %v1677_v25 }
 0x1c3   : > { %2336 = vst [vmem:[%s3356_s23 + $0xf0] sm:$0xff] %v2286_v36  ;;  %v2032_v63 = vsel %vm1145_vm0, %v2028_v50, %v2031_v38  ;;  %v2096_v46 = vadd.f32 %v2028_v50, %v1886_v10  ;;  %v2038_v35 = vsel %vm1145_vm0, %v2034_v4, %v2037_v52 }
 0x1c4   : > { %v2098_v29 = vadd.f32 %v2032_v63, %v1888_v18  ;;  %v1778_v48 = vadd.f32 %v1746_v61, %v1679_v3  ;;  %v1890_v43 = vadd.f32 %v1844_v2, %v1776_v33 }
 0x1c5   : > { %v2133_v28 = vmul.f32 %v3501_v20, %v2096_v46 }
 0x1c6   : > { %v2135_v45 = vmul.f32 %v3501_v20, %v2098_v29  ;;  %v1892_v14 = vadd.f32 %v1844_v2, %v1778_v48  ;;  %v2100_v57 = vadd.f32 %v2034_v4, %v1890_v43 }
 0x1c7   : > { %v2170_v7 = vadd.f32 %v4424_v62, %v2133_v28 }
 0x1c8   : > { %v2172_v24 = vadd.f32 %v4424_v62, %v2135_v45  ;;  %v2102_v47 = vadd.f32 %v2038_v35, %v1892_v14  ;;  %v2137_v12 = vmul.f32 %v3501_v20, %v2100_v57 }
 0x1c9   : > { %v2202_v17 = vmax.f32 %v2170_v7, 0.0 }
 0x1ca   : > { %v2204_v51 = vmax.f32 %v2172_v24, 0.0  ;;  %v2139_v54 = vmul.f32 %v3501_v20, %v2102_v47  ;;  %v2174_v61 = vadd.f32 %v4424_v62, %v2137_v12 }
 0x1cb   : > { %v2281_v5 = vrot.slane %v2202_v17, 7 }
 0x1cc   : > { %v2282_v49 = vrot.slane %v2204_v51, 7  ;;  %v2176_v19 = vadd.f32 %v4424_v62, %v2139_v54  ;;  %v2206_v0 = vmax.f32 %v2174_v61, 0.0 }
 0x1ce   : > { %v2283_v27 = vsel %vm2241_vm1, %v2281_v5, %v2282_v49  ;;  %v2208_v31 = vmax.f32 %v2176_v19, 0.0  ;;  %v2287_v55 = vrot.slane %v2206_v0, 7 }
 0x1cf   : > { %2333 = vst [vmem:[%s3356_s23 + $0xd8] sm:$0xff] %v2283_v27 }
 0x1d0   : > { %v2288_v15 = vrot.slane %v2208_v31, 7 }
 0x1d2   : > { %v2289_v37 = vsel %vm2241_vm1, %v2287_v55, %v2288_v15 }
 0x1d3   : > { %2337 = vst [vmem:[%s3356_s23 + $0xf8] sm:$0xff] %v2289_v37 }
 0x1d4 PF: > { %p20_p3 = scmp.ge.s32.totalorder %s3139_s10, 4   ;;  %s4456_s24 = smov %s3006_s25 }
 0x1d5   : > { %s4457_s25 = smov %s3010_s26  ;;  %s4458_s26 = smov %s3150_s16 }
 0x1d6   : > { %s4459_s27 = smov %s3139_s10  ;;  %22 = sbr.rel (!%p20_p3) target bundleno = 6 (0x6), region = 114 }
 0x1db   :  { %2359 = vsyncpa [#allocation4], 1 }
 0x1dc   :  { %2361 = vsyncpa [#allocation4 + $0x1], 1 }
 0x1dd   :  { %2362 = vsyncpa [#allocation6], 1 }
 0x1de   :  { %2363 = vsyncpa [#allocation9], 1 }
 0x1df   :  { %2364 = vsyncpa [#allocation12], 1 }

</bundles_post_ra>
